<compile_context>
chip_gen: v5e
topology: v5e:2x2
jax: 0.10.0
libtpu: 0.0.40
codegen_flags: <defaults>
</compile_context>

<pallas_src>
import functools

import jax
import jax.numpy as jnp
from jax.experimental import pallas as pl
from jax.experimental.pallas import tpu as pltpu

LN_EPS = 1e-5


def _round_up(x, m):
    return (x + m - 1) // m * m


def _cdiv(a, b):
    return (a + b - 1) // b


def _edge_cls_kernel(
    feat_ref,                    # (2, TILE, D)  both edge directions
    w1_ref, ln1_ref,             # (D, H1) pre-scaled by 0.5, (3, H1)=[b;g;beta]
    w2_ref, ln2_ref,             # (H1, H2), (3, H2)
    w3_ref,                      # (1, H2)  final linear weights (row)
    b3_ref,                      # (1, 1)   final bias, SMEM scalar
    ne_ref,                      # (1,)     number of valid edges, SMEM scalar
    prob_ref,                    # (1, 1, TILE) sigmoid output, lane-dense
):
    f32 = jnp.float32
    tile = feat_ref.shape[1]

    # --- avg_edge_features folded into the MXU -----------------------------
    # mean(f0, f1) @ W1 == f0 @ (0.5*W1) + f1 @ (0.5*W1); f32 accumulate.
    h = (jnp.dot(feat_ref[0], w1_ref[...], preferred_element_type=f32) +
         jnp.dot(feat_ref[1], w1_ref[...], preferred_element_type=f32))

    # Mask padded tail rows (the grid may over-run the edge count); this keeps
    # the padded rows on a deterministic bias-only path (equivalent to the old
    # explicit zero-padding) instead of letting stale-VMEM bits flow through.
    row = pl.program_id(0) * tile + jax.lax.broadcasted_iota(
        jnp.int32, (tile, 1), 0)
    h = jnp.where(row < ne_ref[0], h, 0.0)

    def ln_relu(x, ln_ref):
        x = x + ln_ref[0:1, :]                         # linear bias
        # One-pass LayerNorm statistics in f32 (no bf16 VPU/EUP on v5e).
        hdim = x.shape[-1]
        inv_h = 1.0 / hdim
        s1 = jnp.sum(x, axis=-1, keepdims=True)
        s2 = jnp.sum(x * x, axis=-1, keepdims=True)
        mu = s1 * inv_h
        var = s2 * inv_h - mu * mu
        x = (x - mu) * jax.lax.rsqrt(var + LN_EPS)
        x = x * ln_ref[1:2, :] + ln_ref[2:3, :]        # gamma / beta
        # TODO(synk): training-mode dropout (pltpu.prng_random_bits) omitted —
        # identity in eval/inference.
        return jnp.maximum(x, 0.0)

    h = ln_relu(h, ln1_ref)
    h = ln_relu(jnp.dot(h.astype(w2_ref.dtype), w2_ref[...],
                        preferred_element_type=f32), ln2_ref)

    # --- final Linear(H2, 1) + sigmoid --------------------------------------
    # VPU multiply + lane reduce instead of an N=1 MXU matmul; store the
    # probabilities lane-dense as a (1, 1, TILE) row.
    # TODO(synk): if the bundle shows the sublane->lane relayout here makes
    # XLU the binding slot, compute layer 2 transposed so this reduce lands
    # lane-dense directly.
    logits = jnp.sum(h * w3_ref[...], axis=-1) + b3_ref[0, 0]   # (TILE,)
    prob_ref[0, 0, :] = jax.nn.sigmoid(logits)


@functools.partial(jax.jit, static_argnames=("tile",))
def edge_cls_head_inference(edge_features, edge_index, params, *, tile=None):
    """Pallas implementation of EdgeClsHead.inference.

    edge_features: (2*E, D) — directed edge features (two directions per edge,
                   direction-major as produced by reshape(2, -1, D)).  Matmul
                   operands use this array's dtype directly (no wrapper cast):
                   hand over bf16 if you want bf16 MXU operands / half the
                   feature HBM traffic.
    edge_index:    (2, 2*E) int — directed edge endpoints.
    params:        (w1, b1, g1, be1, w2, b2, g2, be2, w3, b3) with weights
                   stored (in, out) so the kernel computes x @ W.
    Returns (pred_probs (E, 1) f32, edge_idxs (E, 2)).
    """
    two_e, d = edge_features.shape
    e = two_e // 2

    # Adaptive tile: ~4-8 balanced pipeline steps (even counts at realistic E,
    # so both v7x TensorCores get equal work), padding waste < 128 rows, and a
    # cap so the lane-padded f32 feature block (2*tile*128*4 B, x2 buffers)
    # stays comfortably inside v7x's 64 MiB VMEM / default scoped limit.
    if tile is None:
        target_steps = 8
        tile = _round_up(max(1, _cdiv(e, target_steps)), 128)
        tile = min(tile, 4096)
    tile = max(128, _round_up(int(tile), 128))
    n_tiles = max(1, _cdiv(e, tile))
    e_pad = n_tiles * tile

    (w1, b1, g1, be1, w2, b2, g2, be2, w3, b3) = params
    h1 = w1.shape[1]
    h2 = w2.shape[1]

    # (2*E, D) -> (2, E, D) is a free row-major reshape.  No pad, no cast:
    # the kernel masks the tail rows and reads the producer's dtype directly.
    feats = edge_features.reshape(2, e, d)
    mm_dtype = edge_features.dtype

    f32 = jnp.float32
    w1_half = (0.5 * w1.astype(f32)).astype(mm_dtype)           # fold the mean
    w2c = w2.astype(mm_dtype)
    ln1 = jnp.concatenate([b1, g1, be1], axis=0).astype(f32)    # (3, H1)
    ln2 = jnp.concatenate([b2, g2, be2], axis=0).astype(f32)    # (3, H2)
    w3row = w3.reshape(1, h2).astype(f32)                       # (1, H2)
    b3s = b3.reshape(1, 1).astype(f32)                          # SMEM scalar
    ne = jnp.array([e], dtype=jnp.int32)                        # SMEM scalar

    def const2(i):
        return (0, 0)

    out = pl.pallas_call(
        _edge_cls_kernel,
        out_shape=jax.ShapeDtypeStruct((n_tiles, 1, tile), jnp.float32),
        grid_spec=pltpu.PrefetchScalarGridSpec(
            num_scalar_prefetch=0,
            grid=(n_tiles,),
            in_specs=[
                pl.BlockSpec((2, tile, d), lambda i: (0, i, 0)),   # features
                pl.BlockSpec((d, h1), const2),                     # 0.5*w1
                pl.BlockSpec((3, h1), const2),                     # b1/g1/be1
                pl.BlockSpec((h1, h2), const2),                    # w2
                pl.BlockSpec((3, h2), const2),                     # b2/g2/be2
                pl.BlockSpec((1, h2), const2),                     # w3 row
                pl.BlockSpec(memory_space=pltpu.MemorySpace.SMEM), # b3 scalar
                pl.BlockSpec(memory_space=pltpu.MemorySpace.SMEM), # num edges
            ],
            out_specs=pl.BlockSpec((1, 1, tile), lambda i: (i, 0, 0)),
        ),
        compiler_params=pltpu.CompilerParams(
            dimension_semantics=("parallel",)),
    )(feats, w1_half, ln1, w2c, ln2, w3row, b3s, ne)

    probs = out.reshape(e_pad, 1)[:e]                           # drop padding

    # edge_idxs glue: edge_idxs[:, mask].chunk(2, dim=1)[0].permute(1, 0)
    # TODO(synk): the per-batch boolean `batch_masks` selection is
    # data-dependent-shape and left to the caller; this is the unmasked form.
    edge_idxs = edge_index[:, :e].T                             # (E, 2)
    return probs, edge_idxs

    # TODO(synk): forward_edge_cls / loss_edge_cls (torch.nonzero over gt ids,
    # boolean-mask edge gathers, BCE loss) are data-dependent-shape graph ops
    # with no clean static Pallas equivalent; not implemented here.


def _reference(edge_features, params):
    """Pure-JAX f32 reference of the same math for a correctness check."""
    (w1, b1, g1, be1, w2, b2, g2, be2, w3, b3) = params
    e = edge_features.shape[0] // 2
    avg = 0.5 * (edge_features[:e] + edge_features[e:])

    def ln(x, g, be):
        mu = jnp.mean(x, axis=-1, keepdims=True)
        var = jnp.mean(jnp.square(x - mu), axis=-1, keepdims=True)
        return (x - mu) * jax.lax.rsqrt(var + LN_EPS) * g + be

    h = jnp.maximum(ln(avg @ w1 + b1, g1, be1), 0.0)
    h = jnp.maximum(ln(h @ w2 + b2, g2, be2), 0.0)
    return jax.nn.sigmoid(h @ w3 + b3)


def init_params(key, in_dim, fc_dims):
    """Deterministic synthetic params for edge_predictor.

    Weights stored as (in, out) so the kernel does x @ W (PyTorch Linear
    stores (out, in) and computes x @ W.T — same math).
    """
    dims = [in_dim] + list(fc_dims)
    keys = jax.random.split(key, 2 * len(fc_dims) + 2)
    params = []
    ki = 0
    for li in range(len(fc_dims)):
        fan_in, fan_out = dims[li], dims[li + 1]
        w = jax.random.normal(keys[ki], (fan_in, fan_out), jnp.float32) * 0.1
        b = jax.random.normal(keys[ki + 1], (1, fan_out), jnp.float32) * 0.01
        gamma = jnp.ones((1, fan_out), jnp.float32)
        beta = jnp.zeros((1, fan_out), jnp.float32)
        params += [w, b, gamma, beta]
        ki += 2
    w3 = jax.random.normal(keys[ki], (fc_dims[-1], 1), jnp.float32) * 0.1
    b3 = jax.random.normal(keys[ki + 1], (1, 1), jnp.float32) * 0.01
    params += [w3, b3]
    return tuple(params)


if __name__ == "__main__":
    key = jax.random.PRNGKey(0)
    k_feat, k_param = jax.random.split(key)

    # cfg.IN_DIM = 32, cfg.FC_DIMS = [32, 32]
    IN_DIM = 32
    FC_DIMS = (32, 32)
    NUM_EDGES = 1500           # undirected edges (not a multiple of the tile)
    NUM_DIRECTED = 2 * NUM_EDGES

    edge_features = jax.random.normal(
        k_feat, (NUM_DIRECTED, IN_DIM), jnp.float32)
    edge_index = jnp.stack([
        jnp.arange(NUM_DIRECTED, dtype=jnp.int32) % 17,
        (jnp.arange(NUM_DIRECTED, dtype=jnp.int32) * 3) % 23,
    ], axis=0)                                            # (2, 2*E)

    params = init_params(k_param, IN_DIM, FC_DIMS)
    ref = _reference(edge_features, params)

    # f32 feature path (adaptive tile) — should match the reference tightly.
    probs_f32, edge_idxs = edge_cls_head_inference(
        edge_features, edge_index, params)
    probs_f32 = jax.block_until_ready(probs_f32)

    # Producer-supplied bf16 features — bf16 MXU operands, looser tolerance.
    probs_bf16, _ = edge_cls_head_inference(
        edge_features.astype(jnp.bfloat16), edge_index, params)
    probs_bf16 = jax.block_until_ready(probs_bf16)

    # Explicit-tile path (exercises the non-adaptive branch).
    probs_t512, _ = edge_cls_head_inference(
        edge_features, edge_index, params, tile=512)
    probs_t512 = jax.block_until_ready(probs_t512)

    assert probs_f32.shape == (NUM_EDGES, 1)
    assert probs_bf16.shape == (NUM_EDGES, 1)
    assert probs_t512.shape == (NUM_EDGES, 1)
    assert edge_idxs.shape == (NUM_EDGES, 2)

    err_f32 = float(jnp.max(jnp.abs(probs_f32 - ref)))
    err_bf16 = float(jnp.max(jnp.abs(probs_bf16 - ref)))
    err_t512 = float(jnp.max(jnp.abs(probs_t512 - ref)))
    assert err_f32 < 1e-4, err_f32
    assert err_t512 < 1e-4, err_t512
    assert err_bf16 < 2e-2, err_bf16

    print("KERNEL_OK")
</pallas_src>

<mosaic_0001>
module attributes {stable_mosaic.version = 11 : i64} {
  func.func @_edge_cls_kernel(%arg0: i32, %arg1: memref<2x256x32xf32, #tpu.memory_space<vmem>>, %arg2: memref<32x32xf32, #tpu.memory_space<vmem>>, %arg3: memref<3x32xf32, #tpu.memory_space<vmem>>, %arg4: memref<32x32xf32, #tpu.memory_space<vmem>>, %arg5: memref<3x32xf32, #tpu.memory_space<vmem>>, %arg6: memref<1x32xf32, #tpu.memory_space<vmem>>, %arg7: memref<1x1xf32, #tpu.memory_space<smem>>, %arg8: memref<1xi32, #tpu.memory_space<smem>>, %arg9: memref<1x1x256xf32, #tpu.memory_space<vmem>>) attributes {dimension_semantics = [#tpu.dimension_semantics<parallel>], iteration_bounds = array<i64: 6>, scalar_prefetch = 0 : i64, scratch_operands = 0 : i64, tpu.core_type = #tpu.core_type<tc>, window_params = [{transform_indices = @transform_0, window_bounds = array<i64: 2, 256, 32>}, {pipeline_mode = #tpu.pipeline_mode<synchronous>, transform_indices = @transform_1, window_bounds = array<i64: 32, 32>}, {pipeline_mode = #tpu.pipeline_mode<synchronous>, transform_indices = @transform_2, window_bounds = array<i64: 3, 32>}, {pipeline_mode = #tpu.pipeline_mode<synchronous>, transform_indices = @transform_3, window_bounds = array<i64: 32, 32>}, {pipeline_mode = #tpu.pipeline_mode<synchronous>, transform_indices = @transform_4, window_bounds = array<i64: 3, 32>}, {pipeline_mode = #tpu.pipeline_mode<synchronous>, transform_indices = @transform_5, window_bounds = array<i64: 1, 32>}, {transform_indices = @transform_6, window_bounds = array<i64: 1, 1>}, {transform_indices = @transform_7, window_bounds = array<i64: 1>}, {transform_indices = @transform_8, window_bounds = array<i64: 1, 1, 256>}]} {
    %c0 = arith.constant 0 : index
    %c0_0 = arith.constant 0 : index
    %c0_1 = arith.constant 0 : index
    %0 = vector.load %arg1[%c0, %c0_0, %c0_1] : memref<2x256x32xf32, #tpu.memory_space<vmem>>, vector<1x256x32xf32>
    %1 = vector.shape_cast %0 : vector<1x256x32xf32> to vector<256x32xf32>
    %c0_2 = arith.constant 0 : index
    %c0_3 = arith.constant 0 : index
    %2 = vector.load %arg2[%c0_2, %c0_3] : memref<32x32xf32, #tpu.memory_space<vmem>>, vector<32x32xf32>
    %cst = arith.constant dense<0.000000e+00> : vector<256x32xf32>
    %3 = tpu.matmul %1, %2, %cst {dimension_numbers = #tpu.dot_dimension_numbers<[1], [0], [0], [1], [0, 0, 1, 1], [], []>} : vector<256x32xf32>, vector<32x32xf32>, vector<256x32xf32> -> vector<256x32xf32>
    %c1 = arith.constant 1 : index
    %c0_4 = arith.constant 0 : index
    %c0_5 = arith.constant 0 : index
    %4 = vector.load %arg1[%c1, %c0_4, %c0_5] : memref<2x256x32xf32, #tpu.memory_space<vmem>>, vector<1x256x32xf32>
    %5 = vector.shape_cast %4 : vector<1x256x32xf32> to vector<256x32xf32>
    %c0_6 = arith.constant 0 : index
    %c0_7 = arith.constant 0 : index
    %6 = vector.load %arg2[%c0_6, %c0_7] : memref<32x32xf32, #tpu.memory_space<vmem>>, vector<32x32xf32>
    %cst_8 = arith.constant dense<0.000000e+00> : vector<256x32xf32>
    %7 = tpu.matmul %5, %6, %cst_8 {dimension_numbers = #tpu.dot_dimension_numbers<[1], [0], [0], [1], [0, 0, 1, 1], [], []>} : vector<256x32xf32>, vector<32x32xf32>, vector<256x32xf32> -> vector<256x32xf32>
    %8 = arith.addf %3, %7 : vector<256x32xf32>
    %c256_i32 = arith.constant 256 : i32
    %9 = arith.muli %arg0, %c256_i32 : i32
    %10 = tpu.iota {dimensions = array<i32: 0>} : vector<256x1xi32>
    %11 = vector.broadcast %9 : i32 to vector<256x1xi32>
    %12 = arith.addi %11, %10 : vector<256x1xi32>
    %c0_9 = arith.constant 0 : index
    %13 = memref.load %arg8[%c0_9] : memref<1xi32, #tpu.memory_space<smem>>
    %14 = vector.broadcast %13 : i32 to vector<256x1xi32>
    %15 = arith.cmpi slt, %12, %14 : vector<256x1xi32>
    %cst_10 = arith.constant 0.000000e+00 : f32
    %16 = vector.shape_cast %15 : vector<256x1xi1> to vector<256x1xi1>
    %17 = vector.broadcast %16 : vector<256x1xi1> to vector<256x32xi1>
    %18 = vector.broadcast %cst_10 : f32 to vector<256x32xf32>
    %19 = arith.select %17, %8, %18 : vector<256x32xi1>, vector<256x32xf32>
    %c0_11 = arith.constant 0 : index
    %c0_12 = arith.constant 0 : index
    %20 = vector.load %arg3[%c0_11, %c0_12] : memref<3x32xf32, #tpu.memory_space<vmem>>, vector<1x32xf32>
    %21 = vector.broadcast %20 : vector<1x32xf32> to vector<256x32xf32>
    %22 = arith.addf %19, %21 : vector<256x32xf32>
    %cst_13 = arith.constant dense<0.000000e+00> : vector<256xf32>
    %23 = vector.multi_reduction <add>, %22, %cst_13 [1] : vector<256x32xf32> to vector<256xf32>
    %24 = vector.shape_cast %23 : vector<256xf32> to vector<256x1xf32>
    %25 = arith.mulf %22, %22 : vector<256x32xf32>
    %cst_14 = arith.constant dense<0.000000e+00> : vector<256xf32>
    %26 = vector.multi_reduction <add>, %25, %cst_14 [1] : vector<256x32xf32> to vector<256xf32>
    %27 = vector.shape_cast %26 : vector<256xf32> to vector<256x1xf32>
    %cst_15 = arith.constant 3.125000e-02 : f32
    %28 = vector.broadcast %cst_15 : f32 to vector<256x1xf32>
    %29 = arith.mulf %24, %28 : vector<256x1xf32>
    %cst_16 = arith.constant 3.125000e-02 : f32
    %30 = vector.broadcast %cst_16 : f32 to vector<256x1xf32>
    %31 = arith.mulf %27, %30 : vector<256x1xf32>
    %32 = arith.mulf %29, %29 : vector<256x1xf32>
    %33 = arith.subf %31, %32 : vector<256x1xf32>
    %34 = vector.broadcast %29 : vector<256x1xf32> to vector<256x32xf32>
    %35 = arith.subf %22, %34 : vector<256x32xf32>
    %cst_17 = arith.constant 9.99999974E-6 : f32
    %36 = vector.broadcast %cst_17 : f32 to vector<256x1xf32>
    %37 = arith.addf %33, %36 : vector<256x1xf32>
    %38 = math.rsqrt %37 : vector<256x1xf32>
    %39 = vector.broadcast %38 : vector<256x1xf32> to vector<256x32xf32>
    %40 = arith.mulf %35, %39 : vector<256x32xf32>
    %c1_18 = arith.constant 1 : index
    %c0_19 = arith.constant 0 : index
    %41 = vector.load %arg3[%c1_18, %c0_19] : memref<3x32xf32, #tpu.memory_space<vmem>>, vector<1x32xf32>
    %42 = vector.broadcast %41 : vector<1x32xf32> to vector<256x32xf32>
    %43 = arith.mulf %40, %42 : vector<256x32xf32>
    %c2 = arith.constant 2 : index
    %c0_20 = arith.constant 0 : index
    %44 = vector.load %arg3[%c2, %c0_20] : memref<3x32xf32, #tpu.memory_space<vmem>>, vector<1x32xf32>
    %45 = vector.broadcast %44 : vector<1x32xf32> to vector<256x32xf32>
    %46 = arith.addf %43, %45 : vector<256x32xf32>
    %cst_21 = arith.constant 0.000000e+00 : f32
    %47 = vector.broadcast %cst_21 : f32 to vector<256x32xf32>
    %48 = arith.maximumf %46, %47 : vector<256x32xf32>
    %c0_22 = arith.constant 0 : index
    %c0_23 = arith.constant 0 : index
    %49 = vector.load %arg4[%c0_22, %c0_23] : memref<32x32xf32, #tpu.memory_space<vmem>>, vector<32x32xf32>
    %cst_24 = arith.constant dense<0.000000e+00> : vector<256x32xf32>
    %50 = tpu.matmul %48, %49, %cst_24 {dimension_numbers = #tpu.dot_dimension_numbers<[1], [0], [0], [1], [0, 0, 1, 1], [], []>} : vector<256x32xf32>, vector<32x32xf32>, vector<256x32xf32> -> vector<256x32xf32>
    %c0_25 = arith.constant 0 : index
    %c0_26 = arith.constant 0 : index
    %51 = vector.load %arg5[%c0_25, %c0_26] : memref<3x32xf32, #tpu.memory_space<vmem>>, vector<1x32xf32>
    %52 = vector.broadcast %51 : vector<1x32xf32> to vector<256x32xf32>
    %53 = arith.addf %50, %52 : vector<256x32xf32>
    %cst_27 = arith.constant dense<0.000000e+00> : vector<256xf32>
    %54 = vector.multi_reduction <add>, %53, %cst_27 [1] : vector<256x32xf32> to vector<256xf32>
    %55 = vector.shape_cast %54 : vector<256xf32> to vector<256x1xf32>
    %56 = arith.mulf %53, %53 : vector<256x32xf32>
    %cst_28 = arith.constant dense<0.000000e+00> : vector<256xf32>
    %57 = vector.multi_reduction <add>, %56, %cst_28 [1] : vector<256x32xf32> to vector<256xf32>
    %58 = vector.shape_cast %57 : vector<256xf32> to vector<256x1xf32>
    %cst_29 = arith.constant 3.125000e-02 : f32
    %59 = vector.broadcast %cst_29 : f32 to vector<256x1xf32>
    %60 = arith.mulf %55, %59 : vector<256x1xf32>
    %cst_30 = arith.constant 3.125000e-02 : f32
    %61 = vector.broadcast %cst_30 : f32 to vector<256x1xf32>
    %62 = arith.mulf %58, %61 : vector<256x1xf32>
    %63 = arith.mulf %60, %60 : vector<256x1xf32>
    %64 = arith.subf %62, %63 : vector<256x1xf32>
    %65 = vector.broadcast %60 : vector<256x1xf32> to vector<256x32xf32>
    %66 = arith.subf %53, %65 : vector<256x32xf32>
    %cst_31 = arith.constant 9.99999974E-6 : f32
    %67 = vector.broadcast %cst_31 : f32 to vector<256x1xf32>
    %68 = arith.addf %64, %67 : vector<256x1xf32>
    %69 = math.rsqrt %68 : vector<256x1xf32>
    %70 = vector.broadcast %69 : vector<256x1xf32> to vector<256x32xf32>
    %71 = arith.mulf %66, %70 : vector<256x32xf32>
    %c1_32 = arith.constant 1 : index
    %c0_33 = arith.constant 0 : index
    %72 = vector.load %arg5[%c1_32, %c0_33] : memref<3x32xf32, #tpu.memory_space<vmem>>, vector<1x32xf32>
    %73 = vector.broadcast %72 : vector<1x32xf32> to vector<256x32xf32>
    %74 = arith.mulf %71, %73 : vector<256x32xf32>
    %c2_34 = arith.constant 2 : index
    %c0_35 = arith.constant 0 : index
    %75 = vector.load %arg5[%c2_34, %c0_35] : memref<3x32xf32, #tpu.memory_space<vmem>>, vector<1x32xf32>
    %76 = vector.broadcast %75 : vector<1x32xf32> to vector<256x32xf32>
    %77 = arith.addf %74, %76 : vector<256x32xf32>
    %cst_36 = arith.constant 0.000000e+00 : f32
    %78 = vector.broadcast %cst_36 : f32 to vector<256x32xf32>
    %79 = arith.maximumf %77, %78 : vector<256x32xf32>
    %c0_37 = arith.constant 0 : index
    %c0_38 = arith.constant 0 : index
    %80 = vector.load %arg6[%c0_37, %c0_38] : memref<1x32xf32, #tpu.memory_space<vmem>>, vector<1x32xf32>
    %81 = vector.broadcast %80 : vector<1x32xf32> to vector<256x32xf32>
    %82 = arith.mulf %79, %81 : vector<256x32xf32>
    %cst_39 = arith.constant dense<0.000000e+00> : vector<256xf32>
    %83 = vector.multi_reduction <add>, %82, %cst_39 [1] : vector<256x32xf32> to vector<256xf32>
    %c0_40 = arith.constant 0 : index
    %c0_41 = arith.constant 0 : index
    %84 = memref.load %arg7[%c0_40, %c0_41] : memref<1x1xf32, #tpu.memory_space<smem>>
    %85 = vector.broadcast %84 : f32 to vector<256xf32>
    %86 = arith.addf %83, %85 : vector<256xf32>
    %87 = arith.negf %86 : vector<256xf32>
    %88 = math.exp %87 : vector<256xf32>
    %cst_42 = arith.constant 1.000000e+00 : f32
    %89 = vector.broadcast %cst_42 : f32 to vector<256xf32>
    %90 = arith.addf %89, %88 : vector<256xf32>
    %91 = arith.divf %89, %90 : vector<256xf32>
    %c0_43 = arith.constant 0 : index
    %c0_44 = arith.constant 0 : index
    %c0_45 = arith.constant 0 : index
    %92 = vector.load %arg9[%c0_43, %c0_44, %c0_45] : memref<1x1x256xf32, #tpu.memory_space<vmem>>, vector<1x1x256xf32>
    %93 = vector.shape_cast %92 : vector<1x1x256xf32> to vector<256xf32>
    %94 = vector.shape_cast %91 : vector<256xf32> to vector<1x1x256xf32>
    tpu.vector_store %arg9[%c0_43, %c0_44, %c0_45], %94 {strides = array<i32>} : memref<1x1x256xf32, #tpu.memory_space<vmem>>, vector<1x1x256xf32>,
    return
  }
  func.func @transform_0(%arg0: i32) -> (i32, i32, i32) {
    %c0_i32 = arith.constant 0 : i32
    %c0_i32_0 = arith.constant 0 : i32
    %c0_i32_1 = arith.constant 0 : i32
    return %c0_i32, %arg0, %c0_i32_0 : i32, i32, i32
  }
  func.func @transform_1(%arg0: i32) -> (i32, i32) {
    %c0_i32 = arith.constant 0 : i32
    %c0_i32_0 = arith.constant 0 : i32
    %c0_i32_1 = arith.constant 0 : i32
    return %c0_i32, %c0_i32_0 : i32, i32
  }
  func.func @transform_2(%arg0: i32) -> (i32, i32) {
    %c0_i32 = arith.constant 0 : i32
    %c0_i32_0 = arith.constant 0 : i32
    %c0_i32_1 = arith.constant 0 : i32
    return %c0_i32, %c0_i32_0 : i32, i32
  }
  func.func @transform_3(%arg0: i32) -> (i32, i32) {
    %c0_i32 = arith.constant 0 : i32
    %c0_i32_0 = arith.constant 0 : i32
    %c0_i32_1 = arith.constant 0 : i32
    return %c0_i32, %c0_i32_0 : i32, i32
  }
  func.func @transform_4(%arg0: i32) -> (i32, i32) {
    %c0_i32 = arith.constant 0 : i32
    %c0_i32_0 = arith.constant 0 : i32
    %c0_i32_1 = arith.constant 0 : i32
    return %c0_i32, %c0_i32_0 : i32, i32
  }
  func.func @transform_5(%arg0: i32) -> (i32, i32) {
    %c0_i32 = arith.constant 0 : i32
    %c0_i32_0 = arith.constant 0 : i32
    %c0_i32_1 = arith.constant 0 : i32
    return %c0_i32, %c0_i32_0 : i32, i32
  }
  func.func @transform_6(%arg0: i32) -> (i32, i32) {
    %c0_i32 = arith.constant 0 : i32
    %c0_i32_0 = arith.constant 0 : i32
    %c0_i32_1 = arith.constant 0 : i32
    return %c0_i32, %c0_i32_0 : i32, i32
  }
  func.func @transform_7(%arg0: i32) -> i32 {
    %c0_i32 = arith.constant 0 : i32
    %c0_i32_0 = arith.constant 0 : i32
    return %c0_i32 : i32
  }
  func.func @transform_8(%arg0: i32) -> (i32, i32, i32) {
    %c0_i32 = arith.constant 0 : i32
    %c0_i32_0 = arith.constant 0 : i32
    %c0_i32_1 = arith.constant 0 : i32
    return %arg0, %c0_i32, %c0_i32_0 : i32, i32, i32
  }
}

</mosaic_0001>

<bundles_post_ra>
// kernel: edge_cls_head_inference.1
= control target key start
LH: loop header
LB: loop body
LE: loop exit
PB: predicated region body
PF: predicated region fallthrough
CT: control target
= control target key end

     0   :  { %s9294_s0 = inlined_call_operand.vmem [shape: f32[2,1500,32], index: 0, kind: input, shape index: {}]   ;;  %s9295_s1 = inlined_call_operand.vmem [shape: f32[32,32], index: 1, kind: input, shape index: {}]   ;;  %s9296_s2 = inlined_call_operand.vmem [shape: f32[3,32], index: 2, kind: input, shape index: {}]   ;;  %s9297_s3 = inlined_call_operand.vmem [shape: f32[32,32], index: 3, kind: input, shape index: {}]   ;;  %s9298_s4 = inlined_call_operand.vmem [shape: f32[3,32], index: 4, kind: input, shape index: {}]   ;;  %s9299_s5 = inlined_call_operand.vmem [shape: f32[1,32], index: 5, kind: input, shape index: {}]   ;;  %s9300_s6 = inlined_call_operand.<no memory space> [shape: f32[1,1], index: 6, kind: input, shape index: {}]   ;;  %s9301_s7 = inlined_call_operand.<no memory space> [shape: s32[1], index: 7, kind: input, shape index: {}]   ;;  %s9302_s8 = inlined_call_operand.hbm [shape: f32[6,1,256], index: 8, kind: output, shape index: {}]  }
   0x1   :  { %13 = sst [smem:[#allocation2]] %s9300_s6 }
   0x2   :  { %14 = sst [smem:[#allocation3]] %s9301_s7 }
   0x3   :  { %15 = vsyncpa [#allocation6], 0 }
   0x4   :  { %17 = vsyncpa [#allocation6 + $0x1], 0  ;;  %s5665_s9 = smov 0   ;;  %s5667_s10 = smov 0  }
   0x5   :  { %s5669_s11 = smov 0   ;;  %s5671_s12 = smov 0  }
   0x6 LB: > { %s5686_s6 = sadd.s32 4294967295, %s5579_s12   ;;  %s4904_s7 = sadd.s32 4294967294, %s5579_s12   ;;  %s5579_s12 = sphi %s5671_s12, %s9533_s12   ;;  %s5575_s11 = sphi %s5669_s11, %s9532_s11   ;;  %s5571_s10 = sphi %s5667_s10, %s9531_s10   ;;  %s5567_s9 = sphi %s5665_s9, %s9530_s9  }
   0x7   : > { %s5690_s13 = sadd.s32 1, %s5579_s12   ;;  %s30_s14 = sadd.s32 1, %s5575_s11 }
   0x8   : > { %s27_s15 = ssub.s32 %s5579_s12, %s5690_s13  ;;  %p37_p0 = scmp.ne.s32.totalorder %s5575_s11, %s5571_s10 }
   0x9   : > { %p28_p1 = scmp.eq.s32.totalorder %s27_s15, 0  ;;  %p38_p2 = scmp.eq.s32.totalorder %s5579_s12, 0 }
   0xa   : > { %p214_p3 = scmp.eq.s32.totalorder %s5686_s6, 5  ;;  %p219_p4 = scmp.ne.s32.totalorder %s5571_s10, %s5567_s9 }
   0xb   : > { %s5702_s16 = scalar_select %p28_p1, %s5575_s11, %s30_s14  }
   0xc   : > { %p39_p5 = por %p38_p2, %p37_p0  ;;  %p5704_p6 = por %p214_p3, %p37_p0 }
   0xd   : > { %p220_p7 = scmp.eq.s32.totalorder %s4904_s7, 5  ;;  %p4906_p9 = scmp.ge.s32.totalorder %s5579_s12, 6 }
   0xf   : > { %p5708_p8 = por %p220_p7, %p219_p4  ;;  %257 = sbr.rel (%p4906_p9) target bundleno = 89 (0x59), region = 44 }
  0x14   : > { %260 = sbr.rel (!%p39_p5) target bundleno = 89 (0x59), region = 48  ;;  %s262_s19 = sand.u32 (%p39_p5), 1, %s5575_s11  }
  0x15   : > { %s4908_s20 = sshll.u32 (%p39_p5), %s5579_s12, 5  ;;  %s4907_s21 = sshll.u32 (%p39_p5), %s262_s19, 9 }
  0x16   : > { %s266_s22 = ssub.s32 (%p39_p5), 188, %s4908_s20  ;;  %s5090_s23 = sshll.u32 (%p39_p5), %s5579_s12, 8 }
  0x17   : > { %p267_p10 = scmp.lt.s32.totalorder (%p39_p5), %s266_s22, 32  ;;  %s5721_s26 = scalar_lea.vmem (%p39_p5), %s9294_s0, %s5090_s23  }
  0x18   : > { %s5724_s28 = scalar_lea.vmem (%p39_p5), [#allocation4], %s4907_s21  }
  0x19   : > { %s9535_s22 = smov (!%p267_p10, %s266_s22), 32 }
  0x1a   : > { %s4909_s27 = sshll.u32 %s9535_s22, 4 }
  0x1b   : > { %p4912_p11 = scmp.eq.s32.totalorder %s4909_s27, 0 }
  0x1c   : > { %s5727_s29 = sshrl.u32 (!%p4912_p11), %s9535_s22, 4 }
  0x1d   : > { %275 = sbr.rel (%p4912_p11) target bundleno = 89 (0x59), region = 52  ;;  %p4913_p12 = scmp.le.s32.totalorder (!%p4912_p11), %s5727_s29, 0 }
  0x22   : > { %4860 = sbr.rel (%p4913_p12) target bundleno = 72 (0x48), region = 154  ;;  %s9335_s30 = smov (!%p4913_p12), %s5724_s28 }
  0x23   : > { %s9336_s7 = smov (!%p4913_p12), %s5721_s26  ;;  %s5736_s14 = smov (!%p4913_p12), 0  }
  0x24   : > { %s5738_s15 = smov (!%p4913_p12), 0  }
  0x27 LB: >> { %v402_v0 = vld [vmem:[%s5587_s7] sm:$0xff]  ;;  %v404_v1 = vld [vmem:[%s5587_s7 + $0x8] sm:$0xff]  ;;  %v406_v2 = vld [vmem:[%s5587_s7 + $0x10] sm:$0xff]  ;;  %s466_s19 = sadd.s32 1, %s5591_s14  ;;  %s396_s15 = sadd.s32 1, %s5595_s15   ;;  %s5595_s15 = sphi %s5738_s15, %s396_s15   ;;  %s5591_s14 = sphi %s5736_s14, %s9339_s14   ;;  %s5587_s7 = sphi %s9336_s7, %s9338_s7   ;;  %s5583_s30 = sphi %s9335_s30, %s9337_s30  }
  0x28   : >> { %403 = vst [vmem:[%s5583_s30] sm:$0xff] %v402_v0  ;;  %v408_v3 = vld [vmem:[%s5587_s7 + $0x18] sm:$0xff]  ;;  %p467_p13 = scmp.ge.s32.totalorder %s466_s19, %s5727_s29  ;;  %v410_v4 = vld [vmem:[%s5587_s7 + $0x20] sm:$0xff]  ;;  %v412_v5 = vld [vmem:[%s5587_s7 + $0x28] sm:$0xff]  ;;  %p395_p0 = scmp.ge.s32.totalorder %s396_s15, %s5727_s29 }
  0x29   : >> { %405 = vst [vmem:[%s5583_s30 + $0x8] sm:$0xff] %v404_v1  ;;  %v414_v6 = vld [vmem:[%s5587_s7 + $0x30] sm:$0xff]  ;;  %v416_v7 = vld [vmem:[%s5587_s7 + $0x38] sm:$0xff]  ;;  %v418_v8 = vld [vmem:[%s5587_s7 + $0x40] sm:$0xff] }
  0x2a   : >> { %407 = vst [vmem:[%s5583_s30 + $0x10] sm:$0xff] %v406_v2  ;;  %s9537_s19 = smov (%p467_p13, %s466_s19), 0  ;;  %v420_v9 = vld [vmem:[%s5587_s7 + $0x48] sm:$0xff]  ;;  %v422_v10 = vld [vmem:[%s5587_s7 + $0x50] sm:$0xff]  ;;  %v424_v11 = vld [vmem:[%s5587_s7 + $0x58] sm:$0xff] }
  0x2b   : >> { %409 = vst [vmem:[%s5583_s30 + $0x18] sm:$0xff] %v408_v3  ;;  %s4914_s20 = sshll.u32 %s9537_s19, 7  ;;  %v426_v12 = vld [vmem:[%s5587_s7 + $0x60] sm:$0xff]  ;;  %v428_v13 = vld [vmem:[%s5587_s7 + $0x68] sm:$0xff]  ;;  %v430_v14 = vld [vmem:[%s5587_s7 + $0x70] sm:$0xff]  ;;  %s9339_s14 = smov %s9537_s19 }
  0x2c   : >> { %411 = vst [vmem:[%s5583_s30 + $0x20] sm:$0xff] %v410_v4  ;;  %s5770_s21 = scalar_lea.vmem %s5721_s26, %s4914_s20   ;;  %s5773_s23 = scalar_lea.vmem %s5724_s28, %s4914_s20 [#allocation4]   ;;  %v432_v15 = vld [vmem:[%s5587_s7 + $0x78] sm:$0xff]  ;;  %v434_v16 = vld [vmem:[%s5587_s7 + $0x5e0] sm:$0xff]  ;;  %v436_v17 = vld [vmem:[%s5587_s7 + $0x5e8] sm:$0xff] }
  0x2d   : >> { %413 = vst [vmem:[%s5583_s30 + $0x28] sm:$0xff] %v412_v5  ;;  %v438_v18 = vld [vmem:[%s5587_s7 + $0x5f0] sm:$0xff]  ;;  %v440_v19 = vld [vmem:[%s5587_s7 + $0x5f8] sm:$0xff]  ;;  %v442_v20 = vld [vmem:[%s5587_s7 + $0x600] sm:$0xff] }
  0x2e   : >> { %415 = vst [vmem:[%s5583_s30 + $0x30] sm:$0xff] %v414_v6  ;;  %v444_v21 = vld [vmem:[%s5587_s7 + $0x608] sm:$0xff]  ;;  %v446_v22 = vld [vmem:[%s5587_s7 + $0x610] sm:$0xff]  ;;  %v448_v23 = vld [vmem:[%s5587_s7 + $0x618] sm:$0xff] }
  0x2f   : >> { %417 = vst [vmem:[%s5583_s30 + $0x38] sm:$0xff] %v416_v7  ;;  %v450_v24 = vld [vmem:[%s5587_s7 + $0x620] sm:$0xff]  ;;  %v452_v25 = vld [vmem:[%s5587_s7 + $0x628] sm:$0xff]  ;;  %v454_v26 = vld [vmem:[%s5587_s7 + $0x630] sm:$0xff] }
  0x30   : >> { %419 = vst [vmem:[%s5583_s30 + $0x40] sm:$0xff] %v418_v8  ;;  %v456_v27 = vld [vmem:[%s5587_s7 + $0x638] sm:$0xff]  ;;  %v458_v28 = vld [vmem:[%s5587_s7 + $0x640] sm:$0xff]  ;;  %v460_v29 = vld [vmem:[%s5587_s7 + $0x648] sm:$0xff] }
  0x31   : >> { %421 = vst [vmem:[%s5583_s30 + $0x48] sm:$0xff] %v420_v9  ;;  %v462_v30 = vld [vmem:[%s5587_s7 + $0x650] sm:$0xff]  ;;  %v464_v31 = vld [vmem:[%s5587_s7 + $0x658] sm:$0xff]  ;;  %s9338_s7 = smov %s5770_s21 }
  0x32   : >> { %423 = vst [vmem:[%s5583_s30 + $0x50] sm:$0xff] %v422_v10 }
  0x33   : >> { %425 = vst [vmem:[%s5583_s30 + $0x58] sm:$0xff] %v424_v11 }
  0x34   : >> { %427 = vst [vmem:[%s5583_s30 + $0x60] sm:$0xff] %v426_v12 }
  0x35   : >> { %429 = vst [vmem:[%s5583_s30 + $0x68] sm:$0xff] %v428_v13 }
  0x36   : >> { %431 = vst [vmem:[%s5583_s30 + $0x70] sm:$0xff] %v430_v14 }
  0x37   : >> { %433 = vst [vmem:[%s5583_s30 + $0x78] sm:$0xff] %v432_v15 }
  0x38   : >> { %435 = vst [vmem:[%s5583_s30 + $0x100] sm:$0xff] %v434_v16 }
  0x39   : >> { %437 = vst [vmem:[%s5583_s30 + $0x108] sm:$0xff] %v436_v17 }
  0x3a   : >> { %439 = vst [vmem:[%s5583_s30 + $0x110] sm:$0xff] %v438_v18 }
  0x3b   : >> { %441 = vst [vmem:[%s5583_s30 + $0x118] sm:$0xff] %v440_v19 }
  0x3c   : >> { %443 = vst [vmem:[%s5583_s30 + $0x120] sm:$0xff] %v442_v20 }
  0x3d   : >> { %445 = vst [vmem:[%s5583_s30 + $0x128] sm:$0xff] %v444_v21 }
  0x3e   : >> { %447 = vst [vmem:[%s5583_s30 + $0x130] sm:$0xff] %v446_v22 }
  0x3f   : >> { %449 = vst [vmem:[%s5583_s30 + $0x138] sm:$0xff] %v448_v23 }
  0x40   : >> { %451 = vst [vmem:[%s5583_s30 + $0x140] sm:$0xff] %v450_v24 }
  0x41   : >> { %453 = vst [vmem:[%s5583_s30 + $0x148] sm:$0xff] %v452_v25 }
  0x42   : >> { %455 = vst [vmem:[%s5583_s30 + $0x150] sm:$0xff] %v454_v26 }
  0x43   : >> { %457 = vst [vmem:[%s5583_s30 + $0x158] sm:$0xff] %v456_v27  ;;  %398 = sbr.rel (!%p395_p0) target bundleno = 39 (0x27), region = 160 }
  0x44   : >> { %459 = vst [vmem:[%s5583_s30 + $0x160] sm:$0xff] %v458_v28 }
  0x45   : >> { %461 = vst [vmem:[%s5583_s30 + $0x168] sm:$0xff] %v460_v29 }
  0x46   : >> { %463 = vst [vmem:[%s5583_s30 + $0x170] sm:$0xff] %v462_v30 }
  0x47   : >> { %465 = vst [vmem:[%s5583_s30 + $0x178] sm:$0xff] %v464_v31  ;;  %s9337_s30 = smov %s5773_s23 }
  0x48 PF: > { %s5838_s24 = sand.u32 15, %s9535_s22   ;;  %s5091_s25 = sshll.u32 %s5727_s29, 7 }
  0x49   : > { %s5842_s27 = scalar_lea.vmem %s5721_s26, %s5091_s25   ;;  %s479_s20 = scalar_lea.vmem %s5724_s28, %s5091_s25 [#allocation4]  }
  0x4a   : > { %p4919_p1 = scmp.le.s32.totalorder %s5838_s24, 0 }
  0x4b   : > { %s5597_s21 = smov (!%p4919_p1), %s479_s20   ;;  %s5601_s19 = smov (!%p4919_p1), %s5842_s27  }
  0x4c   : > { %4874 = sbr.rel (%p4919_p1) target bundleno = 89 (0x59), region = 165  ;;  %s5605_s23 = smov (!%p4919_p1), 0  }
  0x4d   : > { %s5609_s15 = smov (!%p4919_p1), 0  }
  0x51 LB: >> { %v489_v32 = vld [vmem:[%s5603_s19] sm:$0xff]  ;;  %s493_s22 = sadd.s32 1, %s5607_s23  ;;  %s483_s15 = sadd.s32 1, %s5611_s15   ;;  %s5611_s15 = sphi %s5609_s15, %s483_s15   ;;  %s5607_s23 = sphi %s5605_s23, %s5606_s23   ;;  %s5603_s19 = sphi %s5601_s19, %s498_s19   ;;  %s5599_s21 = sphi %s5597_s21, %s499_s21  }
  0x52   : >> { %v491_v33 = vld [vmem:[%s5603_s19 + $0x5e0] sm:$0xff]  ;;  %490 = vst [vmem:[%s5599_s21] sm:$0xff] %v489_v32  ;;  %p494_p2 = scmp.ge.s32.totalorder %s493_s22, %s5838_s24  ;;  %p482_p3 = scmp.ge.s32.totalorder %s483_s15, %s5838_s24 }
  0x53   : >> { %492 = vst [vmem:[%s5599_s21 + $0x100] sm:$0xff] %v491_v33 }
  0x54   : >> { %s9539_s22 = smov (%p494_p2, %s493_s22), 0  ;;  %485 = sbr.rel (!%p482_p3) target bundleno = 81 (0x51), region = 171 }
  0x55   : >> { %s4920_s26 = sshll.u32 %s9539_s22, 3  ;;  %s5606_s23 = smov %s9539_s22  }
  0x56   : >> { %s498_s19 = scalar_lea.vmem %s5842_s27, %s4920_s26   ;;  %s499_s21 = scalar_lea.vmem %s479_s20, %s4920_s26 [#allocation4]  }
  0x59 PF: > { %p4922_p4 = scmp.ge.s32.totalorder %s5579_s12, 1  ;;  %p504_p5 = scmp.lt.s32.totalorder %s5579_s12, 7 }
  0x5b   : > { %p505_p7 = pnand %p4922_p4, %p504_p5 }
  0x5d   : > { %508 = sbr.rel (%p505_p7) target bundleno = 1505 (0x5e1), region = 100 }
  0x62   : > { %v584_v34 = vld [vmem:[%s9295_s1 + $0x18] sm:$0xff]  ;;  %v583_v35 = vld [vmem:[%s9295_s1 + $0x10] sm:$0xff]  ;;  %s5859_s14 = sand.u32 1, %s5571_s10   ;;  %v582_v36 = vld [vmem:[%s9295_s1 + $0x8] sm:$0xff]  ;;  %vm618_vm0 = vcmask 261120   ;;  %v9303_v19 = vlaneseq  ;;  %s1104_s23 = sld [smem:[#allocation3]] }
  0x63   : > { %727 = vmatpush.msra.mxu0 %v584_v34  ;;  %5093 = vmatpush.msra.mxu3 %v584_v34  ;;  %s4923_s24 = sshll.u32 %s5859_s14, 9  ;;  %v581_v37 = vld [vmem:[%s9295_s1] sm:$0xff]  ;;  %s5021_s15 = sshll.u32 %s5686_s6, 8 }
  0x64   : > { %936 = vmatpush.msra.mxu1 %v584_v34  ;;  %s5868_s19 = scalar_lea.vmem [#allocation4], %s4923_s24  ;;  %v5965_v23 = vshrl.u32 %v9303_v19, 7  ;;  %v5967_v24 = vstv %s5021_s15  ;;  %v5981_v30 = vld [vmem:[%s9296_s2] ss:$0 sm:$0xff]  ;;  %s3351_s28 = sld [smem:[#allocation2]] }
  0x65   : > { %728 = vmatpush.msra.mxu0 %v583_v35  ;;  %5094 = vmatpush.msra.mxu3 %v583_v35  ;;  %v4925_v38 = vld [vmem:[%s5868_s19 + $0x100] sm:$0xff]  ;;  %v4926_v41 = vld [vmem:[%s5868_s19 + $0x108] sm:$0xff]  ;;  %v4927_v44 = vld [vmem:[%s5868_s19 + $0x110] sm:$0xff]  ;;  %s4924_s26 = sshll.u32 %s5859_s14, 1  ;;  %s4776_s27 = scalar_lea.sflag [#allocation6], %s5859_s14 }
  0x66   : > { %937 = vmatpush.msra.mxu1 %v583_v35  ;;  %v4949_v39 = vld [vmem:[%s5868_s19 + $0x1c0] sm:$0xff]  ;;  %v4950_v42 = vld [vmem:[%s5868_s19 + $0x1c8] sm:$0xff]  ;;  %v4951_v45 = vld [vmem:[%s5868_s19 + $0x1d0] sm:$0xff]  ;;  %v1072_v25 = vadd.s32 %v5967_v24, %v5965_v23  ;;  %v1040_v32 = vadd.s32 8, %v5965_v23  ;;  %s5505_s15 = scalar_lea.hbm %s9302_s8, 12 }
  0x67   : > { %729 = vmatpush.msra.mxu0 %v582_v36  ;;  %5095 = vmatpush.msra.mxu3 %v582_v36  ;;  %v549_v40 = vld [vmem:[%s5868_s19] sm:$0xff]  ;;  %v550_v43 = vld [vmem:[%s5868_s19 + $0x8] sm:$0xff]  ;;  %v551_v46 = vld [vmem:[%s5868_s19 + $0x10] sm:$0xff] }
  0x68   : > { %938 = vmatpush.msra.mxu1 %v582_v36  ;;  %v4928_v47 = vld [vmem:[%s5868_s19 + $0x118] sm:$0xff]  ;;  %v4929_v50 = vld [vmem:[%s5868_s19 + $0x120] sm:$0xff]  ;;  %v4930_v53 = vld [vmem:[%s5868_s19 + $0x128] sm:$0xff]  ;;  %v5974_v26 = vstv %s1104_s23 }
  0x69   : > { %730 = vmatpush.msra.mxu0 %v581_v37  ;;  %5096 = vmatpush.msra.mxu3 %v581_v37  ;;  %v4952_v48 = vld [vmem:[%s5868_s19 + $0x1d8] sm:$0xff]  ;;  %v4953_v51 = vld [vmem:[%s5868_s19 + $0x1e0] sm:$0xff]  ;;  %v4954_v54 = vld [vmem:[%s5868_s19 + $0x1e8] sm:$0xff]  ;;  %vm1106_vm1 = vcmp.lt.s32.totalorder %v1072_v25, %v5974_v26 }
  0x6a   : > { %939 = vmatpush.msra.mxu1 %v581_v37  ;;  %4957 = vmatmul.msk.f32.vlgmr.msra.gmra.mxu0 %vm618_vm0, %v4925_v38  ;;  %v552_v49 = vld [vmem:[%s5868_s19 + $0x18] sm:$0xff]  ;;  %v553_v52 = vld [vmem:[%s5868_s19 + $0x20] sm:$0xff]  ;;  %v554_v55 = vld [vmem:[%s5868_s19 + $0x28] sm:$0xff] }
  0x6b   : > { %4981 = vmatmul.msk.f32.vlgmr.msra.gmra.mxu3 %vm618_vm0, %v4949_v39  ;;  %4989 = vmatmul.msk.f32.vlgmr.msra.gmra.mxu1 %vm618_vm0, %v549_v40  ;;  %v4931_v56 = vld [vmem:[%s5868_s19 + $0x130] sm:$0xff]  ;;  %v4932_v59 = vld [vmem:[%s5868_s19 + $0x138] sm:$0xff]  ;;  %v4933_v62 = vld [vmem:[%s5868_s19 + $0x140] sm:$0xff] }
  0x6c   : > { %5097 = vmatpush.msrb.mxu3 %v584_v34  ;;  %v4955_v57 = vld [vmem:[%s5868_s19 + $0x1f0] sm:$0xff]  ;;  %v4956_v60 = vld [vmem:[%s5868_s19 + $0x1f8] sm:$0xff]  ;;  %v557_v63 = vld [vmem:[%s5868_s19 + $0x40] sm:$0xff] }
  0x6d   : > { %v555_v58 = vld [vmem:[%s5868_s19 + $0x30] sm:$0xff]  ;;  %v556_v61 = vld [vmem:[%s5868_s19 + $0x38] sm:$0xff]  ;;  %v573_v0 = vld [vmem:[%s5868_s19 + $0xc0] sm:$0xff] }
  0x6e   : > { %5098 = vmatpush.msrb.mxu3 %v583_v35  ;;  %v4934_v1 = vld [vmem:[%s5868_s19 + $0x148] sm:$0xff]  ;;  %v4935_v4 = vld [vmem:[%s5868_s19 + $0x150] sm:$0xff]  ;;  %v4936_v7 = vld [vmem:[%s5868_s19 + $0x158] sm:$0xff] }
  0x6f   : > { %v558_v2 = vld [vmem:[%s5868_s19 + $0x48] sm:$0xff]  ;;  %v559_v5 = vld [vmem:[%s5868_s19 + $0x50] sm:$0xff]  ;;  %v560_v8 = vld [vmem:[%s5868_s19 + $0x58] sm:$0xff] }
  0x70   : > { %5099 = vmatpush.msrb.mxu3 %v582_v36  ;;  %v574_v3 = vld [vmem:[%s5868_s19 + $0xc8] sm:$0xff]  ;;  %v575_v6 = vld [vmem:[%s5868_s19 + $0xd0] sm:$0xff]  ;;  %v576_v9 = vld [vmem:[%s5868_s19 + $0xd8] sm:$0xff]  ;;  %v1073_v36 = vadd.s32 %v5967_v24, %v1040_v32 }
  0x71   : > { %v4937_v10 = vld [vmem:[%s5868_s19 + $0x160] sm:$0xff]  ;;  %v4938_v13 = vld [vmem:[%s5868_s19 + $0x168] sm:$0xff]  ;;  %v4939_v16 = vld [vmem:[%s5868_s19 + $0x170] sm:$0xff] }
  0x72   : > { %4958 = vmatmul.msk.f32.gmra.mxu0 %vm618_vm0, %v4926_v41  ;;  %5100 = vmatpush.msrb.mxu3 %v581_v37  ;;  %v561_v11 = vld [vmem:[%s5868_s19 + $0x60] sm:$0xff]  ;;  %v562_v14 = vld [vmem:[%s5868_s19 + $0x68] sm:$0xff]  ;;  %v563_v17 = vld [vmem:[%s5868_s19 + $0x70] sm:$0xff]  ;;  %vm1107_vm2 = vcmp.lt.s32.totalorder %v1073_v36, %v5974_v26 }
  0x73   : > { %4982 = vmatmul.msk.f32.gmra.mxu3 %vm618_vm0, %v4950_v42  ;;  %4990 = vmatmul.msk.f32.gmra.mxu1 %vm618_vm0, %v550_v43  ;;  %v577_v12 = vld [vmem:[%s5868_s19 + $0xe0] sm:$0xff]  ;;  %v578_v15 = vld [vmem:[%s5868_s19 + $0xe8] sm:$0xff]  ;;  %v579_v18 = vld [vmem:[%s5868_s19 + $0xf0] sm:$0xff] }
  0x74   : > { %v4940_v20 = vld [vmem:[%s5868_s19 + $0x178] sm:$0xff]  ;;  %v4941_v28 = vld [vmem:[%s5868_s19 + $0x180] sm:$0xff]  ;;  %v4942_v41 = vld [vmem:[%s5868_s19 + $0x188] sm:$0xff] }
  0x75   : > { %v564_v21 = vld [vmem:[%s5868_s19 + $0x78] sm:$0xff]  ;;  %v565_v31 = vld [vmem:[%s5868_s19 + $0x80] sm:$0xff] }
  0x76   : > { %v580_v22 = vld [vmem:[%s5868_s19 + $0xf8] sm:$0xff] }
  0x7a   : > { %4959 = vmatmul.msk.f32.gmra.mxu0 %vm618_vm0, %v4927_v44  ;;  %v566_v44 = vld [vmem:[%s5868_s19 + $0x88] sm:$0xff] }
  0x7b   : > { %4983 = vmatmul.msk.f32.gmra.mxu3 %vm618_vm0, %v4951_v45  ;;  %4991 = vmatmul.msk.f32.gmra.mxu1 %vm618_vm0, %v551_v46  ;;  %v1041_v45 = vadd.s32 16, %v5965_v23 }
  0x82   : > { %4960 = vmatmul.msk.f32.gmra.mxu0 %vm618_vm0, %v4928_v47 }
  0x83   : > { %4984 = vmatmul.msk.f32.gmra.mxu3 %vm618_vm0, %v4952_v48  ;;  %4992 = vmatmul.msk.f32.gmra.mxu1 %vm618_vm0, %v552_v49  ;;  %v1074_v49 = vadd.s32 %v5967_v24, %v1041_v45 }
  0x85   : > { %vm1108_vm3 = vcmp.lt.s32.totalorder %v1074_v49, %v5974_v26 }
  0x8a   : > { %4961 = vmatmul.msk.f32.gmra.mxu0 %vm618_vm0, %v4929_v50 }
  0x8b   : > { %4985 = vmatmul.msk.f32.gmra.mxu3 %vm618_vm0, %v4953_v51  ;;  %4993 = vmatmul.msk.f32.gmra.mxu1 %vm618_vm0, %v553_v52 }
  0x92   : > { %4962 = vmatmul.msk.f32.gmra.mxu0 %vm618_vm0, %v4930_v53 }
  0x93   : > { %4986 = vmatmul.msk.f32.gmra.mxu3 %vm618_vm0, %v4954_v54  ;;  %4994 = vmatmul.msk.f32.gmra.mxu1 %vm618_vm0, %v554_v55  ;;  %v4943_v54 = vld [vmem:[%s5868_s19 + $0x190] sm:$0xff] }
  0x9a   : > { %4963 = vmatmul.msk.f32.gmra.mxu0 %vm618_vm0, %v4931_v56 }
  0x9b   : > { %4987 = vmatmul.msk.f32.gmra.mxu3 %vm618_vm0, %v4955_v57  ;;  %4995 = vmatmul.msk.f32.gmra.mxu1 %vm618_vm0, %v555_v58  ;;  %v567_v57 = vld [vmem:[%s5868_s19 + $0x90] sm:$0xff] }
  0xa2   : > { %4964 = vmatmul.msk.f32.gmra.mxu0 %vm618_vm0, %v4932_v59 }
  0xa3   : > { %4988 = vmatmul.msk.f32.gmra.mxu3 %vm618_vm0, %v4956_v60  ;;  %4996 = vmatmul.msk.f32.gmra.mxu1 %vm618_vm0, %v556_v61 }
  0xaa   : > { %4965 = vmatmul.msk.f32.gmra.mxu0 %vm618_vm0, %v4933_v62  ;;  %v1042_v62 = vadd.s32 24, %v5965_v23 }
  0xab   : > { %4997 = vmatmul.msk.f32.gmra.mxu1 %vm618_vm0, %v557_v63  ;;  %5013 = vmatmul.msk.f32.vlgmr.msrb.gmra.mxu3 %vm618_vm0, %v573_v0  ;;  %v4944_v0 = vld [vmem:[%s5868_s19 + $0x198] sm:$0xff] }
  0xb2   : > { %4966 = vmatmul.msk.f32.gmra.mxu0 %vm618_vm0, %v4934_v1 }
  0xb3   : > { %4998 = vmatmul.msk.f32.gmra.mxu1 %vm618_vm0, %v558_v2  ;;  %5014 = vmatmul.msk.f32.gmra.mxu3 %vm618_vm0, %v574_v3  ;;  %v568_v3 = vld [vmem:[%s5868_s19 + $0x98] sm:$0xff] }
  0xba   : > { %4967 = vmatmul.msk.f32.gmra.mxu0 %vm618_vm0, %v4935_v4  ;;  %v1043_v4 = vadd.s32 32, %v5965_v23 }
  0xbb   : > { %4999 = vmatmul.msk.f32.gmra.mxu1 %vm618_vm0, %v559_v5  ;;  %5015 = vmatmul.msk.f32.gmra.mxu3 %vm618_vm0, %v575_v6  ;;  %v1075_v5 = vadd.s32 %v5967_v24, %v1042_v62  ;;  %v572_v62 = vld [vmem:[%s5868_s19 + $0xb8] sm:$0xff] }
  0xbc   : > { %v1076_v6 = vadd.s32 %v5967_v24, %v1043_v4 }
  0xbd   : > { %vm1109_vm4 = vcmp.lt.s32.totalorder %v1075_v5, %v5974_v26 }
  0xbe   : > { %vm1110_vm5 = vcmp.lt.s32.totalorder %v1076_v6, %v5974_v26 }
  0xc2   : > { %4968 = vmatmul.msk.f32.gmra.mxu0 %vm618_vm0, %v4936_v7 }
  0xc3   : > { %5000 = vmatmul.msk.f32.gmra.mxu1 %vm618_vm0, %v560_v8  ;;  %5016 = vmatmul.msk.f32.gmra.mxu3 %vm618_vm0, %v576_v9 }
  0xca   : > { %4969 = vmatmul.msk.f32.gmra.mxu0 %vm618_vm0, %v4937_v10 }
  0xcb   : > { %5001 = vmatmul.msk.f32.gmra.mxu1 %vm618_vm0, %v561_v11  ;;  %5017 = vmatmul.msk.f32.gmra.mxu3 %vm618_vm0, %v577_v12  ;;  %v4945_v11 = vld [vmem:[%s5868_s19 + $0x1a0] sm:$0xff] }
  0xd2   : > { %4970 = vmatmul.msk.f32.gmra.mxu0 %vm618_vm0, %v4938_v13 }
  0xd3   : > { %5002 = vmatmul.msk.f32.gmra.mxu1 %vm618_vm0, %v562_v14  ;;  %5018 = vmatmul.msk.f32.gmra.mxu3 %vm618_vm0, %v578_v15  ;;  %v569_v14 = vld [vmem:[%s5868_s19 + $0xa0] sm:$0xff]  ;;  %v1044_v15 = vadd.s32 40, %v5965_v23 }
  0xda   : > { %4971 = vmatmul.msk.f32.gmra.mxu0 %vm618_vm0, %v4939_v16 }
  0xdb   : > { %5003 = vmatmul.msk.f32.gmra.mxu1 %vm618_vm0, %v563_v17  ;;  %5019 = vmatmul.msk.f32.gmra.mxu3 %vm618_vm0, %v579_v18 }
  0xe2   : > { %4972 = vmatmul.msk.f32.gmra.mxu0 %vm618_vm0, %v4940_v20 }
  0xe3   : > { %5004 = vmatmul.msk.f32.gmra.mxu1 %vm618_vm0, %v564_v21  ;;  %5020 = vmatmul.msk.f32.gmra.mxu3 %vm618_vm0, %v580_v22  ;;  %v1077_v22 = vadd.s32 %v5967_v24, %v1044_v15 }
  0xe5   : > { %vm1111_vm6 = vcmp.lt.s32.totalorder %v1077_v22, %v5974_v26  ;;  %v1048_v22 = vadd.s32 72, %v5965_v23 }
  0xe7   : > { %v732_v27 = vpop.f32.mrf.mxu0 }
  0xe8   : > { %v941_v29 = vpop.f32.mrf.mxu1 }
  0xe9   : > { %v942_v33 = vadd.f32 %v941_v29, %v732_v27  ;;  %v4946_v29 = vld [vmem:[%s5868_s19 + $0x1a8] sm:$0xff] }
  0xea   : > { %4973 = vmatmul.msk.f32.gmra.mxu0 %vm618_vm0, %v4941_v28 }
  0xeb   : > { %v1202_v34 = vsel %vm1106_vm1, %v942_v33, 0.0  ;;  %5005 = vmatmul.msk.f32.gmra.mxu1 %vm618_vm0, %v565_v31  ;;  %v570_v33 = vld [vmem:[%s5868_s19 + $0xa8] sm:$0xff] }
  0xec   : > { %v5988_v35 = vadd.f32 %v5981_v30, %v1202_v34  ;;  %v1045_v34 = vadd.s32 48, %v5965_v23 }
  0xee   : > { %v5991_v37 = vpop.f32.mrf.mxu3  ;;  %v1268_v38 = vsel %vm618_vm0, %v5988_v35, 0.0  ;;  %v1364_v39 = vmul.f32 %v5988_v35, %v5988_v35 }
  0xef   : > { %1269 = vadd.xlane.f32.xlu0 %v1268_v38  ;;  %v735_v40 = vpop.f32.mrf.mxu0 }
  0xf0   : > { %v944_v42 = vpop.f32.mrf.mxu1  ;;  %v1396_v43 = vsel %vm618_vm0, %v1364_v39, 0.0 }
  0xf1   : > { %v945_v46 = vadd.f32 %v944_v42, %v735_v40  ;;  %1397 = vadd.xlane.f32.xlu2 %v1396_v43  ;;  %v1078_v40 = vadd.s32 %v5967_v24, %v1045_v34 }
  0xf2   : > { %4974 = vmatmul.msk.f32.gmra.mxu0 %vm618_vm0, %v4942_v41 }
  0xf3   : > { %v1203_v47 = vsel %vm1107_vm2, %v945_v46, 0.0  ;;  %5006 = vmatmul.msk.f32.gmra.mxu1 %vm618_vm0, %v566_v44  ;;  %v4947_v44 = vld [vmem:[%s5868_s19 + $0x1b0] sm:$0xff]  ;;  %vm1112_vm7 = vcmp.lt.s32.totalorder %v1078_v40, %v5974_v26  ;;  %v1046_v46 = vadd.s32 56, %v5965_v23  ;;  %v1049_v40 = vadd.s32 80, %v5965_v23 }
  0xf4   : > { %v6005_v48 = vadd.f32 %v5981_v30, %v1203_v47  ;;  %v571_v47 = vld [vmem:[%s5868_s19 + $0xb0] sm:$0xff] }
  0xf6   : > { %v6008_v50 = vpop.f32.mrf.mxu3  ;;  %v1271_v51 = vsel %vm618_vm0, %v6005_v48, 0.0  ;;  %v1365_v52 = vmul.f32 %v6005_v48, %v6005_v48 }
  0xf7   : > { %1272 = vadd.xlane.f32.xlu0 %v1271_v51  ;;  %v738_v53 = vpop.f32.mrf.mxu0 }
  0xf8   : > { %v947_v55 = vpop.f32.mrf.mxu1  ;;  %v1399_v56 = vsel %vm618_vm0, %v1365_v52, 0.0 }
  0xf9   : > { %v948_v58 = vadd.f32 %v947_v55, %v738_v53  ;;  %1400 = vadd.xlane.f32.xlu1 %v1399_v56  ;;  %v1079_v53 = vadd.s32 %v5967_v24, %v1046_v46  ;;  %v1082_v46 = vadd.s32 %v5967_v24, %v1049_v40 }
  0xfa   : > { %4975 = vmatmul.msk.f32.gmra.mxu0 %vm618_vm0, %v4943_v54 }
  0xfb   : > { %v1204_v59 = vsel %vm1108_vm3, %v948_v58, 0.0  ;;  %5007 = vmatmul.msk.f32.gmra.mxu1 %vm618_vm0, %v567_v57  ;;  %v4948_v57 = vld [vmem:[%s5868_s19 + $0x1b8] sm:$0xff]  ;;  %vm1113_vm8 = vcmp.lt.s32.totalorder %v1079_v53, %v5974_v26  ;;  %vm1116_vm12 = vcmp.lt.s32.totalorder %v1082_v46, %v5974_v26 }
  0xfc   : > { %v6021_v60 = vadd.f32 %v5981_v30, %v1204_v59  ;;  %v1047_v59 = vadd.s32 64, %v5965_v23 }
  0xfe   : > { %v6023_v61 = vpop.f32.mrf.mxu3  ;;  %v1274_v2 = vsel %vm618_vm0, %v6021_v60, 0.0  ;;  %v1366_v7 = vmul.f32 %v6021_v60, %v6021_v60 }
  0xff   : > { %v741_v63 = vpop.f32.mrf.mxu0 }
 0x100   : > { %v950_v1 = vpop.f32.mrf.mxu1  ;;  %v1402_v13 = vsel %vm618_vm0, %v1366_v7, 0.0 }
 0x101   : > { %1275 = vadd.xlane.f32.xlu1 %v1274_v2  ;;  %v951_v8 = vadd.f32 %v950_v1, %v741_v63 }
 0x102   : > { %4976 = vmatmul.msk.f32.gmra.mxu0 %vm618_vm0, %v4944_v0 }
 0x103   : > { %5008 = vmatmul.msk.f32.gmra.mxu1 %vm618_vm0, %v568_v3  ;;  %v1205_v16 = vsel %vm1109_vm4, %v951_v8, 0.0  ;;  %v1080_v3 = vadd.s32 %v5967_v24, %v1047_v59  ;;  %v1063_v8 = vadd.s32 192, %v5965_v23 }
 0x104   : > { %v6048_v20 = vadd.f32 %v5981_v30, %v1205_v16 }
 0x105   : > { %vm1114_vm9 = vcmp.lt.s32.totalorder %v1080_v3, %v5974_v26 }
 0x106   : > { %v6038_v9 = vpop.f32.mrf.mxu3  ;;  %v1277_v32 = vsel %vm618_vm0, %v6048_v20, 0.0  ;;  %v1367_v15 = vmul.f32 %v6048_v20, %v6048_v20 }
 0x107   : > { %v744_v10 = vpop.f32.mrf.mxu0 }
 0x108   : > { %v953_v12 = vpop.f32.mrf.mxu1 }
 0x109   : > { %v954_v17 = vadd.f32 %v953_v12, %v744_v10  ;;  %1403 = vadd.xlane.f32.xlu1 %v1402_v13 }
 0x10a   : > { %4977 = vmatmul.msk.f32.gmra.mxu0 %vm618_vm0, %v4945_v11 }
 0x10b   : > { %v1206_v18 = vsel %vm1110_vm5, %v954_v17, 0.0  ;;  %5009 = vmatmul.msk.f32.gmra.mxu1 %vm618_vm0, %v569_v14  ;;  %v1096_v14 = vadd.s32 %v5967_v24, %v1063_v8 }
 0x10c   : > { %v6051_v21 = vadd.f32 %v5981_v30, %v1206_v18 }
 0x10d   : > { %vm1130_vm10 = vcmp.lt.s32.totalorder %v1096_v14, %v5974_v26  ;;  %v1051_v14 = vadd.s32 96, %v5965_v23 }
 0x10e   : > { %v6054_v25 = vpop.f32.mrf.mxu3  ;;  %v1280_v27 = vsel %vm618_vm0, %v6051_v21, 0.0  ;;  %v1368_v0 = vmul.f32 %v6051_v21, %v6051_v21 }
 0x10f   : > { %1281 = vadd.xlane.f32.xlu2 %v1280_v27  ;;  %v747_v28 = vpop.f32.mrf.mxu0 }
 0x110   : > { %v956_v31 = vpop.f32.mrf.mxu1  ;;  %v1408_v6 = vsel %vm618_vm0, %v1368_v0, 0.0 }
 0x111   : > { %v957_v36 = vadd.f32 %v956_v31, %v747_v28  ;;  %1278 = vadd.xlane.f32.xlu1 %v1277_v32  ;;  %v1405_v28 = vsel %vm618_vm0, %v1367_v15, 0.0 }
 0x112   : > { %4978 = vmatmul.msk.f32.gmra.mxu0 %vm618_vm0, %v4946_v29 }
 0x113   : > { %v1207_v38 = vsel %vm1111_vm6, %v957_v36, 0.0  ;;  %5010 = vmatmul.msk.f32.gmra.mxu1 %vm618_vm0, %v570_v33  ;;  %v1081_v36 = vadd.s32 %v5967_v24, %v1048_v22 }
 0x114   : > { %v6067_v39 = vadd.f32 %v5981_v30, %v1207_v38 }
 0x115   : > { %vm1115_vm11 = vcmp.lt.s32.totalorder %v1081_v36, %v5974_v26 }
 0x116   : > { %v6070_v41 = vpop.f32.mrf.mxu3  ;;  %v1283_v42 = vsel %vm618_vm0, %v6067_v39, 0.0  ;;  %v1369_v16 = vmul.f32 %v6067_v39, %v6067_v39 }
 0x117   : > { %1284 = vadd.xlane.f32.xlu2 %v1283_v42  ;;  %v750_v43 = vpop.f32.mrf.mxu0 }
 0x118   : > { %v959_v45 = vpop.f32.mrf.mxu1  ;;  %v1411_v29 = vsel %vm618_vm0, %v1369_v16, 0.0 }
 0x119   : > { %v960_v49 = vadd.f32 %v959_v45, %v750_v43 }
 0x11a   : > { %4979 = vmatmul.msk.f32.gmra.mxu0 %vm618_vm0, %v4947_v44 }
 0x11b   : > { %v1208_v51 = vsel %vm1112_vm7, %v960_v49, 0.0  ;;  %5011 = vmatmul.msk.f32.gmra.mxu1 %vm618_vm0, %v571_v47 }
 0x11c   : > { %v6081_v52 = vadd.f32 %v5981_v30, %v1208_v51 }
 0x11e   : > { %v6084_v54 = vpop.f32.mrf.mxu3  ;;  %v1286_v55 = vsel %vm618_vm0, %v6081_v52, 0.0  ;;  %v1370_v43 = vmul.f32 %v6081_v52, %v6081_v52 }
 0x11f   : > { %1287 = vadd.xlane.f32.xlu0 %v1286_v55  ;;  %v753_v56 = vpop.f32.mrf.mxu0 }
 0x120   : > { %v962_v58 = vpop.f32.mrf.mxu1  ;;  %v1414_v49 = vsel %vm618_vm0, %v1370_v43, 0.0 }
 0x121   : > { %v963_v63 = vadd.f32 %v962_v58, %v753_v56  ;;  %v1050_v58 = vadd.s32 88, %v5965_v23 }
 0x122   : > { %4980 = vmatmul.msk.f32.gmra.mxu0 %vm618_vm0, %v4948_v57 }
 0x123   : > { %v1209_v1 = vsel %vm1113_vm8, %v963_v63, 0.0  ;;  %5012 = vmatmul.msk.f32.gmra.mxu1 %vm618_vm0, %v572_v62  ;;  %v1083_v3 = vadd.s32 %v5967_v24, %v1050_v58 }
 0x124   : > { %v6097_v2 = vadd.f32 %v5981_v30, %v1209_v1 }
 0x125   : > { %vm1117_vm14 = vcmp.lt.s32.totalorder %v1083_v3, %v5974_v26 }
 0x126   : > { %v6100_v4 = vpop.f32.mrf.mxu3  ;;  %v1289_v5 = vsel %vm618_vm0, %v6097_v2, 0.0  ;;  %v1371_v7 = vmul.f32 %v6097_v2, %v6097_v2 }
 0x127   : > { %1290 = vadd.xlane.f32.xlu1 %v1289_v5  ;;  %1409 = vadd.xlane.f32.xlu0 %v1408_v6  ;;  %v756_v10 = vpop.f32.mrf.mxu0  ;;  %v1065_v6 = vadd.s32 208, %v5965_v23 }
 0x128   : > { %v965_v11 = vpop.f32.mrf.mxu1  ;;  %v1417_v12 = vsel %vm618_vm0, %v1371_v7, 0.0 }
 0x129   : > { %v966_v13 = vadd.f32 %v965_v11, %v756_v10  ;;  %1418 = vadd.xlane.f32.xlu2 %v1417_v12 }
 0x12b   : > { %v1210_v17 = vsel %vm1114_vm9, %v966_v13, 0.0 }
 0x12c   : > { %v6116_v18 = vadd.f32 %v5981_v30, %v1210_v17  ;;  %v1098_v17 = vadd.s32 %v5967_v24, %v1065_v6  ;;  %v1053_v6 = vadd.s32 112, %v5965_v23 }
 0x12e   : > { %v1013_v27 = vpop.f32.mrf.mxu3  ;;  %v1372_v31 = vmul.f32 %v6116_v18, %v6116_v18  ;;  %v1292_v7 = vsel %vm618_vm0, %v6116_v18, 0.0  ;;  %vm1132_vm15 = vcmp.lt.s32.totalorder %v1098_v17, %v5974_v26 }
 0x12f   : > { %v1014_v32 = vadd.f32 %v1013_v27, %v5991_v37  ;;  %1406 = vadd.xlane.f32.xlu1 %v1405_v28  ;;  %1412 = vadd.xlane.f32.xlu0 %v1411_v29  ;;  %v759_v33 = vpop.f32.mrf.mxu0  ;;  %v1064_v37 = vadd.s32 200, %v5965_v23  ;;  %v1066_v28 = vadd.s32 216, %v5965_v23  ;;  %v1084_v29 = vadd.s32 %v5967_v24, %v1051_v14 }
 0x130   : > { %v968_v34 = vpop.f32.mrf.mxu1  ;;  %v1420_v38 = vsel %vm618_vm0, %v1372_v31, 0.0 }
 0x131   : > { %v1226_v42 = vsel %vm1130_vm10, %v1014_v32, 0.0  ;;  %1421 = vadd.xlane.f32.xlu2 %v1420_v38  ;;  %v969_v44 = vadd.f32 %v968_v34, %v759_v33  ;;  %v1097_v55 = vadd.s32 %v5967_v24, %v1064_v37  ;;  %v1099_v40 = vadd.s32 %v5967_v24, %v1066_v28 }
 0x132   : > { %v6131_v45 = vadd.f32 %v5981_v30, %v1226_v42  ;;  %vm1118_vm1 = vcmp.lt.s32.totalorder %v1084_v29, %v5974_v26 }
 0x133   : > { %v1211_v51 = vsel %vm1115_vm11, %v969_v44, 0.0  ;;  %vm1131_vm13 = vcmp.lt.s32.totalorder %v1097_v55, %v5974_v26  ;;  %vm1133_vm2 = vcmp.lt.s32.totalorder %v1099_v40, %v5974_v26  ;;  %v1067_v55 = vadd.s32 224, %v5965_v23 }
 0x134   : > { %v1340_v57 = vsel %vm618_vm0, %v6131_v45, 0.0  ;;  %v6143_v62 = vadd.f32 %v5981_v30, %v1211_v51  ;;  %v1069_v40 = vadd.s32 240, %v5965_v23 }
 0x136   : > { %v1016_v47 = vpop.f32.mrf.mxu3  ;;  %v1295_v8 = vsel %vm618_vm0, %v6143_v62, 0.0  ;;  %v1373_v31 = vmul.f32 %v6143_v62, %v6143_v62 }
 0x137   : > { %1415 = vadd.xlane.f32.xlu0 %v1414_v49  ;;  %v762_v53 = vpop.f32.mrf.mxu0  ;;  %v1017_v63 = vadd.f32 %v1016_v47, %v6008_v50 }
 0x138   : > { %v971_v56 = vpop.f32.mrf.mxu1  ;;  %v1423_v43 = vsel %vm618_vm0, %v1373_v31, 0.0 }
 0x139   : > { %v972_v59 = vadd.f32 %v971_v56, %v762_v53  ;;  %1341 = vadd.xlane.f32.xlu2 %v1340_v57  ;;  %v1227_v10 = vsel %vm1131_vm13, %v1017_v63, 0.0 }
 0x13a   : > { %v6162_v16 = vadd.f32 %v5981_v30, %v1227_v10 }
 0x13b   : > { %v1212_v0 = vsel %vm1116_vm12, %v972_v59, 0.0 }
 0x13c   : > { %v6148_v1 = vadd.f32 %v5981_v30, %v1212_v0  ;;  %v1343_v34 = vsel %vm618_vm0, %v6162_v16, 0.0  ;;  %v1052_v0 = vadd.s32 104, %v5965_v23 }
 0x13e   : > { %v1019_v5 = vpop.f32.mrf.mxu3  ;;  %v1374_v50 = vmul.f32 %v6148_v1, %v6148_v1  ;;  %v1298_v56 = vsel %vm618_vm0, %v6148_v1, 0.0  ;;  %v1085_v10 = vadd.s32 %v5967_v24, %v1052_v0 }
 0x13f   : > { %1293 = vadd.xlane.f32.xlu0 %v1292_v7  ;;  %v765_v11 = vpop.f32.mrf.mxu0  ;;  %v1020_v32 = vadd.f32 %v1019_v5, %v6023_v61 }
 0x140   : > { %v974_v12 = vpop.f32.mrf.mxu1  ;;  %v1426_v13 = vsel %vm618_vm0, %v1374_v50, 0.0  ;;  %vm1119_vm5 = vcmp.lt.s32.totalorder %v1085_v10, %v5974_v26 }
 0x141   : > { %v975_v15 = vadd.f32 %v974_v12, %v765_v11  ;;  %1296 = vadd.xlane.f32.xlu2 %v1295_v8  ;;  %1427 = vadd.xlane.f32.xlu1 %v1426_v13  ;;  %v1228_v44 = vsel %vm1132_vm15, %v1020_v32, 0.0  ;;  %v1100_v8 = vadd.s32 %v5967_v24, %v1067_v55  ;;  %v1086_v11 = vadd.s32 %v5967_v24, %v1053_v6 }
 0x142   : > { %v6184_v49 = vadd.f32 %v5981_v30, %v1228_v44 }
 0x143   : > { %v1213_v22 = vsel %vm1117_vm14, %v975_v15, 0.0  ;;  %vm1134_vm3 = vcmp.lt.s32.totalorder %v1100_v8, %v5974_v26  ;;  %vm1120_vm6 = vcmp.lt.s32.totalorder %v1086_v11, %v5974_v26 }
 0x144   : > { %v6166_v27 = vadd.f32 %v5981_v30, %v1213_v22  ;;  %v1346_v3 = vsel %vm618_vm0, %v6184_v49, 0.0 }
 0x146   : > { %v1022_v33 = vpop.f32.mrf.mxu3  ;;  %v1375_v36 = vmul.f32 %v6166_v27, %v6166_v27 }
 0x147   : > { %1344 = vadd.xlane.f32.xlu0 %v1343_v34  ;;  %v768_v38 = vpop.f32.mrf.mxu0  ;;  %v1023_v46 = vadd.f32 %v1022_v33, %v6038_v9  ;;  %v1068_v9 = vadd.s32 232, %v5965_v23 }
 0x148   : > { %v977_v42 = vpop.f32.mrf.mxu1  ;;  %v1429_v61 = vsel %vm618_vm0, %v1375_v36, 0.0 }
 0x149   : > { %v978_v37 = vadd.f32 %v977_v42, %v768_v38  ;;  %1424 = vadd.xlane.f32.xlu2 %v1423_v43  ;;  %1430 = vadd.xlane.f32.xlu1 %v1429_v61  ;;  %v1229_v58 = vsel %vm1133_vm2, %v1023_v46, 0.0  ;;  %v1101_v50 = vadd.s32 %v5967_v24, %v1068_v9  ;;  %v2139_v42 = vld [vmem:[%s9297_s3 + $0x18] sm:$0xff]  ;;  %v1070_v46 = vadd.s32 248, %v5965_v23 }
 0x14a   : > { %v6202_v7 = vadd.f32 %v5981_v30, %v1229_v58  ;;  %2250 = vmatpush.msra.mxu2 %v2139_v42  ;;  %5101 = vmatpush.msra.mxu3 %v2139_v42  ;;  %v1102_v9 = vadd.s32 %v5967_v24, %v1069_v40 }
 0x14b   : > { %v1214_v47 = vsel %vm1118_vm1, %v978_v37, 0.0  ;;  %vm1135_vm4 = vcmp.lt.s32.totalorder %v1101_v50, %v5974_v26  ;;  %v2136_v50 = vld [vmem:[%s9297_s3] sm:$0xff] }
 0x14c   : > { %v6188_v51 = vadd.f32 %v5981_v30, %v1214_v47  ;;  %v1349_v14 = vsel %vm618_vm0, %v6202_v7, 0.0  ;;  %vm1136_vm7 = vcmp.lt.s32.totalorder %v1102_v9, %v5974_v26 }
 0x14e   : > { %v1025_v53 = vpop.f32.mrf.mxu3  ;;  %v1376_v57 = vmul.f32 %v6188_v51, %v6188_v51  ;;  %v1304_v37 = vsel %vm618_vm0, %v6188_v51, 0.0 }
 0x14f   : > { %1299 = vadd.xlane.f32.xlu0 %v1298_v56  ;;  %v771_v59 = vpop.f32.mrf.mxu0  ;;  %v1026_v12 = vadd.f32 %v1025_v53, %v6054_v25  ;;  %v1301_v25 = vsel %vm618_vm0, %v6166_v27, 0.0  ;;  %v1055_v56 = vadd.s32 128, %v5965_v23 }
 0x150   : > { %v980_v63 = vpop.f32.mrf.mxu1  ;;  %v1432_v5 = vsel %vm618_vm0, %v1376_v57, 0.0  ;;  %v2138_v57 = vld [vmem:[%s9297_s3 + $0x10] sm:$0xff] }
 0x151   : > { %1347 = vadd.xlane.f32.xlu2 %v1346_v3  ;;  %1433 = vadd.xlane.f32.xlu1 %v1432_v5  ;;  %v981_v15 = vadd.f32 %v980_v63, %v771_v59  ;;  %v1230_v29 = vsel %vm1134_vm3, %v1026_v12, 0.0  ;;  %v1103_v63 = vadd.s32 %v5967_v24, %v1070_v46  ;;  %v2137_v3 = vld [vmem:[%s9297_s3 + $0x8] sm:$0xff]  ;;  %v1088_v8 = vadd.s32 %v5967_v24, %v1055_v56 }
 0x152   : > { %2251 = vmatpush.msra.mxu2 %v2138_v57  ;;  %5102 = vmatpush.msra.mxu3 %v2138_v57 }
 0x153   : > { %v1215_v34 = vsel %vm1119_vm5, %v981_v15, 0.0  ;;  %vm1137_vm8 = vcmp.lt.s32.totalorder %v1103_v63, %v5974_v26  ;;  %vm1122_vm9 = vcmp.lt.s32.totalorder %v1088_v8, %v5974_v26  ;;  %v1057_v8 = vadd.s32 144, %v5965_v23 }
 0x154   : > { %v6231_v43 = vadd.f32 %v5981_v30, %v1215_v34  ;;  %2252 = vmatpush.msra.mxu2 %v2137_v3  ;;  %5103 = vmatpush.msra.mxu3 %v2137_v3 }
 0x156   : > { %v1028_v13 = vpop.f32.mrf.mxu3  ;;  %v1377_v0 = vmul.f32 %v6231_v43, %v6231_v43  ;;  %2253 = vmatpush.msra.mxu2 %v2136_v50  ;;  %5104 = vmatpush.msra.mxu3 %v2136_v50 }
 0x157   : > { %v1029_v17 = vadd.f32 %v1028_v13, %v6070_v41  ;;  %1350 = vadd.xlane.f32.xlu0 %v1349_v14  ;;  %v774_v22 = vpop.f32.mrf.mxu0  ;;  %v6222_v41 = vadd.f32 %v5981_v30, %v1230_v29  ;;  %v1054_v13 = vadd.s32 120, %v5965_v23  ;;  %v1056_v29 = vadd.s32 136, %v5965_v23 }
 0x158   : > { %v983_v28 = vpop.f32.mrf.mxu1  ;;  %v1435_v15 = vsel %vm618_vm0, %v1377_v0, 0.0 }
 0x159   : > { %v1231_v31 = vsel %vm1135_vm4, %v1029_v17, 0.0  ;;  %v984_v32 = vadd.f32 %v983_v28, %v774_v22  ;;  %1302 = vadd.xlane.f32.xlu2 %v1301_v25  ;;  %v1352_v55 = vsel %vm618_vm0, %v6222_v41, 0.0  ;;  %v1307_v25 = vsel %vm618_vm0, %v6231_v43, 0.0 }
 0x15a   : > { %v6219_v33 = vadd.f32 %v5981_v30, %v1231_v31  ;;  %v1089_v9 = vadd.s32 %v5967_v24, %v1056_v29 }
 0x15b   : > { %v1216_v36 = vsel %vm1120_vm6, %v984_v32, 0.0 }
 0x15c   : > { %9340 = vst [vmem:[#allocation8_spill] sm:$0xff] %v6219_v33  ;;  %v1355_v38 = vsel %vm618_vm0, %v6219_v33, 0.0  ;;  %v6234_v61 = vadd.f32 %v5981_v30, %v1216_v36  ;;  %vm1123_vm11 = vcmp.lt.s32.totalorder %v1089_v9, %v5974_v26 }
 0x15d   : > { %1356 = vadd.xlane.f32.xlu1 %v1355_v38  ;;  %v1087_v38 = vadd.s32 %v5967_v24, %v1054_v13 }
 0x15e   : > { %v1031_v44 = vpop.f32.mrf.mxu3  ;;  %v1310_v59 = vsel %vm618_vm0, %v6234_v61, 0.0  ;;  %v1378_v42 = vmul.f32 %v6234_v61, %v6234_v61 }
 0x15f   : > { %1305 = vadd.xlane.f32.xlu0 %v1304_v37  ;;  %v777_v47 = vpop.f32.mrf.mxu0  ;;  %v1032_v10 = vadd.f32 %v1031_v44, %v6084_v54  ;;  %vm1121_vm10 = vcmp.lt.s32.totalorder %v1087_v38, %v5974_v26 }
 0x160   : > { %v986_v53 = vpop.f32.mrf.mxu1  ;;  %v1438_v0 = vsel %vm618_vm0, %v1378_v42, 0.0 }
 0x161   : > { %1353 = vadd.xlane.f32.xlu2 %v1352_v55  ;;  %v1232_v31 = vsel %vm1136_vm7, %v1032_v10, 0.0 }
 0x162   : > { %v1270_v58 = vpop.xlane.xlu0 %1269  ;;  %v6284_v46 = vadd.f32 %v5981_v30, %v1232_v31 }
 0x163   : > { %v6254_v5 = vmul.f32 0.03125, %v1270_v58  ;;  %v987_v58 = vadd.f32 %v986_v53, %v777_v47 }
 0x164   : > { %v1398_v6 = vpop.xlane.xlu2 %1397  ;;  %9342 = vst [vmem:[#allocation10_spill] sm:$0xff] %v6284_v46  ;;  %v1358_v47 = vsel %vm618_vm0, %v6284_v46, 0.0 }
 0x165   : > { %v1556_v11 = vmul.f32 %v6254_v5, %v6254_v5  ;;  %v1524_v12 = vmul.f32 0.03125, %v1398_v6  ;;  %1311 = vadd.xlane.f32.xlu1 %v1310_v59 }
 0x166   : > { %v1034_v14 = vpop.f32.mrf.mxu3 }
 0x167   : > { %v1588_v17 = vsub.f32 %v1524_v12, %v1556_v11  ;;  %v1035_v22 = vadd.f32 %v1034_v14, %v6100_v4  ;;  %1436 = vadd.xlane.f32.xlu0 %v1435_v15  ;;  %v780_v54 = vpop.f32.mrf.mxu0  ;;  %v1217_v11 = vsel %vm1121_vm10, %v987_v58, 0.0 }
 0x168   : > { %v989_v28 = vpop.f32.mrf.mxu1 }
 0x169   : > { %v6272_v32 = vadd.f32 1e-05, %v1588_v17  ;;  %v1233_v34 = vsel %vm1137_vm8, %v1035_v22, 0.0  ;;  %v990_v36 = vadd.f32 %v989_v28, %v780_v54  ;;  %1308 = vadd.xlane.f32.xlu2 %v1307_v25  ;;  %v1090_v22 = vadd.s32 %v5967_v24, %v1057_v8 }
 0x16a   : > { %v6276_v4 = vadd.f32 %v5981_v30, %v1233_v34  ;;  %v1273_v40 = vpop.xlane.xlu0 %1272  ;;  %v6310_v54 = vadd.f32 %v5981_v30, %v1217_v11 }
 0x16b   : > { %5219 = vrsqrt.f32 %v6272_v32  ;;  %v1218_v44 = vsel %vm1122_vm9, %v990_v36, 0.0  ;;  %v6281_v37 = vmul.f32 0.03125, %v1273_v40  ;;  %v1058_v40 = vadd.s32 152, %v5965_v23 }
 0x16c   : > { %9341 = vst [vmem:[#allocation9_spill] sm:$0xff] %v6276_v4  ;;  %v6287_v55 = vadd.f32 %v5981_v30, %v1218_v44  ;;  %v1401_v56 = vpop.xlane.xlu1 %1400  ;;  %v1361_v57 = vsel %vm618_vm0, %v6276_v4, 0.0  ;;  %vm1124_vm13 = vcmp.lt.s32.totalorder %v1090_v22, %v5974_v26  ;;  %vm1690_vm14 = vweird.f32 %v6272_v32 }
 0x16d   : > { %v1557_v59 = vmul.f32 %v6281_v37, %v6281_v37  ;;  %v1525_v63 = vmul.f32 0.03125, %v1401_v56  ;;  %1362 = vadd.xlane.f32.xlu1 %v1361_v57  ;;  %v1313_v56 = vsel %vm618_vm0, %v6310_v54, 0.0  ;;  %v1091_v11 = vadd.s32 %v5967_v24, %v1058_v40 }
 0x16e   : > { %v1380_v53 = vmul.f32 %v6287_v55, %v6287_v55  ;;  %v1316_v15 = vsel %vm618_vm0, %v6287_v55, 0.0 }
 0x16f   : > { %v1589_v3 = vsub.f32 %v1525_v63, %v1557_v59  ;;  %1439 = vadd.xlane.f32.xlu0 %v1438_v0  ;;  %v783_v6 = vpop.f32.mrf.mxu0  ;;  %v1389_v59 = vmul.f32 %v6162_v16, %v6162_v16  ;;  %vm1125_vm2 = vcmp.lt.s32.totalorder %v1091_v11, %v5974_v26 }
 0x170   : > { %v992_v50 = vpop.f32.mrf.mxu1  ;;  %v1444_v31 = vsel %vm618_vm0, %v1380_v53, 0.0 }
 0x171   : > { %v5220_v10 = vpop.eup %5219  ;;  %v6302_v12 = vadd.f32 1e-05, %v1589_v3  ;;  %v993_v13 = vadd.f32 %v992_v50, %v783_v6  ;;  %1359 = vadd.xlane.f32.xlu2 %v1358_v47  ;;  %v1620_v6 = vsub.f32 %v5988_v35, %v6254_v5  ;;  %v6334_v50 = vld [vmem:[%s9296_s2 + $0x1] ss:$0 sm:$0xff]  ;;  %v6342_v35 = vld [vmem:[%s9296_s2 + $0x2] ss:$0 sm:$0xff] }
 0x172   : > { %v1685_v14 = vmul.f32 %v5220_v10, %v6272_v32  ;;  %vm1691_vm12 = vweird.f32 %v5220_v10  ;;  %v1471_v22 = vsel %vm618_vm0, %v1389_v59, 0.0  ;;  %v1621_v59 = vsub.f32 %v6005_v48, %v6281_v37 }
 0x173   : > { %5221 = vrsqrt.f32 %v6302_v12  ;;  %v1219_v17 = vsel %vm1123_vm11, %v993_v13, 0.0  ;;  %vm1692_vm15 = vmor %vm1690_vm14, %vm1691_vm12  ;;  %vm1700_vm3 = vweird.f32 %v6302_v12 }
 0x174   : > { %v1686_v28 = vmul.f32 %v5220_v10, %v1685_v14  ;;  %v6313_v25 = vadd.f32 %v5981_v30, %v1219_v17  ;;  %v1276_v29 = vpop.xlane.xlu1 %1275 }
 0x175   : > { %1317 = vadd.xlane.f32.xlu1 %v1316_v15  ;;  %v6322_v9 = vmul.f32 0.03125, %v1276_v29 }
 0x176   : > { %v1687_v34 = vmul.f32 0.5, %v1686_v28  ;;  %v1381_v36 = vmul.f32 %v6313_v25, %v6313_v25 }
 0x177   : > { %1445 = vadd.xlane.f32.xlu0 %v1444_v31  ;;  %v786_v38 = vpop.f32.mrf.mxu0  ;;  %v1558_v32 = vmul.f32 %v6322_v9, %v6322_v9 }
 0x178   : > { %v1688_v42 = vsub.f32 1.5, %v1687_v34  ;;  %v995_v44 = vpop.f32.mrf.mxu1  ;;  %v1447_v3 = vsel %vm618_vm0, %v1381_v36, 0.0 }
 0x179   : > { %v5222_v57 = vpop.eup %5221  ;;  %v996_v58 = vadd.f32 %v995_v44, %v786_v38  ;;  %1314 = vadd.xlane.f32.xlu2 %v1313_v56  ;;  %v1059_v38 = vadd.s32 160, %v5965_v23 }
 0x17a   : > { %v1689_v63 = vmul.f32 %v5220_v10, %v1688_v42  ;;  %v1695_v0 = vmul.f32 %v5222_v57, %v6302_v12  ;;  %vm1701_vm1 = vweird.f32 %v5222_v57 }
 0x17b   : > { %v1220_v8 = vsel %vm1124_vm13, %v996_v58, 0.0  ;;  %vm1702_vm4 = vmor %vm1700_vm3, %vm1701_vm1 }
 0x17c   : > { %v1696_v47 = vmul.f32 %v5222_v57, %v1695_v0  ;;  %v1404_v53 = vpop.xlane.xlu1 %1403  ;;  %v1693_v13 = vsel %vm1692_vm15, %v5220_v10, %v1689_v63  ;;  %v6345_v17 = vadd.f32 %v5981_v30, %v1220_v8  ;;  %v1319_v10 = vsel %vm618_vm0, %v6313_v25, 0.0 }
 0x17d   : > { %v1526_v14 = vmul.f32 0.03125, %v1404_v53  ;;  %1448 = vadd.xlane.f32.xlu1 %v1447_v3  ;;  %v2004_v15 = vmul.f32 %v1693_v13, %v1620_v6  ;;  %v1379_v0 = vmul.f32 %v6310_v54, %v6310_v54  ;;  %v1092_v8 = vadd.s32 %v5967_v24, %v1059_v38 }
 0x17e   : > { %v1697_v5 = vmul.f32 0.5, %v1696_v47  ;;  %v1322_v58 = vsel %vm618_vm0, %v6345_v17, 0.0  ;;  %v1390_v53 = vmul.f32 %v6184_v49, %v6184_v49 }
 0x17f   : > { %v1590_v28 = vsub.f32 %v1526_v14, %v1558_v32  ;;  %1472 = vadd.xlane.f32.xlu0 %v1471_v22  ;;  %v789_v29 = vpop.f32.mrf.mxu0  ;;  %v2038_v31 = vmul.f32 %v6334_v50, %v2004_v15  ;;  %vm1126_vm5 = vcmp.lt.s32.totalorder %v1092_v8, %v5974_v26  ;;  %v1441_v32 = vsel %vm618_vm0, %v1379_v0, 0.0 }
 0x180   : > { %v1698_v34 = vsub.f32 1.5, %v1697_v5  ;;  %v998_v36 = vpop.f32.mrf.mxu1  ;;  %v1060_v14 = vadd.s32 168, %v5965_v23  ;;  %v1474_v38 = vsel %vm618_vm0, %v1390_v53, 0.0  ;;  %v1622_v53 = vsub.f32 %v6021_v60, %v6322_v9 }
 0x181   : > { %v1654_v40 = vadd.f32 1e-05, %v1590_v28  ;;  %v999_v42 = vadd.f32 %v998_v36, %v789_v29  ;;  %1320 = vadd.xlane.f32.xlu2 %v1319_v10  ;;  %v2072_v44 = vadd.f32 %v6342_v35, %v2038_v31  ;;  %v1382_v29 = vmul.f32 %v6345_v17, %v6345_v17 }
 0x182   : > { %v1699_v56 = vmul.f32 %v5222_v57, %v1698_v34  ;;  %v1282_v28 = vpop.xlane.xlu2 %1281  ;;  %v1061_v60 = vadd.s32 176, %v5965_v23 }
 0x183   : > { %5223 = vrsqrt.f32 %v1654_v40  ;;  %v1221_v63 = vsel %vm1125_vm2, %v999_v42, 0.0  ;;  %v2104_v6 = vmax.f32 %v2072_v44, 0.0  ;;  %v1093_v44 = vadd.s32 %v5967_v24, %v1060_v14 }
 0x184   : > { %v6362_v3 = vadd.f32 %v5981_v30, %v1221_v63  ;;  %v1703_v47 = vsel %vm1702_vm4, %v5222_v57, %v1699_v56  ;;  %vm1710_vm8 = vweird.f32 %v1654_v40  ;;  %v6404_v9 = vmul.f32 0.03125, %v1282_v28 }
 0x185   : > { %1323 = vadd.xlane.f32.xlu1 %v1322_v58  ;;  %v2005_v12 = vmul.f32 %v1703_v47, %v1621_v59  ;;  %5022 = vmatmul.msk.f32.vlgmr.msra.gmra.mxu2 %vm618_vm0, %v2104_v6  ;;  %v1450_v59 = vsel %vm618_vm0, %v1382_v29, 0.0  ;;  %vm1127_vm7 = vcmp.lt.s32.totalorder %v1093_v44, %v5974_v26  ;;  %v1094_v44 = vadd.s32 %v5967_v24, %v1061_v60 }
 0x186   : > { %v1325_v48 = vsel %vm618_vm0, %v6362_v3, 0.0  ;;  %v1383_v57 = vmul.f32 %v6362_v3, %v6362_v3 }
 0x187   : > { %1326 = vadd.xlane.f32.xlu0 %v1325_v48  ;;  %v792_v37 = vpop.f32.mrf.mxu0  ;;  %v2039_v11 = vmul.f32 %v6334_v50, %v2005_v12  ;;  %v1279_v12 = vpop.xlane.xlu1 %1278  ;;  %vm1128_vm10 = vcmp.lt.s32.totalorder %v1094_v44, %v5974_v26  ;;  %v1391_v44 = vmul.f32 %v6202_v7, %v6202_v7 }
 0x188   : > { %v1001_v13 = vpop.f32.mrf.mxu1  ;;  %v1453_v42 = vsel %vm618_vm0, %v1383_v57, 0.0  ;;  %v1388_v57 = vmul.f32 %v6131_v45, %v6131_v45 }
 0x189   : > { %v5224_v15 = vpop.eup %5223  ;;  %v1002_v5 = vadd.f32 %v1001_v13, %v792_v37  ;;  %1442 = vadd.xlane.f32.xlu2 %v1441_v32  ;;  %v2073_v22 = vadd.f32 %v6342_v35, %v2039_v11 }
 0x18a   : > { %v1705_v10 = vmul.f32 %v5224_v15, %v1654_v40  ;;  %vm1711_vm6 = vweird.f32 %v5224_v15  ;;  %v1285_v13 = vpop.xlane.xlu2 %1284 }
 0x18b   : > { %v1222_v31 = vsel %vm1126_vm5, %v1002_v5, 0.0  ;;  %v2105_v34 = vmax.f32 %v2073_v22, 0.0  ;;  %vm1712_vm9 = vmor %vm1710_vm8, %vm1711_vm6 }
 0x18c   : > { %v1706_v36 = vmul.f32 %v5224_v15, %v1705_v10  ;;  %v6383_v58 = vadd.f32 %v5981_v30, %v1222_v31  ;;  %v1468_v10 = vsel %vm618_vm0, %v1388_v57, 0.0  ;;  %v6424_v57 = vmul.f32 0.03125, %v1285_v13 }
 0x18d   : > { %1475 = vadd.xlane.f32.xlu1 %v1474_v38  ;;  %5023 = vmatmul.msk.f32.gmra.mxu2 %vm618_vm0, %v2105_v34 }
 0x18e   : > { %v1707_v56 = vmul.f32 0.5, %v1706_v36  ;;  %v1328_v37 = vsel %vm618_vm0, %v6383_v58, 0.0  ;;  %v1384_v22 = vmul.f32 %v6383_v58, %v6383_v58 }
 0x18f   : > { %1454 = vadd.xlane.f32.xlu0 %v1453_v42  ;;  %v795_v63 = vpop.f32.mrf.mxu0  ;;  %v1392_v42 = vmul.f32 %v6222_v41, %v6222_v41 }
 0x190   : > { %v1708_v0 = vsub.f32 1.5, %v1707_v56  ;;  %v1004_v6 = vpop.f32.mrf.mxu1  ;;  %v1456_v38 = vsel %vm618_vm0, %v1384_v22, 0.0  ;;  %v1560_v56 = vmul.f32 %v6404_v9, %v6404_v9 }
 0x191   : > { %v1005_v8 = vadd.f32 %v1004_v6, %v795_v63  ;;  %1451 = vadd.xlane.f32.xlu2 %v1450_v59  ;;  %v1062_v6 = vadd.s32 184, %v5965_v23  ;;  %v1393_v23 = vmul.f32 %v6219_v33, %v6219_v33 }
 0x192   : > { %v1709_v47 = vmul.f32 %v5224_v15, %v1708_v0  ;;  %v6388_v48 = vpop.xlane.xlu0 %1287 }
 0x193   : > { %v1223_v11 = vsel %vm1127_vm7, %v1005_v8, 0.0  ;;  %v1095_v22 = vadd.s32 %v5967_v24, %v1062_v6  ;;  %v1483_v24 = vsel %vm618_vm0, %v1393_v23, 0.0 }
 0x194   : > { %v6395_v32 = vadd.f32 %v5981_v30, %v1223_v11  ;;  %v1713_v14 = vsel %vm1712_vm9, %v5224_v15, %v1709_v47 }
 0x195   : > { %1329 = vadd.xlane.f32.xlu1 %v1328_v37  ;;  %v2006_v40 = vmul.f32 %v1713_v14, %v1622_v53  ;;  %v6419_v37 = vmul.f32 0.03125, %v1279_v12  ;;  %v1480_v53 = vsel %vm618_vm0, %v1392_v42, 0.0  ;;  %v5475_v42 = vld [vmem:[%s9296_s2] ss:$0 sm:$0xff]  ;;  %vm1129_vm11 = vcmp.lt.s32.totalorder %v1095_v22, %v5974_v26 }
 0x196   : > { %v1331_v5 = vsel %vm618_vm0, %v6395_v32, 0.0  ;;  %v1385_v28 = vmul.f32 %v6395_v32, %v6395_v32 }
 0x197   : > { %1332 = vadd.xlane.f32.xlu0 %v1331_v5  ;;  %v2040_v30 = vmul.f32 %v6334_v50, %v2006_v40  ;;  %v798_v29 = vpop.f32.mrf.mxu0  ;;  %v1559_v60 = vmul.f32 %v6419_v37, %v6419_v37 }
 0x198   : > { %v1007_v31 = vpop.f32.mrf.mxu1  ;;  %v1459_v11 = vsel %vm618_vm0, %v1385_v28, 0.0 }
 0x199   : > { %1469 = vadd.xlane.f32.xlu2 %v1468_v10  ;;  %v2074_v15 = vadd.f32 %v6342_v35, %v2040_v30  ;;  %v1008_v47 = vadd.f32 %v1007_v31, %v798_v29  ;;  %v1395_v10 = vmul.f32 %v6276_v4, %v6276_v4  ;;  %v1561_v29 = vmul.f32 %v6424_v57, %v6424_v57 }
 0x19a   : > { %v1291_v34 = vpop.xlane.xlu1 %1290  ;;  %v1410_v36 = vpop.xlane.xlu0 %1409 }
 0x19b   : > { %v1528_v59 = vmul.f32 0.03125, %v1410_v36  ;;  %v2106_v63 = vmax.f32 %v2074_v15, 0.0  ;;  %v1224_v12 = vsel %vm1128_vm10, %v1008_v47, 0.0  ;;  %v1489_v6 = vsel %vm618_vm0, %v1395_v10, 0.0 }
 0x19c   : > { %v1419_v0 = vpop.xlane.xlu2 %1418  ;;  %v6442_v28 = vadd.f32 %v5475_v42, %v1224_v12  ;;  %v6453_v47 = vmul.f32 0.03125, %v6388_v48 }
 0x19d   : > { %v1592_v8 = vsub.f32 %v1528_v59, %v1560_v56  ;;  %1457 = vadd.xlane.f32.xlu1 %v1456_v38  ;;  %5024 = vmatmul.msk.f32.gmra.mxu2 %vm618_vm0, %v2106_v63  ;;  %v6447_v56 = vmul.f32 0.03125, %v1291_v34  ;;  %v1477_v34 = vsel %vm618_vm0, %v1391_v44, 0.0  ;;  %v1531_v22 = vmul.f32 0.03125, %v1419_v0 }
 0x19e   : > { %9343 = vst [vmem:[#allocation11_spill] sm:$0xff] %v6442_v28  ;;  %v1334_v12 = vsel %vm618_vm0, %v6442_v28, 0.0 }
 0x19f   : > { %v6426_v14 = vadd.f32 1e-05, %v1592_v8  ;;  %1481 = vadd.xlane.f32.xlu0 %v1480_v53  ;;  %v801_v40 = vpop.f32.mrf.mxu0 }
 0x1a0   : > { %v1010_v5 = vpop.f32.mrf.mxu1 }
 0x1a1   : > { %5225 = vrsqrt.f32 %v6426_v14  ;;  %1460 = vadd.xlane.f32.xlu2 %v1459_v11  ;;  %v1011_v36 = vadd.f32 %v1010_v5, %v801_v40  ;;  %v1386_v40 = vmul.f32 %v6442_v28, %v6442_v28  ;;  %v1563_v5 = vmul.f32 %v6447_v56, %v6447_v56 }
 0x1a2   : > { %v1407_v30 = vpop.xlane.xlu1 %1406  ;;  %v1413_v13 = vpop.xlane.xlu0 %1412  ;;  %vm1730_vm15 = vweird.f32 %v6426_v14 }
 0x1a3   : > { %v1527_v31 = vmul.f32 0.03125, %v1407_v30  ;;  %v1529_v15 = vmul.f32 0.03125, %v1413_v13  ;;  %v1225_v23 = vsel %vm1129_vm11, %v1011_v36, 0.0  ;;  %v1562_v30 = vmul.f32 %v6453_v47, %v6453_v47 }
 0x1a4   : > { %v1422_v38 = vpop.xlane.xlu2 %1421  ;;  %v1462_v0 = vsel %vm618_vm0, %v1386_v40, 0.0 }
 0x1a5   : > { %v1591_v59 = vsub.f32 %v1527_v31, %v1559_v60  ;;  %v1593_v63 = vsub.f32 %v1529_v15, %v1561_v29  ;;  %1484 = vadd.xlane.f32.xlu1 %v1483_v24  ;;  %v6470_v60 = vadd.f32 %v5475_v42, %v1225_v23  ;;  %v1394_v31 = vmul.f32 %v6284_v46, %v6284_v46 }
 0x1a6   : > { %v1595_v15 = vsub.f32 %v1531_v22, %v1563_v5 }
 0x1a7   : > { %v6450_v8 = vpop.eup %5225  ;;  %v6455_v53 = vadd.f32 1e-05, %v1591_v59  ;;  %v6457_v11 = vadd.f32 1e-05, %v1593_v63  ;;  %1490 = vadd.xlane.f32.xlu0 %v1489_v6  ;;  %9344 = vst [vmem:[#allocation12_spill] sm:$0xff] %v6470_v60  ;;  %v1387_v24 = vmul.f32 %v6470_v60, %v6470_v60  ;;  %v1486_v23 = vsel %vm618_vm0, %v1394_v31, 0.0 }
 0x1a8   : > { %v1725_v26 = vmul.f32 %v6450_v8, %v6426_v14  ;;  %vm1731_vm13 = vweird.f32 %v6450_v8  ;;  %v1624_v14 = vsub.f32 %v6051_v21, %v6404_v9 }
 0x1a9   : > { %5227 = vrsqrt.f32 %v6455_v53  ;;  %1478 = vadd.xlane.f32.xlu2 %v1477_v34  ;;  %v1465_v22 = vsel %vm618_vm0, %v1387_v24, 0.0  ;;  %vm1720_vm14 = vweird.f32 %v6455_v53  ;;  %vm6514_vm2 = vmor %vm1730_vm15, %vm1731_vm13  ;;  %vm1740_vm4 = vweird.f32 %v6457_v11 }
 0x1aa   : > { %5229 = vrsqrt.f32 %v6457_v11  ;;  %v1416_v48 = vpop.xlane.xlu0 %1415  ;;  %v1726_v13 = vmul.f32 %v6450_v8, %v1725_v26  ;;  %v6488_v26 = vadd.f32 1e-05, %v1595_v15  ;;  %v1532_v15 = vmul.f32 0.03125, %v1422_v38 }
 0x1ab   : > { %v1530_v10 = vmul.f32 0.03125, %v1416_v48 }
 0x1ac   : > { %v6475_v29 = vpop.xlane.xlu2 %1341  ;;  %v1727_v44 = vmul.f32 0.5, %v1726_v13  ;;  %vm1760_vm10 = vweird.f32 %v6488_v26 }
 0x1ad   : > { %v1594_v36 = vsub.f32 %v1530_v10, %v1562_v30  ;;  %1335 = vadd.xlane.f32.xlu1 %v1334_v12 }
 0x1ae   : > { %v1728_v48 = vsub.f32 1.5, %v1727_v44 }
 0x1af   : > { %v5228_v42 = vpop.eup %5227  ;;  %v6482_v59 = vadd.f32 1e-05, %v1594_v36  ;;  %1463 = vadd.xlane.f32.xlu0 %v1462_v0  ;;  %v1337_v0 = vsel %vm618_vm0, %v6470_v60, 0.0 }
 0x1b0   : > { %v6484_v63 = vpop.eup %5229  ;;  %v1715_v6 = vmul.f32 %v5228_v42, %v6455_v53  ;;  %vm1721_vm12 = vweird.f32 %v5228_v42  ;;  %v1729_v44 = vmul.f32 %v6450_v8, %v1728_v48 }
 0x1b1   : > { %v1735_v34 = vmul.f32 %v6484_v63, %v6457_v11  ;;  %5231 = vrsqrt.f32 %v6482_v59  ;;  %1487 = vadd.xlane.f32.xlu2 %v1486_v23  ;;  %vm1722_vm1 = vmor %vm1720_vm14, %vm1721_vm12  ;;  %vm1741_vm3 = vweird.f32 %v6484_v63  ;;  %vm1750_vm7 = vweird.f32 %v6482_v59 }
 0x1b2   : > { %v1716_v40 = vmul.f32 %v5228_v42, %v1715_v6  ;;  %v1294_v5 = vpop.xlane.xlu0 %1293  ;;  %5233 = vrsqrt.f32 %v6488_v26  ;;  %vm6543_vm5 = vmor %vm1740_vm4, %vm1741_vm3 }
 0x1b3   : > { %v1736_v12 = vmul.f32 %v6484_v63, %v1735_v34  ;;  %v6495_v30 = vmul.f32 0.03125, %v1294_v5  ;;  %v1623_v5 = vsub.f32 %v6048_v20, %v6419_v37  ;;  %v1733_v37 = vsel %vm6514_vm2, %v6450_v8, %v1729_v44 }
 0x1b4   : > { %v1717_v13 = vmul.f32 0.5, %v1716_v40  ;;  %v1297_v10 = vpop.xlane.xlu2 %1296  ;;  %v1428_v31 = vpop.xlane.xlu1 %1427 }
 0x1b5   : > { %v1564_v36 = vmul.f32 %v6495_v30, %v6495_v30  ;;  %1466 = vadd.xlane.f32.xlu1 %v1465_v22  ;;  %v1737_v23 = vmul.f32 0.5, %v1736_v12  ;;  %v6512_v22 = vmul.f32 0.03125, %v1297_v10 }
 0x1b6   : > { %v1718_v6 = vsub.f32 1.5, %v1717_v13 }
 0x1b7   : > { %v6502_v24 = vpop.eup %5231  ;;  %v1596_v34 = vsub.f32 %v1532_v15, %v1564_v36  ;;  %1338 = vadd.xlane.f32.xlu0 %v1337_v0  ;;  %v1738_v15 = vsub.f32 1.5, %v1737_v23 }
 0x1b8   : > { %v1719_v40 = vmul.f32 %v5228_v42, %v1718_v6  ;;  %v1745_v38 = vmul.f32 %v6502_v24, %v6482_v59  ;;  %v6522_v0 = vpop.eup %5233  ;;  %vm1751_vm6 = vweird.f32 %v6502_v24 }
 0x1b9   : > { %v6518_v12 = vadd.f32 1e-05, %v1596_v34  ;;  %v1565_v34 = vmul.f32 %v6512_v22, %v6512_v22  ;;  %vm6569_vm8 = vmor %vm1750_vm7, %vm1751_vm6  ;;  %vm1761_vm9 = vweird.f32 %v6522_v0 }
 0x1ba   : > { %v6520_v13 = vpop.xlane.xlu0 %1344  ;;  %v1723_v53 = vsel %vm1722_vm1, %v5228_v42, %v1719_v40  ;;  %v1746_v36 = vmul.f32 %v6502_v24, %v1745_v38  ;;  %v1755_v42 = vmul.f32 %v6522_v0, %v6488_v26  ;;  %v2008_v40 = vmul.f32 %v1733_v37, %v1624_v14  ;;  %vm6600_vm11 = vmor %vm1760_vm10, %vm1761_vm9 }
 0x1bb   : > { %v2007_v20 = vmul.f32 %v1723_v53, %v1623_v5  ;;  %5235 = vrsqrt.f32 %v6518_v12  ;;  %v1739_v38 = vmul.f32 %v6484_v63, %v1738_v15  ;;  %vm1770_vm13 = vweird.f32 %v6518_v12 }
 0x1bc   : > { %v1425_v10 = vpop.xlane.xlu2 %1424  ;;  %v1431_v6 = vpop.xlane.xlu1 %1430  ;;  %v1747_v8 = vmul.f32 0.5, %v1746_v36  ;;  %v1756_v5 = vmul.f32 %v6522_v0, %v1755_v42  ;;  %v2042_v15 = vmul.f32 %v6334_v50, %v2008_v40  ;;  %v1625_v36 = vsub.f32 %v6067_v39, %v6424_v57 }
 0x1bd   : > { %v1533_v19 = vmul.f32 0.03125, %v1425_v10  ;;  %v2041_v23 = vmul.f32 %v6334_v50, %v2007_v20 }
 0x1be   : > { %v1748_v37 = vsub.f32 1.5, %v1747_v8  ;;  %v2076_v8 = vadd.f32 %v6342_v35, %v2042_v15 }
 0x1bf   : > { %v1597_v21 = vsub.f32 %v1533_v19, %v1565_v34  ;;  %v2075_v9 = vadd.f32 %v6342_v35, %v2041_v23  ;;  %v1743_v19 = vsel %vm6543_vm5, %v6484_v63, %v1739_v38  ;;  %v1534_v34 = vmul.f32 0.03125, %v1428_v31 }
 0x1c0   : > { %v1757_v23 = vmul.f32 0.5, %v1756_v5  ;;  %v2009_v63 = vmul.f32 %v1743_v19, %v1625_v36  ;;  %v1749_v38 = vmul.f32 %v6502_v24, %v1748_v37  ;;  %v2108_v5 = vmax.f32 %v2076_v8, 0.0 }
 0x1c1   : > { %v6540_v44 = vadd.f32 1e-05, %v1597_v21  ;;  %v2107_v20 = vmax.f32 %v2075_v9, 0.0  ;;  %v6553_v11 = vpop.eup %5235  ;;  %v1626_v37 = vsub.f32 %v6081_v52, %v6453_v47 }
 0x1c2   : > { %v1300_v53 = vpop.xlane.xlu0 %1299  ;;  %v1765_v39 = vmul.f32 %v6553_v11, %v6518_v12  ;;  %v2043_v48 = vmul.f32 %v6334_v50, %v2009_v63  ;;  %v1753_v59 = vsel %vm6569_vm8, %v6502_v24, %v1749_v38  ;;  %v1535_v63 = vmul.f32 0.03125, %v1431_v6 }
 0x1c3   : > { %v6548_v14 = vmul.f32 0.03125, %v1300_v53  ;;  %5025 = vmatmul.msk.f32.gmra.mxu2 %vm618_vm0, %v2107_v20  ;;  %5237 = vrsqrt.f32 %v6540_v44  ;;  %v1758_v20 = vsub.f32 1.5, %v1757_v23  ;;  %v2010_v23 = vmul.f32 %v1753_v59, %v1626_v37 }
 0x1c4   : > { %v6558_v10 = vpop.xlane.xlu2 %1347  ;;  %v1434_v40 = vpop.xlane.xlu1 %1433  ;;  %v1766_v15 = vmul.f32 %v6553_v11, %v1765_v39  ;;  %v1627_v37 = vsub.f32 %v6097_v2, %v6447_v56  ;;  %vm1771_vm12 = vweird.f32 %v6553_v11  ;;  %vm1780_vm1 = vweird.f32 %v6540_v44 }
 0x1c5   : > { %v1566_v42 = vmul.f32 %v6548_v14, %v6548_v14  ;;  %v1759_v24 = vmul.f32 %v6522_v0, %v1758_v20  ;;  %vm1772_vm14 = vmor %vm1770_vm13, %vm1771_vm12 }
 0x1c6   : > { %v1767_v8 = vmul.f32 0.5, %v1766_v15 }
 0x1c7   : > { %v1598_v57 = vsub.f32 %v1534_v34, %v1566_v42  ;;  %v2077_v42 = vadd.f32 %v6342_v35, %v2043_v48  ;;  %v2044_v48 = vmul.f32 %v6334_v50, %v2010_v23  ;;  %v1763_v26 = vsel %vm6600_vm11, %v6522_v0, %v1759_v24 }
 0x1c8   : > { %v1768_v20 = vsub.f32 1.5, %v1767_v8 }
 0x1c9   : > { %v6573_v21 = vadd.f32 1e-05, %v1598_v57  ;;  %v6578_v53 = vpop.eup %5237  ;;  %v2078_v8 = vadd.f32 %v6342_v35, %v2044_v48 }
 0x1ca   : > { %v6575_v9 = vpop.xlane.xlu0 %1350  ;;  %v1775_v34 = vmul.f32 %v6578_v53, %v6540_v44  ;;  %v1769_v0 = vmul.f32 %v6553_v11, %v1768_v20  ;;  %v1628_v20 = vsub.f32 %v6116_v18, %v6495_v30  ;;  %vm1781_vm15 = vweird.f32 %v6578_v53 }
 0x1cb   : > { %5026 = vmatmul.msk.f32.gmra.mxu2 %vm618_vm0, %v2108_v5  ;;  %5239 = vrsqrt.f32 %v6573_v21  ;;  %v2109_v5 = vmax.f32 %v2077_v42, 0.0  ;;  %v2110_v39 = vmax.f32 %v2078_v8, 0.0  ;;  %vm6652_vm2 = vmor %vm1780_vm1, %vm1781_vm15  ;;  %vm1790_vm4 = vweird.f32 %v6573_v21 }
 0x1cc   : > { %v1303_v19 = vpop.xlane.xlu2 %1302  ;;  %v1776_v57 = vmul.f32 %v6578_v53, %v1775_v34  ;;  %v1536_v34 = vmul.f32 0.03125, %v1434_v40 }
 0x1cd   : > { %v6588_v36 = vmul.f32 0.03125, %v1303_v19 }
 0x1ce   : > { %v1777_v23 = vmul.f32 0.5, %v1776_v57 }
 0x1cf   : > { %v1567_v52 = vmul.f32 %v6588_v36, %v6588_v36 }
 0x1d0   : > { %v6597_v47 = vpop.xlane.xlu1 %1356 }
 0x1d1   : > { %v1599_v38 = vsub.f32 %v1535_v63, %v1567_v52  ;;  %v6613_v59 = vpop.eup %5239  ;;  %v2011_v63 = vmul.f32 %v1763_v26, %v1627_v37  ;;  %v1778_v52 = vsub.f32 1.5, %v1777_v23 }
 0x1d2   : > { %v1306_v31 = vpop.xlane.xlu0 %1305  ;;  %v1785_v2 = vmul.f32 %v6613_v59, %v6573_v21  ;;  %vm1791_vm3 = vweird.f32 %v6613_v59 }
 0x1d3   : > { %v6606_v6 = vadd.f32 1e-05, %v1599_v38  ;;  %v6608_v15 = vmul.f32 0.03125, %v1306_v31  ;;  %5027 = vmatmul.msk.f32.gmra.mxu2 %vm618_vm0, %v2109_v5  ;;  %v2045_v57 = vmul.f32 %v6334_v50, %v2011_v63  ;;  %v1773_v5 = vsel %vm1772_vm14, %v6553_v11, %v1769_v0  ;;  %vm6685_vm5 = vmor %vm1790_vm4, %vm1791_vm3 }
 0x1d4   : > { %v6618_v19 = vpop.xlane.xlu2 %1353  ;;  %v1786_v48 = vmul.f32 %v6613_v59, %v1785_v2 }
 0x1d5   : > { %5241 = vrsqrt.f32 %v6606_v6  ;;  %v1568_v42 = vmul.f32 %v6608_v15, %v6608_v15  ;;  %v2079_v11 = vadd.f32 %v6342_v35, %v2045_v57  ;;  %vm1800_vm7 = vweird.f32 %v6606_v6 }
 0x1d6   : > { %v1787_v23 = vmul.f32 0.5, %v1786_v48 }
 0x1d7   : > { %v1600_v56 = vsub.f32 %v1536_v34, %v1568_v42  ;;  %v2012_v34 = vmul.f32 %v1773_v5, %v1628_v20  ;;  %v1779_v42 = vmul.f32 %v6578_v53, %v1778_v52 }
 0x1d8   : > { %v1312_v24 = vpop.xlane.xlu1 %1311  ;;  %v1788_v5 = vsub.f32 1.5, %v1787_v23 }
 0x1d9   : > { %v6629_v40 = vadd.f32 1e-05, %v1600_v56  ;;  %v6657_v2 = vmul.f32 0.03125, %v1312_v24  ;;  %v1783_v57 = vsel %vm6652_vm2, %v6578_v53, %v1779_v42  ;;  %v1629_v24 = vsub.f32 %v6143_v62, %v6512_v22 }
 0x1da   : > { %v1437_v38 = vpop.xlane.xlu0 %1436 }
 0x1db   : > { %v6632_v31 = vpop.eup %5241  ;;  %5028 = vmatmul.msk.f32.gmra.mxu2 %vm618_vm0, %v2110_v39  ;;  %5243 = vrsqrt.f32 %v6629_v40  ;;  %v1537_v8 = vmul.f32 0.03125, %v1437_v38  ;;  %v2111_v39 = vmax.f32 %v2079_v11, 0.0  ;;  %v2046_v38 = vmul.f32 %v6334_v50, %v2012_v34 }
 0x1dc   : > { %v1309_v12 = vpop.xlane.xlu2 %1308  ;;  %v1795_v26 = vmul.f32 %v6632_v31, %v6606_v6  ;;  %v1570_v48 = vmul.f32 %v6657_v2, %v6657_v2  ;;  %v2013_v23 = vmul.f32 %v1783_v57, %v1629_v24  ;;  %vm1801_vm6 = vweird.f32 %v6632_v31 }
 0x1dd   : > { %v6642_v37 = vmul.f32 0.03125, %v1309_v12  ;;  %v2080_v11 = vadd.f32 %v6342_v35, %v2046_v38  ;;  %vm1802_vm8 = vmor %vm1800_vm7, %vm1801_vm6  ;;  %vm1810_vm10 = vweird.f32 %v6629_v40 }
 0x1de   : > { %v1796_v0 = vmul.f32 %v6632_v31, %v1795_v26  ;;  %v2047_v38 = vmul.f32 %v6334_v50, %v2013_v23 }
 0x1df   : > { %v1569_v18 = vmul.f32 %v6642_v37, %v6642_v37 }
 0x1e0   : > { %v6650_v30 = vpop.xlane.xlu1 %1362  ;;  %v1797_v34 = vmul.f32 0.5, %v1796_v0 }
 0x1e1   : > { %v1601_v56 = vsub.f32 %v1537_v8, %v1569_v18  ;;  %v6663_v44 = vpop.eup %5243  ;;  %v1789_v8 = vmul.f32 %v6613_v59, %v1788_v5 }
 0x1e2   : > { %v1440_v52 = vpop.xlane.xlu0 %1439  ;;  %v1805_v42 = vmul.f32 %v6663_v44, %v6629_v40  ;;  %v1798_v22 = vsub.f32 1.5, %v1797_v34  ;;  %vm1811_vm9 = vweird.f32 %v6663_v44 }
 0x1e3   : > { %v6667_v20 = vadd.f32 1e-05, %v1601_v56  ;;  %v1538_v12 = vmul.f32 0.03125, %v1440_v52  ;;  %5029 = vmatmul.msk.f32.gmra.mxu2 %vm618_vm0, %v2111_v39  ;;  %v2112_v39 = vmax.f32 %v2080_v11, 0.0  ;;  %v1793_v5 = vsel %vm6685_vm5, %v6613_v59, %v1789_v8  ;;  %vm6736_vm12 = vmor %vm1810_vm10, %vm1811_vm9 }
 0x1e4   : > { %v6672_v26 = vpop.xlane.xlu2 %1359  ;;  %v1806_v56 = vmul.f32 %v6663_v44, %v1805_v42  ;;  %v2081_v8 = vadd.f32 %v6342_v35, %v2047_v38  ;;  %v6718_v38 = vmul.f32 0.03125, %v6520_v13 }
 0x1e5   : > { %5245 = vrsqrt.f32 %v6667_v20  ;;  %v1602_v53 = vsub.f32 %v1538_v12, %v1570_v48  ;;  %v1630_v12 = vsub.f32 %v6148_v1, %v6548_v14  ;;  %vm1820_vm13 = vweird.f32 %v6667_v20 }
 0x1e6   : > { %v1807_v11 = vmul.f32 0.5, %v1806_v56 }
 0x1e7   : > { %v6680_v18 = vadd.f32 1e-05, %v1602_v53  ;;  %v1799_v53 = vmul.f32 %v6632_v31, %v1798_v22  ;;  %v2014_v42 = vmul.f32 %v1793_v5, %v1630_v12  ;;  %v1631_v22 = vsub.f32 %v6166_v27, %v6588_v36 }
 0x1e8   : > { %v1318_v62 = vpop.xlane.xlu1 %1317  ;;  %v2113_v5 = vmax.f32 %v2081_v8, 0.0 }
 0x1e9   : > { %v6683_v63 = vmul.f32 0.03125, %v1318_v62  ;;  %5247 = vrsqrt.f32 %v6680_v18  ;;  %v1803_v62 = vsel %vm1802_vm8, %v6632_v31, %v1799_v53  ;;  %vm1830_vm1 = vweird.f32 %v6680_v18 }
 0x1ea   : > { %v1446_v52 = vpop.xlane.xlu0 %1445  ;;  %v2015_v6 = vmul.f32 %v1803_v62, %v1631_v22 }
 0x1eb   : > { %v6691_v57 = vpop.eup %5245  ;;  %v1572_v21 = vmul.f32 %v6683_v63, %v6683_v63  ;;  %v1540_v48 = vmul.f32 0.03125, %v1446_v52  ;;  %5030 = vmatmul.msk.f32.gmra.mxu2 %vm618_vm0, %v2112_v39  ;;  %v1808_v39 = vsub.f32 1.5, %v1807_v11 }
 0x1ec   : > { %v1815_v24 = vmul.f32 %v6691_v57, %v6667_v20  ;;  %v1315_v34 = vpop.xlane.xlu2 %1314  ;;  %vm1821_vm11 = vweird.f32 %v6691_v57 }
 0x1ed   : > { %v1604_v59 = vsub.f32 %v1540_v48, %v1572_v21  ;;  %v2048_v21 = vmul.f32 %v6334_v50, %v2014_v42  ;;  %v1809_v36 = vmul.f32 %v6663_v44, %v1808_v39  ;;  %v1581_v42 = vmul.f32 %v6718_v38, %v6718_v38  ;;  %vm6759_vm14 = vmor %vm1820_vm13, %vm1821_vm11 }
 0x1ee   : > { %v1816_v23 = vmul.f32 %v6691_v57, %v1815_v24 }
 0x1ef   : > { %v6709_v14 = vpop.eup %5247  ;;  %v6712_v52 = vadd.f32 1e-05, %v1604_v59  ;;  %v2082_v13 = vadd.f32 %v6342_v35, %v2048_v21  ;;  %v1813_v40 = vsel %vm6736_vm12, %v6663_v44, %v1809_v36 }
 0x1f0   : > { %v1449_v1 = vpop.xlane.xlu1 %1448  ;;  %v1817_v0 = vmul.f32 0.5, %v1816_v23  ;;  %v1825_v48 = vmul.f32 %v6709_v14, %v6680_v18  ;;  %v2049_v23 = vmul.f32 %v6334_v50, %v2015_v6  ;;  %v1632_v6 = vsub.f32 %v6188_v51, %v6608_v15 }
 0x1f1   : > { %5249 = vrsqrt.f32 %v6712_v52  ;;  %v1541_v24 = vmul.f32 0.03125, %v1449_v1  ;;  %vm1831_vm15 = vweird.f32 %v6709_v14  ;;  %v6843_v18 = vmul.f32 0.03125, %v6650_v30 }
 0x1f2   : > { %v1473_v56 = vpop.xlane.xlu0 %1472  ;;  %v1818_v12 = vsub.f32 1.5, %v1817_v0  ;;  %v1826_v62 = vmul.f32 %v6709_v14, %v1825_v48  ;;  %v6742_v0 = vmul.f32 0.03125, %v1315_v34  ;;  %v6755_v34 = vmul.f32 0.03125, %v6475_v29  ;;  %vm6836_vm2 = vmor %vm1830_vm1, %vm1831_vm15 }
 0x1f3   : > { %5031 = vmatmul.msk.f32.gmra.mxu2 %vm618_vm0, %v2113_v5  ;;  %v1549_v53 = vmul.f32 0.03125, %v1473_v56  ;;  %v2114_v5 = vmax.f32 %v2082_v13, 0.0  ;;  %v6776_v13 = vmul.f32 0.03125, %v6558_v10  ;;  %9363 = vst [vmem:[#allocation13_spill] sm:$0xff] %v6843_v18  ;;  %vm1850_vm3 = vweird.f32 %v6712_v52 }
 0x1f4   : > { %v1321_v31 = vpop.xlane.xlu2 %1320  ;;  %v1819_v1 = vmul.f32 %v6691_v57, %v1818_v12  ;;  %v2083_v12 = vadd.f32 %v6342_v35, %v2049_v23  ;;  %v1827_v15 = vmul.f32 0.5, %v1826_v62  ;;  %v1571_v29 = vmul.f32 %v6742_v0, %v6742_v0 }
 0x1f5   : > { %v6724_v27 = vmul.f32 0.03125, %v1321_v31  ;;  %v1613_v39 = vsub.f32 %v1549_v53, %v1581_v42  ;;  %v6785_v8 = vmul.f32 %v6755_v34, %v6755_v34 }
 0x1f6   : > { %v1823_v51 = vsel %vm6759_vm14, %v6691_v57, %v1819_v1  ;;  %v6781_v57 = vmul.f32 0.03125, %v6575_v9  ;;  %v1828_v62 = vsub.f32 1.5, %v1827_v15 }
 0x1f7   : > { %v1573_v59 = vmul.f32 %v6724_v27, %v6724_v27  ;;  %v6747_v21 = vpop.eup %5249  ;;  %v6772_v36 = vadd.f32 1e-05, %v1613_v39 }
 0x1f8   : > { %v1324_v11 = vpop.xlane.xlu1 %1323  ;;  %v1845_v20 = vmul.f32 %v6747_v21, %v6712_v52  ;;  %v1829_v15 = vmul.f32 %v6709_v14, %v1828_v62  ;;  %v6824_v62 = vmul.f32 0.03125, %v6597_v47  ;;  %vm1851_vm4 = vweird.f32 %v6747_v21 }
 0x1f9   : > { %v1605_v22 = vsub.f32 %v1541_v24, %v1573_v59  ;;  %v2016_v24 = vmul.f32 %v1813_v40, %v1632_v6  ;;  %v1633_v59 = vsub.f32 %v6231_v43, %v6642_v37  ;;  %v2115_v37 = vmax.f32 %v2083_v12, 0.0  ;;  %vm6889_vm5 = vmor %vm1850_vm3, %vm1851_vm4 }
 0x1fa   : > { %v1327_v56 = vpop.xlane.xlu0 %1326  ;;  %v1846_v40 = vmul.f32 %v6747_v21, %v1845_v20  ;;  %v6846_v6 = vmul.f32 0.03125, %v6672_v26  ;;  %v1636_v26 = vsub.f32 %v6287_v55, %v6683_v63  ;;  %vm1940_vm12 = vweird.f32 %v6772_v36 }
 0x1fb   : > { %v6752_v31 = vadd.f32 1e-05, %v1605_v22  ;;  %5032 = vmatmul.msk.f32.gmra.mxu2 %vm618_vm0, %v2114_v5  ;;  %v2017_v1 = vmul.f32 %v1823_v51, %v1633_v59  ;;  %v2050_v22 = vmul.f32 %v6334_v50, %v2016_v24  ;;  %v1582_v5 = vmul.f32 %v6776_v13, %v6776_v13 }
 0x1fc   : > { %v1443_v44 = vpop.xlane.xlu2 %1442  ;;  %v6806_v24 = vmul.f32 0.03125, %v1324_v11  ;;  %v6816_v11 = vmul.f32 0.03125, %v1327_v56  ;;  %v1634_v56 = vsub.f32 %v6234_v61, %v6657_v2  ;;  %9364 = vst [vmem:[#allocation14_spill] sm:$0xff] %v6846_v6  ;;  %v1833_v61 = vsel %vm6836_vm2, %v6709_v14, %v1829_v15 }
 0x1fd   : > { %5251 = vrsqrt.f32 %v6752_v31  ;;  %v1539_v53 = vmul.f32 0.03125, %v1443_v44  ;;  %v6804_v44 = vmul.f32 %v6781_v57, %v6781_v57  ;;  %v2051_v20 = vmul.f32 %v6334_v50, %v2017_v1 }
 0x1fe   : > { %5253 = vrsqrt.f32 %v6772_v36  ;;  %v1574_v59 = vmul.f32 %v6806_v24, %v6806_v24  ;;  %v1575_v47 = vmul.f32 %v6816_v11, %v6816_v11  ;;  %vm1860_vm10 = vweird.f32 %v6752_v31 }
 0x1ff   : > { %v1603_v42 = vsub.f32 %v1539_v53, %v1571_v29  ;;  %v2084_v29 = vadd.f32 %v6342_v35, %v2050_v22  ;;  %v1847_v53 = vmul.f32 0.5, %v1846_v40  ;;  %v2085_v30 = vadd.f32 %v6342_v35, %v2051_v20 }
 0x200   : > { %v1476_v23 = vpop.xlane.xlu1 %1475  ;;  %v2018_v35 = vmul.f32 %v1833_v61, %v1634_v56 }
 0x201   : > { %v6790_v10 = vadd.f32 1e-05, %v1603_v42  ;;  %v1550_v12 = vmul.f32 0.03125, %v1476_v23  ;;  %v6821_v23 = vld [vmem:[%s9298_s4] ss:$0 sm:$0xff]  ;;  %v2116_v9 = vmax.f32 %v2084_v29, 0.0 }
 0x202   : > { %v1455_v43 = vpop.xlane.xlu0 %1454  ;;  %v1848_v4 = vsub.f32 1.5, %v1847_v53  ;;  %v2117_v22 = vmax.f32 %v2085_v30, 0.0 }
 0x203   : > { %v6800_v48 = vpop.eup %5251  ;;  %5255 = vrsqrt.f32 %v6790_v10  ;;  %5033 = vmatmul.msk.f32.gmra.mxu2 %vm618_vm0, %v2115_v37  ;;  %v6827_v37 = vmul.f32 0.03125, %v6618_v19  ;;  %v1614_v40 = vsub.f32 %v1550_v12, %v1582_v5  ;;  %v1543_v19 = vmul.f32 0.03125, %v1455_v43 }
 0x204   : > { %v1452_v51 = vpop.xlane.xlu2 %1451  ;;  %v1855_v50 = vmul.f32 %v6800_v48, %v6752_v31  ;;  %v6832_v1 = vpop.eup %5253  ;;  %vm1840_vm7 = vweird.f32 %v6790_v10  ;;  %vm1861_vm9 = vweird.f32 %v6800_v48 }
 0x205   : > { %v1542_v42 = vmul.f32 0.03125, %v1452_v51  ;;  %v1935_v12 = vmul.f32 %v6832_v1, %v6772_v36  ;;  %v6867_v15 = vadd.f32 1e-05, %v1614_v40  ;;  %vm6970_vm11 = vmor %vm1860_vm10, %vm1861_vm9  ;;  %vm1941_vm13 = vweird.f32 %v6832_v1 }
 0x206   : > { %v1856_v29 = vmul.f32 %v6800_v48, %v1855_v50  ;;  %vm7037_vm2 = vmor %vm1940_vm12, %vm1941_vm13 }
 0x207   : > { %v1606_v60 = vsub.f32 %v1542_v42, %v1574_v59  ;;  %v1849_v42 = vmul.f32 %v6747_v21, %v1848_v4  ;;  %5257 = vrsqrt.f32 %v6867_v15 }
 0x208   : > { %v1330_v51 = vpop.xlane.xlu1 %1329  ;;  %v2255_v39 = vpop.f32.mrf.mxu2  ;;  %v1857_v56 = vmul.f32 0.5, %v1856_v29 }
 0x209   : > { %v6851_v2 = vpop.eup %5255  ;;  %v6854_v5 = vadd.f32 %v6821_v23, %v2255_v39  ;;  %v1607_v39 = vsub.f32 %v1543_v19, %v1575_v47  ;;  %v6877_v50 = vadd.f32 1e-05, %v1606_v60  ;;  %v6884_v61 = vmul.f32 0.03125, %v1330_v51  ;;  %v6899_v51 = vld [vmem:[%s9296_s2 + $0x1] ss:$0 sm:$0xff] }
 0x20a   : > { %v6856_v43 = vpop.xlane.xlu0 %1332  ;;  %v1835_v14 = vmul.f32 %v6851_v2, %v6790_v10  ;;  %vm1841_vm6 = vweird.f32 %v6851_v2  ;;  %v2052_v29 = vmul.f32 %v6899_v51, %v2018_v35  ;;  %v6913_v35 = vmul.f32 %v6824_v62, %v6824_v62 }
 0x20b   : > { %9365 = vst [vmem:[#allocation15_spill] sm:$0xff] %v6854_v5  ;;  %5034 = vmatmul.msk.f32.gmra.mxu2 %vm618_vm0, %v2116_v9  ;;  %v2351_v63 = vsel %vm618_vm0, %v6854_v5, 0.0  ;;  %v2447_v59 = vmul.f32 %v6854_v5, %v6854_v5  ;;  %v1936_v9 = vmul.f32 %v6832_v1, %v1935_v12  ;;  %v6882_v19 = vadd.f32 1e-05, %v1607_v39  ;;  %vm6917_vm8 = vmor %vm1840_vm7, %vm1841_vm6 }
 0x20c   : > { %v1470_v53 = vpop.xlane.xlu2 %1469  ;;  %v1836_v20 = vmul.f32 %v6851_v2, %v1835_v14  ;;  %2352 = vadd.xlane.f32.xlu1 %v2351_v63  ;;  %5259 = vrsqrt.f32 %v6877_v50  ;;  %v1576_v52 = vmul.f32 %v6884_v61, %v6884_v61  ;;  %v6945_v60 = vmul.f32 %v6846_v6, %v6846_v6 }
 0x20d   : > { %v1548_v55 = vmul.f32 0.03125, %v1470_v53  ;;  %v2479_v4 = vsel %vm618_vm0, %v2447_v59, 0.0  ;;  %v1937_v59 = vmul.f32 0.5, %v1936_v9  ;;  %v6931_v9 = vld [vmem:[%s9296_s2 + $0x2] ss:$0 sm:$0xff]  ;;  %vm1880_vm3 = vweird.f32 %v6882_v19 }
 0x20e   : > { %v1837_v47 = vmul.f32 0.5, %v1836_v20  ;;  %2480 = vadd.xlane.f32.xlu2 %v2479_v4  ;;  %v1853_v20 = vsel %vm6889_vm5, %v6747_v21, %v1849_v42  ;;  %v1584_v42 = vmul.f32 %v6827_v37, %v6827_v37  ;;  %vm1870_vm4 = vweird.f32 %v6877_v50 }
 0x20f   : > { %v1612_v40 = vsub.f32 %v1548_v55, %v6785_v8  ;;  %v1858_v55 = vsub.f32 1.5, %v1857_v56  ;;  %v2086_v56 = vadd.f32 %v6931_v9, %v2052_v29  ;;  %v2020_v4 = vmul.f32 %v1853_v20, %v1636_v26 }
 0x210   : > { %v1458_v14 = vpop.xlane.xlu1 %1457  ;;  %v1838_v30 = vsub.f32 1.5, %v1837_v47  ;;  %v2258_v8 = vpop.f32.mrf.mxu2  ;;  %v1637_v29 = vsub.f32 %v6313_v25, %v6724_v27  ;;  %v6956_v47 = vmul.f32 0.03125, %v6856_v43  ;;  %vm1950_vm5 = vweird.f32 %v6867_v15 }
 0x211   : > { %v6894_v12 = vadd.f32 1e-05, %v1612_v40  ;;  %v1544_v39 = vmul.f32 0.03125, %v1458_v14  ;;  %v6923_v21 = vadd.f32 %v6821_v23, %v2258_v8  ;;  %v6937_v14 = vpop.eup %5257  ;;  %v2118_v27 = vmax.f32 %v2086_v56, 0.0 }
 0x212   : > { %v1482_v53 = vpop.xlane.xlu0 %1481  ;;  %v1839_v63 = vmul.f32 %v6851_v2, %v1838_v30  ;;  %v1635_v30 = vsub.f32 %v6310_v54, %v6742_v0  ;;  %v6953_v20 = vpop.eup %5259  ;;  %v1945_v25 = vmul.f32 %v6937_v14, %v6867_v15  ;;  %vm1951_vm6 = vweird.f32 %v6937_v14 }
 0x213   : > { %5261 = vrsqrt.f32 %v6894_v12  ;;  %9370 = vst [vmem:[#allocation16_spill] sm:$0xff] %v6923_v21  ;;  %5035 = vmatmul.msk.f32.gmra.mxu2 %vm618_vm0, %v2117_v22  ;;  %v6941_v22 = vmul.f32 %v6843_v18, %v6843_v18  ;;  %v1608_v8 = vsub.f32 %v1544_v39, %v1576_v52  ;;  %v1552_v26 = vmul.f32 0.03125, %v1482_v53  ;;  %vm7131_vm12 = vmor %vm1950_vm5, %vm1951_vm6 }
 0x214   : > { %5263 = vrsqrt.f32 %v6882_v19  ;;  %v1461_v10 = vpop.xlane.xlu2 %1460  ;;  %v1843_v40 = vsel %vm6917_vm8, %v6851_v2, %v1839_v63  ;;  %v1859_v2 = vmul.f32 %v6800_v48, %v1858_v55  ;;  %v1938_v63 = vsub.f32 1.5, %v1937_v59 }
 0x215   : > { %v2354_v5 = vsel %vm618_vm0, %v6923_v21, 0.0  ;;  %v2019_v54 = vmul.f32 %v1843_v40, %v1635_v30  ;;  %v2054_v52 = vmul.f32 %v6899_v51, %v2020_v4  ;;  %v1577_v53 = vmul.f32 %v6956_v47, %v6956_v47 }
 0x216   : > { %2355 = vadd.xlane.f32.xlu2 %v2354_v5  ;;  %v6978_v55 = vadd.f32 1e-05, %v1608_v8  ;;  %v1545_v5 = vmul.f32 0.03125, %v1461_v10  ;;  %v1863_v56 = vsel %vm6970_vm11, %v6800_v48, %v1859_v2  ;;  %v1865_v40 = vmul.f32 %v6953_v20, %v6877_v50 }
 0x217   : > { %v1616_v4 = vsub.f32 %v1552_v26, %v1584_v42  ;;  %v6990_v30 = vmul.f32 %v6832_v1, %v1938_v63  ;;  %v2448_v46 = vmul.f32 %v6923_v21, %v6923_v21  ;;  %v2053_v6 = vmul.f32 %v6899_v51, %v2019_v54 }
 0x218   : > { %v1485_v18 = vpop.xlane.xlu1 %1484  ;;  %v1946_v43 = vmul.f32 %v6937_v14, %v1945_v25  ;;  %v7001_v42 = vadd.f32 %v6931_v9, %v2054_v52  ;;  %v2021_v26 = vmul.f32 %v1863_v56, %v1637_v29  ;;  %5265 = vrsqrt.f32 %v6978_v55 }
 0x219   : > { %v6960_v0 = vpop.eup %5261  ;;  %v7005_v28 = vadd.f32 1e-05, %v1616_v4  ;;  %v2087_v25 = vadd.f32 %v6931_v9, %v2053_v6  ;;  %v2482_v52 = vsel %vm618_vm0, %v2448_v46, 0.0  ;;  %vm1930_vm15 = vweird.f32 %v6894_v12 }
 0x21a   : > { %v6966_v39 = vpop.eup %5263  ;;  %v1925_v31 = vmul.f32 %v6960_v0, %v6894_v12  ;;  %v6980_v59 = vpop.xlane.xlu0 %1490  ;;  %vm1931_vm14 = vweird.f32 %v6960_v0  ;;  %v1947_v29 = vmul.f32 0.5, %v1946_v43  ;;  %v1638_v46 = vsub.f32 %v6345_v17, %v6806_v24 }
 0x21b   : > { %5036 = vmatmul.msk.f32.gmra.mxu2 %vm618_vm0, %v2118_v27  ;;  %v1875_v48 = vmul.f32 %v6966_v39, %v6882_v19  ;;  %v1609_v27 = vsub.f32 %v1545_v5, %v1577_v53  ;;  %vm7026_vm1 = vmor %vm1930_vm15, %vm1931_vm14  ;;  %5267 = vrsqrt.f32 %v7005_v28  ;;  %vm1881_vm7 = vweird.f32 %v6966_v39 }
 0x21c   : > { %v1926_v8 = vmul.f32 %v6960_v0, %v1925_v31  ;;  %v1479_v10 = vpop.xlane.xlu2 %1478  ;;  %v1866_v31 = vmul.f32 %v6953_v20, %v1865_v40  ;;  %vm1871_vm8 = vweird.f32 %v6953_v20  ;;  %vm7111_vm9 = vmor %vm1880_vm3, %vm1881_vm7  ;;  %vm1890_vm10 = vweird.f32 %v6978_v55 }
 0x21d   : > { %v1551_v2 = vmul.f32 0.03125, %v1479_v10  ;;  %v1553_v10 = vmul.f32 0.03125, %v1485_v18  ;;  %v1876_v56 = vmul.f32 %v6966_v39, %v1875_v48  ;;  %v7018_v6 = vadd.f32 1e-05, %v1609_v27  ;;  %vm1872_vm11 = vmor %vm1870_vm4, %vm1871_vm8 }
 0x21e   : > { %v1927_v63 = vmul.f32 0.5, %v1926_v8  ;;  %2483 = vadd.xlane.f32.xlu2 %v2482_v52  ;;  %v2119_v18 = vmax.f32 %v2087_v25, 0.0  ;;  %v1867_v43 = vmul.f32 0.5, %v1866_v31  ;;  %v7031_v12 = vpop.eup %5265  ;;  %v2120_v31 = vmax.f32 %v7001_v42, 0.0 }
 0x21f   : > { %v1615_v54 = vsub.f32 %v1551_v2, %v6804_v44  ;;  %v1617_v2 = vsub.f32 %v1553_v10, %v6913_v35  ;;  %v1943_v35 = vsel %vm7037_vm2, %v6832_v1, %v6990_v30  ;;  %v1877_v25 = vmul.f32 0.5, %v1876_v56 }
 0x220   : > { %v1928_v21 = vsub.f32 1.5, %v1927_v63  ;;  %v1336_v33 = vpop.xlane.xlu1 %1335  ;;  %v2261_v5 = vpop.f32.mrf.mxu2  ;;  %v9377_v10 = vsub.f32 %v6131_v45, %v6755_v34  ;;  %v1885_v42 = vmul.f32 %v7031_v12, %v6978_v55  ;;  %vm1891_vm13 = vweird.f32 %v7031_v12 }
 0x221   : > { %v7012_v8 = vadd.f32 1e-05, %v1615_v54  ;;  %v7014_v53 = vmul.f32 0.03125, %v1336_v33  ;;  %v7048_v63 = vadd.f32 %v6821_v23, %v2261_v5  ;;  %v2055_v54 = vmul.f32 %v6899_v51, %v2021_v26  ;;  %v7072_v34 = vpop.eup %5267  ;;  %vm7197_vm2 = vmor %vm1890_vm10, %vm1891_vm13 }
 0x222   : > { %v1929_v44 = vmul.f32 %v6960_v0, %v1928_v21  ;;  %v1464_v40 = vpop.xlane.xlu0 %1463  ;;  %v1868_v5 = vsub.f32 1.5, %v1867_v43  ;;  %v7068_v1 = vadd.f32 1e-05, %v1617_v2  ;;  %vm1971_vm3 = vweird.f32 %v7072_v34 }
 0x223   : > { %5269 = vrsqrt.f32 %v7012_v8  ;;  %5037 = vmatmul.msk.f32.gmra.mxu2 %vm618_vm0, %v2119_v18  ;;  %v1578_v36 = vmul.f32 %v7014_v53, %v7014_v53  ;;  %v1546_v26 = vmul.f32 0.03125, %v1464_v40  ;;  %v2357_v45 = vsel %vm618_vm0, %v7048_v63, 0.0 }
 0x224   : > { %v1933_v48 = vsel %vm7026_vm1, %v6960_v0, %v1929_v44  ;;  %v1488_v27 = vpop.xlane.xlu2 %1487  ;;  %v1948_v0 = vsub.f32 1.5, %v1947_v29  ;;  %5271 = vrsqrt.f32 %v7018_v6  ;;  %2358 = vadd.xlane.f32.xlu0 %v2357_v45  ;;  %v2449_v56 = vmul.f32 %v7048_v63, %v7048_v63 }
 0x225   : > { %v2028_v52 = vmul.f32 %v1933_v48, %v9377_v10  ;;  %v1554_v30 = vmul.f32 0.03125, %v1488_v27  ;;  %v1610_v29 = vsub.f32 %v1546_v26, %v1578_v36  ;;  %v1878_v18 = vsub.f32 1.5, %v1877_v25 }
 0x226   : > { %v1949_v40 = vmul.f32 %v6937_v14, %v1948_v0  ;;  %v2089_v48 = vadd.f32 %v6931_v9, %v2055_v54  ;;  %v1869_v2 = vmul.f32 %v6953_v20, %v1868_v5  ;;  %v1886_v27 = vmul.f32 %v7031_v12, %v1885_v42 }
 0x227   : > { %v2062_v43 = vmul.f32 %v6899_v51, %v2028_v52  ;;  %v7087_v10 = vadd.f32 1e-05, %v1610_v29  ;;  %5273 = vrsqrt.f32 %v7068_v1  ;;  %v1618_v0 = vsub.f32 %v1554_v30, %v6945_v60 }
 0x228   : > { %v1467_v21 = vpop.xlane.xlu1 %1466  ;;  %v2485_v25 = vsel %vm618_vm0, %v2449_v56, 0.0  ;;  %v9378_v54 = vsub.f32 %v6162_v16, %v6718_v38  ;;  %v1965_v5 = vmul.f32 %v7072_v34, %v7005_v28  ;;  %v1879_v4 = vmul.f32 %v6966_v39, %v1878_v18 }
 0x229   : > { %v7078_v44 = vpop.eup %5269  ;;  %2486 = vadd.xlane.f32.xlu2 %v2485_v25  ;;  %v1547_v29 = vmul.f32 0.03125, %v1467_v21  ;;  %v1555_v60 = vmul.f32 0.03125, %v6980_v59  ;;  %5275 = vrsqrt.f32 %v7087_v10  ;;  %v1887_v38 = vmul.f32 0.5, %v1886_v27 }
 0x22a   : > { %v1339_v33 = vpop.xlane.xlu0 %1338  ;;  %v1955_v36 = vmul.f32 %v7078_v44, %v7012_v8  ;;  %v7089_v26 = vpop.eup %5271  ;;  %v2029_v52 = vmul.f32 %v1943_v35, %v9378_v54  ;;  %v7124_v19 = vadd.f32 1e-05, %v1618_v0  ;;  %v2121_v18 = vmax.f32 %v2089_v48, 0.0 }
 0x22b   : > { %5038 = vmatmul.msk.f32.gmra.mxu2 %vm618_vm0, %v2120_v31  ;;  %v7101_v45 = vmul.f32 0.03125, %v1339_v33  ;;  %v2096_v31 = vadd.f32 %v6931_v9, %v2062_v43  ;;  %v1895_v35 = vmul.f32 %v7089_v26, %v7018_v6  ;;  %v1966_v21 = vmul.f32 %v7072_v34, %v1965_v5 }
 0x22c   : > { %v1956_v42 = vmul.f32 %v7078_v44, %v1955_v36  ;;  %v2063_v43 = vmul.f32 %v6899_v51, %v2029_v52  ;;  %v1873_v50 = vsel %vm1872_vm11, %v6953_v20, %v1869_v2  ;;  %v1619_v48 = vsub.f32 %v1555_v60, %v6941_v22 }
 0x22d   : > { %v1579_v59 = vmul.f32 %v7101_v45, %v7101_v45  ;;  %v2128_v56 = vmax.f32 %v2096_v31, 0.0  ;;  %v7137_v0 = vpop.eup %5273  ;;  %v2022_v15 = vmul.f32 %v1873_v50, %v1638_v46  ;;  %v1953_v25 = vsel %vm7131_vm12, %v6937_v14, %v1949_v40 }
 0x22e   : > { %v1957_v30 = vmul.f32 0.5, %v1956_v42  ;;  %v1888_v54 = vsub.f32 1.5, %v1887_v38  ;;  %v1896_v52 = vmul.f32 %v7089_v26, %v1895_v35  ;;  %v1883_v2 = vsel %vm7111_vm9, %v6966_v39, %v1879_v4 }
 0x22f   : > { %v1611_v36 = vsub.f32 %v1547_v29, %v1579_v59  ;;  %5046 = vmatmul.msk.f32.vlgmr.msra.gmra.mxu3 %vm618_vm0, %v2128_v56  ;;  %v7154_v22 = vpop.eup %5275  ;;  %5277 = vrsqrt.f32 %v7124_v19  ;;  %v2097_v17 = vadd.f32 %v6931_v9, %v2063_v43  ;;  %v2056_v24 = vmul.f32 %v6899_v51, %v2022_v15 }
 0x230   : > { %v1958_v27 = vsub.f32 1.5, %v1957_v30  ;;  %v9383_v14 = vsub.f32 %v6184_v49, %v6776_v13  ;;  %v1967_v40 = vmul.f32 0.5, %v1966_v21  ;;  %v1975_v5 = vmul.f32 %v7137_v0, %v7068_v1 }
 0x231   : > { %v7149_v20 = vadd.f32 1e-05, %v1611_v36  ;;  %vm1961_vm14 = vweird.f32 %v7078_v44  ;;  %v7167_v4 = vadd.f32 1e-05, %v1619_v48  ;;  %v2090_v42 = vadd.f32 %v6931_v9, %v2056_v24 }
 0x232   : > { %v2030_v46 = vmul.f32 %v1953_v25, %v9383_v14  ;;  %v1959_v39 = vmul.f32 %v7078_v44, %v1958_v27  ;;  %v9384_v29 = vsub.f32 %v6362_v3, %v6816_v11  ;;  %v1889_v49 = vmul.f32 %v7031_v12, %v1888_v54 }
 0x233   : > { %5039 = vmatmul.msk.f32.gmra.mxu2 %vm618_vm0, %v2121_v18  ;;  %5279 = vrsqrt.f32 %v7149_v20  ;;  %v1897_v13 = vmul.f32 0.5, %v1896_v52  ;;  %vm1960_vm15 = vweird.f32 %v7012_v8  ;;  %v1905_v31 = vmul.f32 %v7154_v22, %v7087_v10  ;;  %v9404_v52 = vld [vmem:[#allocation10_spill] sm:$0xff] }
 0x234   : > { %v2023_v60 = vmul.f32 %v1883_v2, %v9384_v29  ;;  %vm7178_vm1 = vmor %vm1960_vm15, %vm1961_vm14  ;;  %v2129_v38 = vmax.f32 %v2097_v17, 0.0  ;;  %v2064_v35 = vmul.f32 %v6899_v51, %v2030_v46  ;;  %v1968_v30 = vsub.f32 1.5, %v1967_v40 }
 0x235   : > { %v1976_v59 = vmul.f32 %v7137_v0, %v1975_v5  ;;  %v1963_v3 = vsel %vm7178_vm1, %v7078_v44, %v1959_v39  ;;  %v7187_v11 = vpop.eup %5277  ;;  %v1647_v8 = vsub.f32 %v6202_v7, %v6781_v57  ;;  %v1640_v56 = vsub.f32 %v6383_v58, %v6884_v61 }
 0x236   : > { %v2122_v43 = vmax.f32 %v2090_v42, 0.0  ;;  %v2057_v44 = vmul.f32 %v6899_v51, %v2023_v60  ;;  %v1898_v33 = vsub.f32 1.5, %v1897_v13  ;;  %5281 = vrsqrt.f32 %v7167_v4 }
 0x237   : > { %5047 = vmatmul.msk.f32.gmra.mxu3 %vm618_vm0, %v2129_v38  ;;  %v1906_v7 = vmul.f32 %v7154_v22, %v1905_v31  ;;  %v1893_v58 = vsel %vm7197_vm2, %v7031_v12, %v1889_v49  ;;  %vm1900_vm4 = vweird.f32 %v7018_v6  ;;  %v2098_v61 = vadd.f32 %v6931_v9, %v2064_v35 }
 0x238   : > { %v2031_v55 = vmul.f32 %v1963_v3, %v1647_v8  ;;  %v1969_v21 = vmul.f32 %v7072_v34, %v1968_v30  ;;  %vm1901_vm5 = vweird.f32 %v7089_v26  ;;  %v1977_v27 = vmul.f32 0.5, %v1976_v59 }
 0x239   : > { %v7208_v57 = vpop.eup %5279  ;;  %v1985_v36 = vmul.f32 %v7187_v11, %v7124_v19  ;;  %vm1970_vm6 = vweird.f32 %v7005_v28  ;;  %v2091_v12 = vadd.f32 %v6931_v9, %v2057_v44  ;;  %v2024_v50 = vmul.f32 %v1893_v58, %v1640_v56  ;;  %vm7229_vm8 = vmor %vm1900_vm4, %vm1901_vm5  ;;  %v9397_v56 = vld [vmem:[#allocation8_spill] sm:$0xff] }
 0x23a   : > { %vm7220_vm7 = vmor %vm1970_vm6, %vm1971_vm3  ;;  %v1899_v15 = vmul.f32 %v7089_v26, %v1898_v33  ;;  %v1907_v25 = vmul.f32 0.5, %v1906_v7  ;;  %v1915_v54 = vmul.f32 %v7208_v57, %v7149_v20  ;;  %v2130_v28 = vmax.f32 %v2098_v61, 0.0  ;;  %v9398_v61 = vld [vmem:[#allocation11_spill] sm:$0xff] }
 0x23b   : > { %5040 = vmatmul.msk.f32.gmra.mxu2 %vm618_vm0, %v2122_v43  ;;  %v2065_v2 = vmul.f32 %v6899_v51, %v2031_v55  ;;  %v1978_v24 = vsub.f32 1.5, %v1977_v27  ;;  %v1986_v14 = vmul.f32 %v7187_v11, %v1985_v36  ;;  %v1973_v46 = vsel %vm7220_vm7, %v7072_v34, %v1969_v21 }
 0x23c   : > { %v7234_v17 = vpop.eup %5281  ;;  %v1648_v40 = vsub.f32 %v6222_v41, %v6827_v37  ;;  %v2123_v6 = vmax.f32 %v2091_v12, 0.0  ;;  %v2058_v5 = vmul.f32 %v6899_v51, %v2024_v50  ;;  %v1641_v39 = vsub.f32 %v6395_v32, %v6956_v47 }
 0x23d   : > { %v1908_v42 = vsub.f32 1.5, %v1907_v25  ;;  %v1916_v29 = vmul.f32 %v7208_v57, %v1915_v54  ;;  %v1903_v60 = vsel %vm7229_vm8, %v7089_v26, %v1899_v15  ;;  %vm1981_vm9 = vweird.f32 %v7137_v0  ;;  %v9403_v54 = vld [vmem:[#allocation14_spill] sm:$0xff] }
 0x23e   : > { %v1995_v41 = vmul.f32 %v7234_v17, %v7167_v4  ;;  %v2099_v37 = vadd.f32 %v6931_v9, %v2065_v2  ;;  %v2032_v34 = vmul.f32 %v1973_v46, %v1648_v40  ;;  %v1979_v49 = vmul.f32 %v7137_v0, %v1978_v24 }
 0x23f   : > { %5048 = vmatmul.msk.f32.gmra.mxu3 %vm618_vm0, %v2130_v28  ;;  %vm1910_vm10 = vweird.f32 %v7087_v10  ;;  %vm1911_vm11 = vweird.f32 %v7154_v22  ;;  %v1987_v32 = vmul.f32 0.5, %v1986_v14  ;;  %vm1980_vm12 = vweird.f32 %v7068_v1 }
 0x240   : > { %v2092_v47 = vadd.f32 %v6931_v9, %v2058_v5  ;;  %v2025_v26 = vmul.f32 %v1903_v60, %v1641_v39  ;;  %vm7260_vm13 = vmor %vm1980_vm12, %vm1981_vm9  ;;  %v1909_v31 = vmul.f32 %v7154_v22, %v1908_v42  ;;  %v1917_v16 = vmul.f32 0.5, %v1916_v29  ;;  %v9405_v39 = vld [vmem:[#allocation12_spill] sm:$0xff] }
 0x241   : > { %vm7265_vm14 = vmor %vm1910_vm10, %vm1911_vm11  ;;  %v2131_v10 = vmax.f32 %v2099_v37, 0.0  ;;  %v2066_v1 = vmul.f32 %v6899_v51, %v2032_v34  ;;  %v1996_v59 = vmul.f32 %v7234_v17, %v1995_v41  ;;  %v1988_v3 = vsub.f32 1.5, %v1987_v32 }
 0x242   : > { %v1983_v8 = vsel %vm7260_vm13, %v7137_v0, %v1979_v49  ;;  %v1649_v18 = vsub.f32 %v9397_v56, %v6824_v62  ;;  %v2124_v44 = vmax.f32 %v2092_v47, 0.0  ;;  %v2059_v33 = vmul.f32 %v6899_v51, %v2025_v26  ;;  %v9406_v47 = vld [vmem:[#allocation13_spill] sm:$0xff] }
 0x243   : > { %5041 = vmatmul.msk.f32.gmra.mxu2 %vm618_vm0, %v2123_v6  ;;  %v1918_v7 = vsub.f32 1.5, %v1917_v16  ;;  %v1913_v58 = vsel %vm7265_vm14, %v7154_v22, %v1909_v31  ;;  %v1642_v0 = vsub.f32 %v9398_v61, %v7014_v53  ;;  %vm1991_vm15 = vweird.f32 %v7187_v11  ;;  %v9407_v26 = vld [vmem:[#allocation9_spill] sm:$0xff] }
 0x244   : > { %v2100_v62 = vadd.f32 %v6931_v9, %v2066_v1  ;;  %v2033_v55 = vmul.f32 %v1983_v8, %v1649_v18  ;;  %v1997_v21 = vmul.f32 0.5, %v1996_v59  ;;  %v1989_v27 = vmul.f32 %v7187_v11, %v1988_v3 }
 0x245   : > { %vm1920_vm1 = vweird.f32 %v7149_v20  ;;  %vm1921_vm2 = vweird.f32 %v7208_v57  ;;  %vm1990_vm3 = vweird.f32 %v7124_v19  ;;  %v2093_v53 = vadd.f32 %v6931_v9, %v2059_v33 }
 0x246   : > { %v2264_v38 = vpop.f32.mrf.mxu2  ;;  %v2026_v36 = vmul.f32 %v1913_v58, %v1642_v0  ;;  %vm7298_vm4 = vmor %vm1990_vm3, %vm1991_vm15  ;;  %v1919_v50 = vmul.f32 %v7208_v57, %v1918_v7  ;;  %v2132_v20 = vmax.f32 %v2100_v62, 0.0  ;;  %v2067_v25 = vmul.f32 %v6899_v51, %v2033_v55 }
 0x247   : > { %v7270_v30 = vadd.f32 %v6821_v23, %v2264_v38  ;;  %5049 = vmatmul.msk.f32.gmra.mxu3 %vm618_vm0, %v2131_v10  ;;  %vm7303_vm5 = vmor %vm1920_vm1, %vm1921_vm2  ;;  %v1650_v28 = vsub.f32 %v9404_v52, %v9403_v54  ;;  %v1998_v2 = vsub.f32 1.5, %v1997_v21  ;;  %v1993_v24 = vsel %vm7298_vm4, %v7187_v11, %v1989_v27 }
 0x248   : > { %v2125_v40 = vmax.f32 %v2093_v53, 0.0  ;;  %v2060_v6 = vmul.f32 %v6899_v51, %v2026_v36  ;;  %v1923_v5 = vsel %vm7303_vm5, %v7208_v57, %v1919_v50  ;;  %v1643_v42 = vsub.f32 %v9405_v39, %v7101_v45 }
 0x249   : > { %v2360_v43 = vsel %vm618_vm0, %v7270_v30, 0.0  ;;  %v2450_v22 = vmul.f32 %v7270_v30, %v7270_v30  ;;  %v2101_v11 = vadd.f32 %v6931_v9, %v2067_v25  ;;  %v2034_v29 = vmul.f32 %v1993_v24, %v1650_v28 }
 0x24a   : > { %2361 = vadd.xlane.f32.xlu1 %v2360_v43  ;;  %v1999_v60 = vmul.f32 %v7234_v17, %v1998_v2  ;;  %vm2001_vm6 = vweird.f32 %v7234_v17  ;;  %v2094_v37 = vadd.f32 %v6931_v9, %v2060_v6  ;;  %v2027_v34 = vmul.f32 %v1923_v5, %v1643_v42 }
 0x24b   : > { %5042 = vmatmul.msk.f32.gmra.mxu2 %vm618_vm0, %v2124_v44  ;;  %v2488_v14 = vsel %vm618_vm0, %v2450_v22, 0.0  ;;  %vm2000_vm7 = vweird.f32 %v7167_v4  ;;  %v2133_v45 = vmax.f32 %v2101_v11, 0.0  ;;  %v2068_v32 = vmul.f32 %v6899_v51, %v2034_v29 }
 0x24c   : > { %vm2002_vm8 = vmor %vm2000_vm7, %vm2001_vm6  ;;  %v1651_v13 = vsub.f32 %v9407_v26, %v9406_v47  ;;  %v2126_v38 = vmax.f32 %v2094_v37, 0.0  ;;  %v2061_v35 = vmul.f32 %v6899_v51, %v2027_v34 }
 0x24d   : > { %v2003_v31 = vsel %vm2002_vm8, %v7234_v17, %v1999_v60  ;;  %v2102_v10 = vadd.f32 %v6931_v9, %v2068_v32 }
 0x24e   : > { %v2267_v48 = vpop.f32.mrf.mxu2  ;;  %v2035_v1 = vmul.f32 %v2003_v31, %v1651_v13  ;;  %v2095_v59 = vadd.f32 %v6931_v9, %v2061_v35 }
 0x24f   : > { %v7308_v19 = vadd.f32 %v6821_v23, %v2267_v48  ;;  %5050 = vmatmul.msk.f32.gmra.mxu3 %vm618_vm0, %v2132_v20  ;;  %v2134_v8 = vmax.f32 %v2102_v10, 0.0 }
 0x250   : > { %v2069_v18 = vmul.f32 %v6899_v51, %v2035_v1  ;;  %v2127_v44 = vmax.f32 %v2095_v59, 0.0 }
 0x251   : > { %v2363_v46 = vsel %vm618_vm0, %v7308_v19, 0.0  ;;  %v2451_v41 = vmul.f32 %v7308_v19, %v7308_v19 }
 0x252   : > { %2489 = vadd.xlane.f32.xlu1 %v2488_v14  ;;  %2364 = vadd.xlane.f32.xlu2 %v2363_v46  ;;  %v2103_v58 = vadd.f32 %v6931_v9, %v2069_v18 }
 0x253   : > { %5043 = vmatmul.msk.f32.gmra.mxu2 %vm618_vm0, %v2125_v40  ;;  %v2491_v16 = vsel %vm618_vm0, %v2451_v41, 0.0 }
 0x254   : > { %v2135_v0 = vmax.f32 %v2103_v58, 0.0 }
 0x256   : > { %v2270_v57 = vpop.f32.mrf.mxu2 }
 0x257   : > { %v7335_v49 = vadd.f32 %v6821_v23, %v2270_v57  ;;  %5051 = vmatmul.msk.f32.gmra.mxu3 %vm618_vm0, %v2133_v45 }
 0x259   : > { %v2366_v4 = vsel %vm618_vm0, %v7335_v49, 0.0  ;;  %v2452_v17 = vmul.f32 %v7335_v49, %v7335_v49 }
 0x25a   : > { %2492 = vadd.xlane.f32.xlu1 %v2491_v16  ;;  %2367 = vadd.xlane.f32.xlu0 %v2366_v4 }
 0x25b   : > { %5044 = vmatmul.msk.f32.gmra.mxu2 %vm618_vm0, %v2126_v38  ;;  %v2494_v43 = vsel %vm618_vm0, %v2452_v17, 0.0 }
 0x25e   : > { %v2273_v3 = vpop.f32.mrf.mxu2 }
 0x25f   : > { %v7352_v56 = vadd.f32 %v6821_v23, %v2273_v3  ;;  %5052 = vmatmul.msk.f32.gmra.mxu3 %vm618_vm0, %v2134_v8 }
 0x261   : > { %v2453_v33 = vmul.f32 %v7352_v56, %v7352_v56  ;;  %v2369_v55 = vsel %vm618_vm0, %v7352_v56, 0.0 }
 0x262   : > { %2495 = vadd.xlane.f32.xlu1 %v2494_v43 }
 0x263   : > { %5045 = vmatmul.msk.f32.gmra.mxu2 %vm618_vm0, %v2127_v44  ;;  %v2497_v7 = vsel %vm618_vm0, %v2453_v33, 0.0 }
 0x264   : > { %2498 = vadd.xlane.f32.xlu0 %v2497_v7 }
 0x266   : > { %v2276_v61 = vpop.f32.mrf.mxu2 }
 0x267   : > { %v7363_v51 = vadd.f32 %v6821_v23, %v2276_v61  ;;  %5053 = vmatmul.msk.f32.gmra.mxu3 %vm618_vm0, %v2135_v0 }
 0x269   : > { %v2372_v62 = vsel %vm618_vm0, %v7363_v51, 0.0  ;;  %v2454_v21 = vmul.f32 %v7363_v51, %v7363_v51 }
 0x26a   : > { %2373 = vadd.xlane.f32.xlu2 %v2372_v62  ;;  %2370 = vadd.xlane.f32.xlu1 %v2369_v55 }
 0x26b   : > { %v2500_v9 = vsel %vm618_vm0, %v2454_v21, 0.0 }
 0x26c   : > { %2501 = vadd.xlane.f32.xlu0 %v2500_v9 }
 0x26e   : > { %v2279_v27 = vpop.f32.mrf.mxu2 }
 0x26f   : > { %v7374_v22 = vadd.f32 %v6821_v23, %v2279_v27 }
 0x271   : > { %v2375_v53 = vsel %vm618_vm0, %v7374_v22, 0.0  ;;  %v2455_v50 = vmul.f32 %v7374_v22, %v7374_v22 }
 0x273   : > { %v2503_v15 = vsel %vm618_vm0, %v2455_v50, 0.0 }
 0x274   : > { %2376 = vadd.xlane.f32.xlu0 %v2375_v53 }
 0x276   : > { %v2282_v36 = vpop.f32.mrf.mxu2 }
 0x277   : > { %v7379_v12 = vadd.f32 %v6821_v23, %v2282_v36 }
 0x279   : > { %v2378_v48 = vsel %vm618_vm0, %v7379_v12, 0.0 }
 0x27a   : > { %2379 = vadd.xlane.f32.xlu1 %v2378_v48  ;;  %v9409_v48 = vld [vmem:[#allocation15_spill] sm:$0xff] }
 0x27c   : > { %2504 = vadd.xlane.f32.xlu0 %v2503_v15 }
 0x27e   : > { %v7386_v20 = vpop.f32.mrf.mxu2 }
 0x27f   : > { %v2353_v2 = vpop.xlane.xlu1 %2352 }
 0x280   : > { %v2575_v14 = vmul.f32 0.03125, %v2353_v2 }
 0x281   : > { %v2481_v25 = vpop.xlane.xlu2 %2480 }
 0x282   : > { %v2639_v40 = vmul.f32 %v2575_v14, %v2575_v14  ;;  %v2607_v6 = vmul.f32 0.03125, %v2481_v25  ;;  %v2703_v15 = vsub.f32 %v9409_v48, %v2575_v14  ;;  %v2456_v25 = vmul.f32 %v7379_v12, %v7379_v12 }
 0x284   : > { %v2671_v5 = vsub.f32 %v2607_v6, %v2639_v40  ;;  %v7441_v40 = vld [vmem:[%s9298_s4 + $0x1] ss:$0 sm:$0xff] }
 0x286   : > { %v2288_v54 = vpop.f32.mrf.mxu2  ;;  %v2735_v60 = vadd.f32 1e-05, %v2671_v5 }
 0x287   : > { %v7389_v52 = vadd.f32 %v6821_v23, %v2288_v54 }
 0x288   : > { %5283 = vrsqrt.f32 %v2735_v60  ;;  %vm2773_vm10 = vweird.f32 %v2735_v60 }
 0x289   : > { %v2384_v28 = vsel %vm618_vm0, %v7389_v52, 0.0  ;;  %v2356_v24 = vpop.xlane.xlu2 %2355 }
 0x28a   : > { %2385 = vadd.xlane.f32.xlu0 %v2384_v28  ;;  %v7395_v11 = vmul.f32 0.03125, %v2356_v24 }
 0x28c   : > { %v2640_v34 = vmul.f32 %v7395_v11, %v7395_v11 }
 0x28e   : > { %v7393_v46 = vpop.f32.mrf.mxu2  ;;  %v5284_v26 = vpop.eup %5283 }
 0x28f   : > { %v2768_v31 = vmul.f32 %v5284_v26, %v2735_v60  ;;  %vm2774_vm9 = vweird.f32 %v5284_v26  ;;  %v7454_v60 = vld [vmem:[%s9298_s4 + $0x2] ss:$0 sm:$0xff] }
 0x290   : > { %vm2775_vm11 = vmor %vm2773_vm10, %vm2774_vm9 }
 0x291   : > { %v2484_v39 = vpop.xlane.xlu2 %2483  ;;  %v2769_v17 = vmul.f32 %v5284_v26, %v2768_v31 }
 0x292   : > { %v2608_v41 = vmul.f32 0.03125, %v2484_v39  ;;  %v2506_v39 = vsel %vm618_vm0, %v2456_v25, 0.0 }
 0x293   : > { %v2770_v8 = vmul.f32 0.5, %v2769_v17 }
 0x294   : > { %v2672_v57 = vsub.f32 %v2608_v41, %v2640_v34 }
 0x295   : > { %v2771_v33 = vsub.f32 1.5, %v2770_v8 }
 0x296   : > { %v2294_v42 = vpop.f32.mrf.mxu2  ;;  %v2736_v32 = vadd.f32 1e-05, %v2672_v57  ;;  %v7462_v57 = vld [vmem:[%s9298_s4] ss:$0 sm:$0xff] }
 0x297   : > { %v7398_v29 = vadd.f32 %v6821_v23, %v2294_v42  ;;  %v2359_v47 = vpop.xlane.xlu0 %2358  ;;  %v2772_v0 = vmul.f32 %v5284_v26, %v2771_v33 }
 0x298   : > { %5285 = vrsqrt.f32 %v2736_v32  ;;  %v7406_v13 = vmul.f32 0.03125, %v2359_v47  ;;  %vm2783_vm13 = vweird.f32 %v2736_v32  ;;  %v9411_v47 = vld [vmem:[#allocation16_spill] sm:$0xff] }
 0x299   : > { %v2390_v37 = vsel %vm618_vm0, %v7398_v29, 0.0  ;;  %v2776_v36 = vsel %vm2775_vm11, %v5284_v26, %v2772_v0  ;;  %v2704_v26 = vsub.f32 %v9411_v47, %v7395_v11 }
 0x29a   : > { %2391 = vadd.xlane.f32.xlu0 %v2390_v37  ;;  %v2641_v35 = vmul.f32 %v7406_v13, %v7406_v13  ;;  %v3087_v24 = vmul.f32 %v2776_v36, %v2703_v15 }
 0x29c   : > { %v2487_v16 = vpop.xlane.xlu2 %2486  ;;  %v3121_v42 = vmul.f32 %v7441_v40, %v3087_v24 }
 0x29d   : > { %v2609_v10 = vmul.f32 0.03125, %v2487_v16 }
 0x29e   : > { %v7404_v45 = vpop.f32.mrf.mxu2  ;;  %v5286_v59 = vpop.eup %5285 }
 0x29f   : > { %v2673_v3 = vsub.f32 %v2609_v10, %v2641_v35  ;;  %v2778_v18 = vmul.f32 %v5286_v59, %v2736_v32  ;;  %vm2784_vm12 = vweird.f32 %v5286_v59  ;;  %v7466_v32 = vadd.f32 %v7462_v57, %v7386_v20 }
 0x2a0   : > { %vm2785_vm14 = vmor %vm2783_vm13, %vm2784_vm12 }
 0x2a1   : > { %v7417_v44 = vadd.f32 1e-05, %v2673_v3  ;;  %v2779_v7 = vmul.f32 %v5286_v59, %v2778_v18  ;;  %v2381_v3 = vsel %vm618_vm0, %v7466_v32, 0.0 }
 0x2a3   : > { %5287 = vrsqrt.f32 %v7417_v44  ;;  %v2780_v62 = vmul.f32 0.5, %v2779_v7  ;;  %v7483_v7 = vld [vmem:[%s9299_s5] ss:$0 sm:$0xff]  ;;  %vm2793_vm1 = vweird.f32 %v7417_v44 }
 0x2a5   : > { %v2781_v53 = vsub.f32 1.5, %v2780_v62 }
 0x2a6   : > { %v2300_v4 = vpop.f32.mrf.mxu2 }
 0x2a7   : > { %v7409_v38 = vadd.f32 %v6821_v23, %v2300_v4  ;;  %v2782_v6 = vmul.f32 %v5286_v59, %v2781_v53  ;;  %v3155_v4 = vadd.f32 %v7454_v60, %v3121_v42 }
 0x2a9   : > { %v2396_v1 = vsel %vm618_vm0, %v7409_v38, 0.0  ;;  %v7430_v50 = vpop.eup %5287  ;;  %v2786_v34 = vsel %vm2785_vm14, %v5286_v59, %v2782_v6  ;;  %v3187_v33 = vmax.f32 %v3155_v4, 0.0  ;;  %v7524_v4 = vadd.f32 %v7462_v57, %v7393_v46 }
 0x2aa   : > { %2397 = vadd.xlane.f32.xlu0 %v2396_v1  ;;  %v2788_v5 = vmul.f32 %v7430_v50, %v7417_v44  ;;  %v3088_v35 = vmul.f32 %v2786_v34, %v2704_v26  ;;  %vm2794_vm15 = vweird.f32 %v7430_v50 }
 0x2ab   : > { %v3223_v48 = vmul.f32 %v7483_v7, %v3187_v33  ;;  %vm7508_vm2 = vmor %vm2793_vm1, %vm2794_vm15 }
 0x2ac   : > { %v2789_v41 = vmul.f32 %v7430_v50, %v2788_v5 }
 0x2ae   : > { %v7415_v43 = vpop.f32.mrf.mxu2  ;;  %v2790_v10 = vmul.f32 0.5, %v2789_v41  ;;  %v3255_v41 = vsel %vm618_vm0, %v3223_v48, 0.0  ;;  %v2458_v48 = vmul.f32 %v7389_v52, %v7389_v52 }
 0x2b0   : > { %v2791_v0 = vsub.f32 1.5, %v2790_v10 }
 0x2b2   : > { %v2327_v58 = vpop.f32.mrf.mxu3  ;;  %v2792_v25 = vmul.f32 %v7430_v50, %v2791_v0 }
 0x2b3   : > { %v7421_v61 = vadd.f32 %v6821_v23, %v2327_v58  ;;  %v3122_v58 = vmul.f32 %v7441_v40, %v3088_v35  ;;  %v2705_v35 = vsub.f32 %v7048_v63, %v7406_v13  ;;  %v2387_v13 = vsel %vm618_vm0, %v7524_v4, 0.0 }
 0x2b4   : > { %v2796_v44 = vsel %vm7508_vm2, %v7430_v50, %v2792_v25 }
 0x2b5   : > { %9408 = vst [vmem:[#allocation8_spill] sm:$0xff] %v7421_v61  ;;  %v2423_v21 = vsel %vm618_vm0, %v7421_v61, 0.0  ;;  %v3156_v15 = vadd.f32 %v7454_v60, %v3122_v58  ;;  %v3089_v50 = vmul.f32 %v2796_v44, %v2705_v35 }
 0x2b6   : > { %v2306_v55 = vpop.f32.mrf.mxu2  ;;  %2424 = vadd.xlane.f32.xlu2 %v2423_v21  ;;  %v2457_v21 = vmul.f32 %v7466_v32, %v7466_v32 }
 0x2b7   : > { %v7426_v9 = vadd.f32 %v6821_v23, %v2306_v55  ;;  %v3188_v34 = vmax.f32 %v3156_v15, 0.0  ;;  %v3123_v58 = vmul.f32 %v7441_v40, %v3089_v50 }
 0x2b8   : > { %v2509_v24 = vsel %vm618_vm0, %v2457_v21, 0.0 }
 0x2b9   : > { %v2402_v27 = vsel %vm618_vm0, %v7426_v9, 0.0 }
 0x2ba   : > { %2403 = vadd.xlane.f32.xlu0 %v2402_v27  ;;  %v2330_v54 = vpop.f32.mrf.mxu3 }
 0x2bb   : > { %v7436_v28 = vadd.f32 %v6821_v23, %v2330_v54 }
 0x2bd   : > { %9410 = vst [vmem:[#allocation11_spill] sm:$0xff] %v7436_v28  ;;  %v2362_v2 = vpop.xlane.xlu1 %2361  ;;  %v2426_v23 = vsel %vm618_vm0, %v7436_v28, 0.0 }
 0x2be   : > { %v7445_v14 = vpop.f32.mrf.mxu2  ;;  %2507 = vadd.xlane.f32.xlu2 %v2506_v39  ;;  %2427 = vadd.xlane.f32.xlu1 %v2426_v23  ;;  %v7457_v37 = vmul.f32 0.03125, %v2362_v2 }
 0x2c0   : > { %v2642_v1 = vmul.f32 %v7457_v37, %v7457_v37 }
 0x2c2   : > { %v2333_v31 = vpop.f32.mrf.mxu3 }
 0x2c3   : > { %v7529_v10 = vadd.f32 %v7462_v57, %v2333_v31 }
 0x2c5   : > { %v2490_v16 = vpop.xlane.xlu1 %2489  ;;  %v2365_v8 = vpop.xlane.xlu2 %2364  ;;  %9415 = vst [vmem:[#allocation10_spill] sm:$0xff] %v7529_v10  ;;  %v2429_v63 = vsel %vm618_vm0, %v7529_v10, 0.0 }
 0x2c6   : > { %v2610_v17 = vmul.f32 0.03125, %v2490_v16  ;;  %v2312_v59 = vpop.f32.mrf.mxu2  ;;  %2382 = vadd.xlane.f32.xlu2 %v2381_v3  ;;  %v7488_v55 = vmul.f32 0.03125, %v2365_v8  ;;  %v3224_v3 = vmul.f32 %v7483_v7, %v3188_v34 }
 0x2c7   : > { %v7476_v20 = vadd.f32 %v7462_v57, %v2312_v59 }
 0x2c8   : > { %v2674_v11 = vsub.f32 %v2610_v17, %v2642_v1  ;;  %v2643_v54 = vmul.f32 %v7488_v55, %v7488_v55  ;;  %v3258_v33 = vsel %vm618_vm0, %v3224_v3, 0.0 }
 0x2c9   : > { %v2408_v18 = vsel %vm618_vm0, %v7476_v20, 0.0 }
 0x2ca   : > { %v7486_v62 = vadd.f32 1e-05, %v2674_v11  ;;  %2409 = vadd.xlane.f32.xlu0 %v2408_v18  ;;  %v2336_v27 = vpop.f32.mrf.mxu3 }
 0x2cb   : > { %v7494_v53 = vadd.f32 %v7462_v57, %v2336_v27 }
 0x2cc   : > { %5289 = vrsqrt.f32 %v7486_v62  ;;  %vm2803_vm4 = vweird.f32 %v7486_v62 }
 0x2cd   : > { %9412 = vst [vmem:[#allocation14_spill] sm:$0xff] %v7494_v53  ;;  %v2493_v36 = vpop.xlane.xlu1 %2492  ;;  %v2432_v6 = vsel %vm618_vm0, %v7494_v53, 0.0  ;;  %v2368_v5 = vpop.xlane.xlu0 %2367 }
 0x2ce   : > { %v2611_v2 = vmul.f32 0.03125, %v2493_v36  ;;  %2510 = vadd.xlane.f32.xlu2 %v2509_v24  ;;  %2433 = vadd.xlane.f32.xlu1 %v2432_v6  ;;  %v7506_v23 = vpop.f32.mrf.mxu2  ;;  %v7517_v16 = vmul.f32 0.03125, %v2368_v5  ;;  %v3157_v24 = vadd.f32 %v7454_v60, %v3123_v58  ;;  %v2707_v58 = vsub.f32 %v7308_v19, %v7488_v55 }
 0x2d0   : > { %v2675_v39 = vsub.f32 %v2611_v2, %v2643_v54  ;;  %v2644_v46 = vmul.f32 %v7517_v16, %v7517_v16  ;;  %v3189_v3 = vmax.f32 %v3157_v24, 0.0 }
 0x2d2   : > { %v7513_v47 = vpop.eup %5289  ;;  %v7515_v26 = vadd.f32 1e-05, %v2675_v39  ;;  %3256 = vadd.xlane.f32.xlu0 %v3255_v41  ;;  %v2339_v17 = vpop.f32.mrf.mxu3  ;;  %v2512_v39 = vsel %vm618_vm0, %v2458_v48, 0.0 }
 0x2d3   : > { %v2798_v1 = vmul.f32 %v7513_v47, %v7486_v62  ;;  %v7549_v36 = vadd.f32 %v7462_v57, %v2339_v17  ;;  %vm2804_vm3 = vweird.f32 %v7513_v47 }
 0x2d4   : > { %5291 = vrsqrt.f32 %v7515_v26  ;;  %vm7589_vm5 = vmor %vm2803_vm4, %vm2804_vm3  ;;  %vm2813_vm7 = vweird.f32 %v7515_v26 }
 0x2d5   : > { %v2496_v59 = vpop.xlane.xlu1 %2495  ;;  %v2799_v11 = vmul.f32 %v7513_v47, %v2798_v1  ;;  %9416 = vst [vmem:[#allocation12_spill] sm:$0xff] %v7549_v36  ;;  %v2435_v42 = vsel %vm618_vm0, %v7549_v36, 0.0 }
 0x2d6   : > { %v2612_v8 = vmul.f32 0.03125, %v2496_v59  ;;  %2430 = vadd.xlane.f32.xlu2 %v2429_v63  ;;  %2388 = vadd.xlane.f32.xlu1 %v2387_v13  ;;  %v2318_v27 = vpop.f32.mrf.mxu2 }
 0x2d7   : > { %v2499_v31 = vpop.xlane.xlu0 %2498  ;;  %v2800_v15 = vmul.f32 0.5, %v2799_v11  ;;  %v7557_v54 = vadd.f32 %v7462_v57, %v2318_v27 }
 0x2d8   : > { %v2676_v18 = vsub.f32 %v2612_v8, %v2644_v46  ;;  %v2613_v17 = vmul.f32 0.03125, %v2499_v31  ;;  %v7574_v46 = vadd.f32 %v7462_v57, %v7445_v14 }
 0x2d9   : > { %9417 = vst [vmem:[#allocation13_spill] sm:$0xff] %v7557_v54  ;;  %v2801_v34 = vsub.f32 1.5, %v2800_v15  ;;  %v2414_v59 = vsel %vm618_vm0, %v7557_v54, 0.0 }
 0x2da   : > { %v7544_v0 = vpop.eup %5291  ;;  %v7546_v21 = vadd.f32 1e-05, %v2676_v18  ;;  %3259 = vadd.xlane.f32.xlu0 %v3258_v33  ;;  %v2342_v6 = vpop.f32.mrf.mxu3  ;;  %v3225_v33 = vmul.f32 %v7483_v7, %v3189_v3  ;;  %v2405_v14 = vsel %vm618_vm0, %v7574_v46, 0.0 }
 0x2db   : > { %v2808_v25 = vmul.f32 %v7544_v0, %v7515_v26  ;;  %v7577_v8 = vadd.f32 %v7462_v57, %v2342_v6  ;;  %v2802_v11 = vmul.f32 %v7513_v47, %v2801_v34  ;;  %vm2814_vm6 = vweird.f32 %v7544_v0 }
 0x2dc   : > { %5293 = vrsqrt.f32 %v7546_v21  ;;  %v3261_v34 = vsel %vm618_vm0, %v3225_v33, 0.0  ;;  %vm7623_vm8 = vmor %vm2813_vm7, %vm2814_vm6  ;;  %vm2823_vm10 = vweird.f32 %v7546_v21 }
 0x2dd   : > { %v2371_v2 = vpop.xlane.xlu1 %2370  ;;  %v2809_v44 = vmul.f32 %v7544_v0, %v2808_v25  ;;  %v2374_v35 = vpop.xlane.xlu2 %2373  ;;  %9418 = vst [vmem:[#allocation9_spill] sm:$0xff] %v7577_v8  ;;  %v2438_v25 = vsel %vm618_vm0, %v7577_v8, 0.0 }
 0x2de   : > { %v7560_v5 = vmul.f32 0.03125, %v2371_v2  ;;  %2513 = vadd.xlane.f32.xlu2 %v2512_v39  ;;  %2436 = vadd.xlane.f32.xlu1 %v2435_v42  ;;  %v7579_v63 = vmul.f32 0.03125, %v2374_v35  ;;  %v2806_v39 = vsel %vm7589_vm5, %v7513_v47, %v2802_v11  ;;  %v2706_v42 = vsub.f32 %v7270_v30, %v7457_v37 }
 0x2df   : > { %v2502_v41 = vpop.xlane.xlu0 %2501  ;;  %v2810_v31 = vmul.f32 0.5, %v2809_v44  ;;  %v7612_v44 = vadd.f32 %v7462_v57, %v7506_v23  ;;  %v2321_v23 = vpop.f32.mrf.mxu2 }
 0x2e0   : > { %v2645_v1 = vmul.f32 %v7560_v5, %v7560_v5  ;;  %v2646_v27 = vmul.f32 %v7579_v63, %v7579_v63  ;;  %v2614_v15 = vmul.f32 0.03125, %v2502_v41  ;;  %v7608_v41 = vadd.f32 %v7462_v57, %v7404_v45 }
 0x2e1   : > { %v2811_v24 = vsub.f32 1.5, %v2810_v31  ;;  %v2411_v3 = vsel %vm618_vm0, %v7612_v44, 0.0 }
 0x2e2   : > { %v7570_v50 = vpop.eup %5293  ;;  %2415 = vadd.xlane.f32.xlu0 %v2414_v59  ;;  %v2677_v13 = vsub.f32 %v2613_v17, %v2645_v1  ;;  %v2345_v6 = vpop.f32.mrf.mxu3  ;;  %v2678_v35 = vsub.f32 %v2614_v15, %v2646_v27  ;;  %v3090_v1 = vmul.f32 %v2806_v39, %v2706_v42 }
 0x2e3   : > { %v2818_v18 = vmul.f32 %v7570_v50, %v7546_v21  ;;  %v2812_v47 = vmul.f32 %v7544_v0, %v2811_v24  ;;  %v7618_v37 = vadd.f32 %v7462_v57, %v2345_v6  ;;  %vm2824_vm9 = vweird.f32 %v7570_v50 }
 0x2e4   : > { %v7595_v48 = vadd.f32 1e-05, %v2677_v13  ;;  %v7627_v59 = vadd.f32 1e-05, %v2678_v35  ;;  %v2393_v13 = vsel %vm618_vm0, %v7608_v41, 0.0  ;;  %v3124_v31 = vmul.f32 %v7441_v40, %v3090_v1  ;;  %vm7664_vm11 = vmor %vm2823_vm10, %vm2824_vm9 }
 0x2e5   : > { %v2819_v62 = vmul.f32 %v7570_v50, %v2818_v18  ;;  %9421 = vst [vmem:[#allocation15_spill] sm:$0xff] %v7618_v37  ;;  %v2816_v33 = vsel %vm7623_vm8, %v7544_v0, %v2812_v47  ;;  %v2441_v15 = vsel %vm618_vm0, %v7618_v37, 0.0 }
 0x2e6   : > { %2406 = vadd.xlane.f32.xlu2 %v2405_v14  ;;  %2439 = vadd.xlane.f32.xlu1 %v2438_v25  ;;  %5295 = vrsqrt.f32 %v7595_v48  ;;  %v7647_v25 = vadd.f32 %v7462_v57, %v7415_v43  ;;  %v3158_v19 = vadd.f32 %v7454_v60, %v3124_v31  ;;  %v3091_v55 = vmul.f32 %v2816_v33, %v2707_v58 }
 0x2e7   : > { %v2377_v2 = vpop.xlane.xlu0 %2376  ;;  %v2820_v30 = vmul.f32 0.5, %v2819_v62  ;;  %5297 = vrsqrt.f32 %v7627_v59  ;;  %vm2833_vm13 = vweird.f32 %v7595_v48  ;;  %vm2843_vm1 = vweird.f32 %v7627_v59 }
 0x2e8   : > { %v7620_v17 = vmul.f32 0.03125, %v2377_v2  ;;  %v7650_v2 = vadd.f32 %v7462_v57, %v2321_v23  ;;  %v2399_v39 = vsel %vm618_vm0, %v7647_v25, 0.0  ;;  %v3190_v1 = vmax.f32 %v3158_v19, 0.0 }
 0x2e9   : > { %v2821_v18 = vsub.f32 1.5, %v2820_v30  ;;  %v3125_v47 = vmul.f32 %v7441_v40, %v3091_v55  ;;  %v2708_v23 = vsub.f32 %v7335_v49, %v7517_v16  ;;  %v2462_v49 = vmul.f32 %v7409_v38, %v7409_v38 }
 0x2ea   : > { %3262 = vadd.xlane.f32.xlu0 %v3261_v34  ;;  %v2647_v27 = vmul.f32 %v7620_v17, %v7620_v17  ;;  %9424 = vst [vmem:[#allocation16_spill] sm:$0xff] %v7650_v2  ;;  %v2348_v24 = vpop.f32.mrf.mxu3  ;;  %v2417_v35 = vsel %vm618_vm0, %v7650_v2, 0.0  ;;  %v2460_v55 = vmul.f32 %v7398_v29, %v7398_v29 }
 0x2eb   : > { %v2822_v62 = vmul.f32 %v7570_v50, %v2821_v18  ;;  %v7659_v43 = vadd.f32 %v7462_v57, %v2348_v24  ;;  %v3159_v31 = vadd.f32 %v7454_v60, %v3125_v47  ;;  %v2524_v19 = vsel %vm618_vm0, %v2462_v49, 0.0 }
 0x2ec   : > { %v7637_v14 = vpop.eup %5295  ;;  %v2518_v47 = vsel %vm618_vm0, %v2460_v55, 0.0  ;;  %v2466_v49 = vmul.f32 %v7476_v20, %v7476_v20 }
 0x2ed   : > { %v2828_v6 = vmul.f32 %v7637_v14, %v7595_v48  ;;  %9425 = vst [vmem:[#allocation17_spill] sm:$0xff] %v7659_v43  ;;  %v2826_v21 = vsel %vm7664_vm11, %v7570_v50, %v2822_v62  ;;  %v7677_v45 = vpop.eup %5297  ;;  %v3191_v58 = vmax.f32 %v3159_v31, 0.0  ;;  %vm2834_vm12 = vweird.f32 %v7637_v14 }
 0x2ee   : > { %2412 = vadd.xlane.f32.xlu2 %v2411_v3  ;;  %2394 = vadd.xlane.f32.xlu1 %v2393_v13  ;;  %v2444_v3 = vsel %vm618_vm0, %v7659_v43, 0.0  ;;  %v2459_v13 = vmul.f32 %v7524_v4, %v7524_v4  ;;  %v3092_v18 = vmul.f32 %v2826_v21, %v2708_v23  ;;  %vm2835_vm14 = vmor %vm2833_vm13, %vm2834_vm12  ;;  %vm2844_vm15 = vweird.f32 %v7677_v45 }
 0x2ef   : > { %v2505_v11 = vpop.xlane.xlu0 %2504  ;;  %v2829_v30 = vmul.f32 %v7637_v14, %v2828_v6  ;;  %v3227_v62 = vmul.f32 %v7483_v7, %v3191_v58  ;;  %vm2845_vm2 = vmor %vm2843_vm1, %vm2844_vm15 }
 0x2f0   : > { %v2615_v26 = vmul.f32 0.03125, %v2505_v11  ;;  %v3226_v11 = vmul.f32 %v7483_v7, %v3190_v1  ;;  %v2515_v16 = vsel %vm618_vm0, %v2459_v13, 0.0  ;;  %v2464_v1 = vmul.f32 %v7426_v9, %v7426_v9 }
 0x2f1   : > { %v2830_v50 = vmul.f32 0.5, %v2829_v30  ;;  %v3267_v30 = vsel %vm618_vm0, %v3227_v62, 0.0 }
 0x2f2   : > { %2442 = vadd.xlane.f32.xlu0 %v2441_v15  ;;  %v2679_v0 = vsub.f32 %v2615_v26, %v2647_v27  ;;  %v2838_v26 = vmul.f32 %v7677_v45, %v7627_v59  ;;  %v3264_v33 = vsel %vm618_vm0, %v3226_v11, 0.0  ;;  %v3126_v27 = vmul.f32 %v7441_v40, %v3092_v18 }
 0x2f3   : > { %v2831_v15 = vsub.f32 1.5, %v2830_v50  ;;  %v2709_v11 = vsub.f32 %v7352_v56, %v7560_v5  ;;  %v2530_v31 = vsel %vm618_vm0, %v2464_v1, 0.0  ;;  %v2461_v18 = vmul.f32 %v7608_v41, %v7608_v41 }
 0x2f4   : > { %v7668_v34 = vadd.f32 1e-05, %v2679_v0  ;;  %v2839_v24 = vmul.f32 %v7677_v45, %v2838_v26  ;;  %v3160_v6 = vadd.f32 %v7454_v60, %v3126_v27 }
 0x2f5   : > { %v2521_v5 = vsel %vm618_vm0, %v2461_v18, 0.0 }
 0x2f6   : > { %2400 = vadd.xlane.f32.xlu1 %v2399_v39  ;;  %2418 = vadd.xlane.f32.xlu2 %v2417_v35  ;;  %5299 = vrsqrt.f32 %v7668_v34  ;;  %v2832_v39 = vmul.f32 %v7637_v14, %v2831_v15  ;;  %v2840_v42 = vmul.f32 0.5, %v2839_v24  ;;  %v3192_v21 = vmax.f32 %v3160_v6, 0.0 }
 0x2f7   : > { %v2710_v15 = vsub.f32 %v7363_v51, %v7579_v63  ;;  %v2536_v24 = vsel %vm618_vm0, %v2466_v49, 0.0  ;;  %vm2853_vm4 = vweird.f32 %v7668_v34  ;;  %v2380_v49 = vpop.xlane.xlu1 %2379 }
 0x2f8   : > { %v2836_v23 = vsel %vm2835_vm14, %v7637_v14, %v2832_v39  ;;  %v3228_v50 = vmul.f32 %v7483_v7, %v3192_v21 }
 0x2f9   : > { %v3093_v48 = vmul.f32 %v2836_v23, %v2709_v11 }
 0x2fa   : > { %2445 = vadd.xlane.f32.xlu0 %v2444_v3  ;;  %v2841_v3 = vsub.f32 1.5, %v2840_v42  ;;  %v2711_v42 = vsub.f32 %v7374_v22, %v7620_v17  ;;  %v2467_v22 = vmul.f32 %v7612_v44, %v7612_v44 }
 0x2fb   : > { %v3127_v56 = vmul.f32 %v7441_v40, %v3093_v48 }
 0x2fc   : > { %v7696_v0 = vpop.eup %5299  ;;  %v2842_v26 = vmul.f32 %v7677_v45, %v2841_v3 }
 0x2fd   : > { %v2848_v35 = vmul.f32 %v7696_v0, %v7668_v34  ;;  %v3161_v55 = vadd.f32 %v7454_v60, %v3127_v56  ;;  %vm2854_vm3 = vweird.f32 %v7696_v0 }
 0x2fe   : > { %2516 = vadd.xlane.f32.xlu1 %v2515_v16  ;;  %3265 = vadd.xlane.f32.xlu2 %v3264_v33  ;;  %v3270_v16 = vsel %vm618_vm0, %v3228_v50, 0.0  ;;  %v2324_v33 = vpop.f32.mrf.mxu2  ;;  %v2846_v27 = vsel %vm2845_vm2, %v7677_v45, %v2842_v26  ;;  %vm2855_vm5 = vmor %vm2853_vm4, %vm2854_vm3  ;;  %v2469_v26 = vmul.f32 %v7650_v2, %v7650_v2 }
 0x2ff   : > { %v2849_v13 = vmul.f32 %v7696_v0, %v2848_v35  ;;  %v7733_v59 = vadd.f32 %v7462_v57, %v2324_v33  ;;  %v3094_v62 = vmul.f32 %v2846_v27, %v2710_v15  ;;  %v3193_v57 = vmax.f32 %v3161_v55, 0.0 }
 0x300   : > { %v2465_v35 = vmul.f32 %v7574_v46, %v7574_v46  ;;  %v2584_v33 = vmul.f32 0.03125, %v2380_v49  ;;  %v2471_v27 = vmul.f32 %v7421_v61, %v7421_v61  ;;  %v2468_v15 = vmul.f32 %v7557_v54, %v7557_v54 }
 0x301   : > { %v2850_v14 = vmul.f32 0.5, %v2849_v13  ;;  %9428 = vst [vmem:[#allocation18_spill] sm:$0xff] %v7733_v59  ;;  %v2420_v51 = vsel %vm618_vm0, %v7733_v59, 0.0  ;;  %v3128_v45 = vmul.f32 %v7441_v40, %v3094_v62  ;;  %v3229_v34 = vmul.f32 %v7483_v7, %v3193_v57 }
 0x302   : > { %2525 = vadd.xlane.f32.xlu0 %v2524_v19  ;;  %v2463_v19 = vmul.f32 %v7647_v25, %v7647_v25  ;;  %v2533_v21 = vsel %vm618_vm0, %v2465_v35, 0.0 }
 0x303   : > { %v2851_v58 = vsub.f32 1.5, %v2850_v14  ;;  %v3162_v1 = vadd.f32 %v7454_v60, %v3128_v45  ;;  %v3273_v23 = vsel %vm618_vm0, %v3229_v34, 0.0 }
 0x304   : > { %v2527_v63 = vsel %vm618_vm0, %v2463_v19, 0.0 }
 0x305   : > { %v2852_v6 = vmul.f32 %v7696_v0, %v2851_v58  ;;  %v3194_v3 = vmax.f32 %v3162_v1, 0.0 }
 0x306   : > { %2519 = vadd.xlane.f32.xlu1 %v2518_v47  ;;  %3268 = vadd.xlane.f32.xlu2 %v3267_v30  ;;  %v7752_v30 = vpop.xlane.xlu0 %2385 }
 0x307   : > { %v2856_v39 = vsel %vm2855_vm5, %v7696_v0, %v2852_v6  ;;  %v3230_v17 = vmul.f32 %v7483_v7, %v3194_v3  ;;  %v2551_v6 = vsel %vm618_vm0, %v2471_v27, 0.0  ;;  %v2712_v27 = vsub.f32 %v7379_v12, %v2584_v33 }
 0x308   : > { %v3095_v47 = vmul.f32 %v2856_v39, %v2711_v42  ;;  %v2470_v39 = vmul.f32 %v7733_v59, %v7733_v59 }
 0x309   : > { %v3276_v48 = vsel %vm618_vm0, %v3230_v17, 0.0 }
 0x30a   : > { %2531 = vadd.xlane.f32.xlu0 %v2530_v31  ;;  %v3129_v0 = vmul.f32 %v7441_v40, %v3095_v47  ;;  %v2539_v31 = vsel %vm618_vm0, %v2467_v22, 0.0  ;;  %v2548_v35 = vsel %vm618_vm0, %v2470_v39, 0.0  ;;  %v7795_v22 = vstv %s3351_s28  ;;  %s5087_s28 = sshll.u32 %s5686_s6, 1  ;;  %s543_s6 = scalar_lea.vmem [#allocation5], %s4924_s26 }
 0x30b   : > { %s4786_s7 = scalar_lea.hbm %s9302_s8, %s5087_s28  ;;  %s4788_s24 = sshll.u32 %s543_s6, 4  ;;  %s4789_s24 = int_to_ptr.vmem [resolvable:$true] %s4788_s24 }
 0x30c   : > { %v3163_v13 = vadd.f32 %v7454_v60, %v3129_v0  ;;  %v2472_v0 = vmul.f32 %v7436_v28, %v7436_v28  ;;  %s4790_s25 = sshll.u32 %s4786_s7, 4  ;;  %s4791_s25 = int_to_ptr.hbm [resolvable:$true] %s4790_s25 }
 0x30d   : > { %s5499_s20 = sshra.s32 %s4791_s25, 4  ;;  %s5500_s20 = int_to_ptr.hbm [resolvable:$true] %s5499_s20 }
 0x30e   : > { %2522 = vadd.xlane.f32.xlu1 %v2521_v5  ;;  %3271 = vadd.xlane.f32.xlu2 %v3270_v16  ;;  %v7761_v11 = vpop.xlane.xlu0 %2391  ;;  %v3195_v18 = vmax.f32 %v3163_v13, 0.0  ;;  %v2545_v5 = vsel %vm618_vm0, %v2469_v26, 0.0  ;;  %v2554_v49 = vsel %vm618_vm0, %v2472_v0, 0.0  ;;  %s5501_s21 = scalar_lea.hbm %s5500_s20, 2  ;;  %p5506_p12 = scmp.lt.s32.totalorder %s5500_s20, %s9302_s8 }
 0x30f   : > { %p5502_p9 = scmp.ne.s32.totalorder %s5500_s20, %s5501_s21  ;;  %p5507_p13 = scmp.lt.s32.totalorder %s5505_s15, %s5501_s21 }
 0x310   : > { %v3231_v14 = vmul.f32 %v7483_v7, %v3195_v18 }
 0x311   : > { %p5503_p10 = pnand %p5502_p9, %p5704_p6  ;;  %p5508_p0 = por %p5507_p13, %p5506_p12 }
 0x312   : > { %2537 = vadd.xlane.f32.xlu0 %v2536_v24  ;;  %v3279_v16 = vsel %vm618_vm0, %v3231_v14, 0.0  ;;  %v2648_v24 = vmul.f32 %v2584_v33, %v2584_v33 }
 0x313   : > { %p5504_p11 = pneg %p5503_p10 }
 0x315   : > { %p5509_p1 = pnand %p5508_p0, %p5504_p11 }
 0x316   : > { %2421 = vadd.xlane.f32.xlu1 %v2420_v51  ;;  %2528 = vadd.xlane.f32.xlu2 %v2527_v63  ;;  %v2542_v51 = vsel %vm618_vm0, %v2468_v15, 0.0 }
 0x31d   : > { %v7770_v56 = vpop.xlane.xlu0 %2397 }
 0x31e   : > { %2534 = vadd.xlane.f32.xlu2 %v2533_v21  ;;  %3274 = vadd.xlane.f32.xlu1 %v3273_v23 }
 0x326   : > { %2540 = vadd.xlane.f32.xlu2 %v2539_v31  ;;  %3277 = vadd.xlane.f32.xlu1 %v3276_v48 }
 0x329   : > { %v7765_v50 = vpop.xlane.xlu2 %2424 }
 0x32d   : > { %v7778_v55 = vpop.xlane.xlu0 %2403 }
 0x32e   : > { %2546 = vadd.xlane.f32.xlu2 %v2545_v5  ;;  %3280 = vadd.xlane.f32.xlu1 %v3279_v16 }
 0x331   : > { %v2508_v58 = vpop.xlane.xlu2 %2507  ;;  %v7782_v57 = vpop.xlane.xlu1 %2427 }
 0x332   : > { %v2616_v19 = vmul.f32 0.03125, %v2508_v58 }
 0x334   : > { %v2680_v62 = vsub.f32 %v2616_v19, %v2648_v24  ;;  %v2474_v19 = vmul.f32 %v7494_v53, %v7494_v53 }
 0x336   : > { %v2744_v63 = vadd.f32 1e-05, %v2680_v62  ;;  %2552 = vadd.xlane.f32.xlu2 %v2551_v6  ;;  %2543 = vadd.xlane.f32.xlu1 %v2542_v51 }
 0x338   : > { %5301 = vrsqrt.f32 %v2744_v63  ;;  %vm2863_vm7 = vweird.f32 %v2744_v63 }
 0x339   : > { %v2383_v45 = vpop.xlane.xlu2 %2382 }
 0x33a   : > { %v7789_v1 = vmul.f32 0.03125, %v2383_v45  ;;  %v2560_v45 = vsel %vm618_vm0, %v2474_v19, 0.0 }
 0x33c   : > { %v2649_v17 = vmul.f32 %v7789_v1, %v7789_v1 }
 0x33d   : > { %v7786_v42 = vpop.xlane.xlu0 %2409 }
 0x33e   : > { %v5302_v34 = vpop.eup %5301  ;;  %2549 = vadd.xlane.f32.xlu1 %v2548_v35  ;;  %v7812_v35 = vmul.f32 0.03125, %v7752_v30 }
 0x33f   : > { %v2858_v47 = vmul.f32 %v5302_v34, %v2744_v63  ;;  %vm2864_vm6 = vweird.f32 %v5302_v34 }
 0x340   : > { %vm2865_vm8 = vmor %vm2863_vm7, %vm2864_vm6 }
 0x341   : > { %v2859_v21 = vmul.f32 %v5302_v34, %v2858_v47  ;;  %v2511_v23 = vpop.xlane.xlu2 %2510  ;;  %v7791_v3 = vpop.xlane.xlu1 %2433 }
 0x342   : > { %v2617_v13 = vmul.f32 0.03125, %v2511_v23 }
 0x343   : > { %v2860_v31 = vmul.f32 0.5, %v2859_v21 }
 0x344   : > { %v2681_v18 = vsub.f32 %v2617_v13, %v2649_v17 }
 0x345   : > { %v3257_v48 = vpop.xlane.xlu0 %3256  ;;  %v2861_v14 = vsub.f32 1.5, %v2860_v31 }
 0x346   : > { %v3353_v26 = vadd.f32 %v7795_v22, %v3257_v48  ;;  %v2745_v5 = vadd.f32 1e-05, %v2681_v18  ;;  %2555 = vadd.xlane.f32.xlu1 %v2554_v49  ;;  %v2476_v48 = vmul.f32 %v7577_v8, %v7577_v8  ;;  %v2650_v18 = vmul.f32 %v7812_v35, %v7812_v35 }
 0x347   : > { %v2862_v58 = vmul.f32 %v5302_v34, %v2861_v14 }
 0x348   : > { %v5054_v16 = vmul.f32 -1.442695, %v3353_v26  ;;  %5303 = vrsqrt.f32 %v2745_v5  ;;  %vm2873_vm10 = vweird.f32 %v2745_v5 }
 0x349   : > { %v7802_v15 = vpop.xlane.xlu2 %2430  ;;  %v7804_v24 = vpop.xlane.xlu1 %2388  ;;  %v2866_v62 = vsel %vm2865_vm8, %v5302_v34, %v2862_v58 }
 0x34a   : > { %5305 = vpow2.f32 %v5054_v16  ;;  %9429 = vst [vmem:[#allocation19_spill] sm:$0xff] %v7802_v15  ;;  %v3096_v6 = vmul.f32 %v2866_v62, %v2712_v27  ;;  %v2566_v27 = vsel %vm618_vm0, %v2476_v48, 0.0 }
 0x34c   : > { %v3130_v63 = vmul.f32 %v7441_v40, %v3096_v6 }
 0x34d   : > { %v3260_v51 = vpop.xlane.xlu0 %3259 }
 0x34e   : > { %v3354_v39 = vadd.f32 %v7795_v22, %v3260_v51  ;;  %v5304_v12 = vpop.eup %5303  ;;  %2561 = vadd.xlane.f32.xlu1 %v2560_v45  ;;  %v3164_v23 = vadd.f32 %v7454_v60, %v3130_v63 }
 0x34f   : > { %v2868_v47 = vmul.f32 %v5304_v12, %v2745_v5  ;;  %vm2874_vm9 = vweird.f32 %v5304_v12 }
 0x350   : > { %v5306_v33 = vpop.eup %5305  ;;  %v5055_v21 = vmul.f32 -1.442695, %v3354_v39  ;;  %v3196_v31 = vmax.f32 %v3164_v23, 0.0  ;;  %vm2875_vm11 = vmor %vm2873_vm10, %vm2874_vm9 }
 0x351   : > { %v3481_v0 = vadd.f32 1.0, %v5306_v33  ;;  %v2869_v34 = vmul.f32 %v5304_v12, %v2868_v47  ;;  %v2514_v17 = vpop.xlane.xlu2 %2513  ;;  %v7815_v13 = vpop.xlane.xlu1 %2436 }
 0x352   : > { %5307 = vpow2.f32 %v5055_v21  ;;  %9430 = vst [vmem:[#allocation20_spill] sm:$0xff] %v7815_v13  ;;  %v2618_v26 = vmul.f32 0.03125, %v2514_v17  ;;  %v3232_v14 = vmul.f32 %v7483_v7, %v3196_v31  ;;  %v2713_v21 = vsub.f32 %v7466_v32, %v7789_v1 }
 0x353   : > { %5309 = vrcp.f32 %v3481_v0  ;;  %v2870_v30 = vmul.f32 0.5, %v2869_v34  ;;  %v3524_v31 = vand.u32 2147483648, %v3481_v0  ;;  %vm3518_vm13 = vweird.f32 %v3481_v0 }
 0x354   : > { %v2682_v58 = vsub.f32 %v2618_v26, %v2650_v18  ;;  %v3282_v19 = vsel %vm618_vm0, %v3232_v14, 0.0 }
 0x355   : > { %v7822_v49 = vpop.xlane.xlu0 %2415  ;;  %v2871_v16 = vsub.f32 1.5, %v2870_v30  ;;  %3283 = vadd.xlane.f32.xlu0 %v3282_v19  ;;  %v3522_v30 = vand.u32 2147483647, %v3481_v0  ;;  %v3525_v1 = vor.u32 1.1754944e-38, %v3524_v31 }
 0x356   : > { %2567 = vadd.xlane.f32.xlu1 %v2566_v27  ;;  %v7826_v51 = vadd.f32 1e-05, %v2682_v58 }
 0x357   : > { %v2872_v6 = vmul.f32 %v5304_v12, %v2871_v16  ;;  %vm3523_vm15 = vcmp.eq.f32.partialorder %v3522_v30, 8.507059e+37 }
 0x358   : > { %v5308_v62 = vpop.eup %5307  ;;  %5311 = vrsqrt.f32 %v7826_v51  ;;  %vm2883_vm6 = vweird.f32 %v7826_v51 }
 0x359   : > { %v5310_v45 = vpop.eup %5309  ;;  %v7828_v39 = vadd.f32 1.0, %v5308_v62  ;;  %v7831_v33 = vpop.xlane.xlu2 %2406  ;;  %v2876_v17 = vsel %vm2875_vm11, %v5304_v12, %v2872_v6 }
 0x35a   : > { %v3514_v63 = vmul.f32 %v5310_v45, %v3481_v0  ;;  %v7833_v47 = vpop.xlane.xlu1 %2439  ;;  %v3097_v5 = vmul.f32 %v2876_v17, %v2713_v21  ;;  %vm3519_vm12 = vweird.f32 %v5310_v45 }
 0x35b   : > { %9431 = vst [vmem:[#allocation21_spill] sm:$0xff] %v7833_v47  ;;  %5313 = vrcp.f32 %v7828_v39  ;;  %vm3520_vm14 = vmor %vm3518_vm13, %vm3519_vm12  ;;  %vm3533_vm2 = vweird.f32 %v7828_v39 }
 0x35c   : > { %v3515_v23 = vsub.f32 1.0, %v3514_v63  ;;  %v3131_v14 = vmul.f32 %v7441_v40, %v3097_v5 }
 0x35d   : > { %v3263_v34 = vpop.xlane.xlu0 %3262 }
 0x35e   : > { %v3355_v48 = vadd.f32 %v7795_v22, %v3263_v34  ;;  %v3516_v18 = vmul.f32 %v5310_v45, %v3515_v23  ;;  %v7840_v16 = vpop.eup %5311  ;;  %v3165_v0 = vadd.f32 %v7454_v60, %v3131_v14 }
 0x35f   : > { %v2878_v12 = vmul.f32 %v7840_v16, %v7826_v51  ;;  %vm2884_vm4 = vweird.f32 %v7840_v16  ;;  %v2714_v51 = vsub.f32 %v7389_v52, %v7812_v35  ;;  %v7916_v35 = vmul.f32 0.03125, %v7765_v50 }
 0x360   : > { %v5056_v26 = vmul.f32 -1.442695, %v3355_v48  ;;  %v3517_v58 = vadd.f32 %v5310_v45, %v3516_v18  ;;  %vm7887_vm7 = vmor %vm2883_vm6, %vm2884_vm4 }
 0x361   : > { %v5314_v32 = vpop.eup %5313  ;;  %v7845_v62 = vpop.xlane.xlu2 %2412  ;;  %v2879_v21 = vmul.f32 %v7840_v16, %v2878_v12  ;;  %9438 = vst [vmem:[#allocation24_spill] sm:$0xff] %v7916_v35 }
 0x362   : > { %5315 = vpow2.f32 %v5056_v26  ;;  %v3521_v27 = vsel %vm3520_vm14, %v5310_v45, %v3517_v58  ;;  %v3529_v19 = vmul.f32 %v5314_v32, %v7828_v39  ;;  %v7847_v6 = vpop.xlane.xlu1 %2394  ;;  %vm3534_vm1 = vweird.f32 %v5314_v32 }
 0x363   : > { %v3526_v63 = vsel %vm3523_vm15, %v3525_v1, %v3521_v27  ;;  %v2880_v18 = vmul.f32 0.5, %v2879_v21  ;;  %v3539_v58 = vand.u32 2147483648, %v7828_v39  ;;  %v3197_v1 = vmax.f32 %v3165_v0, 0.0  ;;  %vm7865_vm3 = vmor %vm3533_vm2, %vm3534_vm1 }
 0x364   : > { %v4025_v23 = vperm.slane %v3526_v63, 0  ;;  %v4026_v34 = vperm.slane %v3526_v63, 1  ;;  %v4027_v17 = vperm.slane %v3526_v63, 2  ;;  %v4028_v48 = vperm.slane %v3526_v63, 3 }
 0x365   : > { %v7851_v31 = vpop.xlane.xlu0 %2442  ;;  %v4029_v5 = vperm.slane %v3526_v63, 4  ;;  %v3530_v45 = vsub.f32 1.0, %v3529_v19  ;;  %v4030_v26 = vperm.slane %v3526_v63, 5  ;;  %v4031_v12 = vperm.slane %v3526_v63, 6 }
 0x366   : > { %9432 = vst [vmem:[#allocation22_spill] sm:$0xff] %v7851_v31  ;;  %v2881_v27 = vsub.f32 1.5, %v2880_v18  ;;  %v4032_v13 = vperm.slane %v3526_v63, 7  ;;  %v3537_v31 = vand.u32 2147483647, %v7828_v39  ;;  %v3233_v19 = vmul.f32 %v7483_v7, %v3197_v1 }
 0x367   : > { %4281 = vst [vmem:[#allocation1] ss:$9 sm:$0xff] %v4025_v23  ;;  %v3531_v14 = vmul.f32 %v5314_v32, %v3530_v45  ;;  %v2473_v39 = vmul.f32 %v7529_v10, %v7529_v10  ;;  %v7879_v18 = vmul.f32 0.03125, %v7770_v56 }
 0x368   : > { %v5316_v30 = vpop.eup %5315  ;;  %4283 = vst [vmem:[#allocation1 + $0x1] ss:$9 sm:$0xff] %v4026_v34  ;;  %v2882_v63 = vmul.f32 %v7840_v16, %v2881_v27  ;;  %vm3538_vm5 = vcmp.eq.f32.partialorder %v3537_v31, 8.507059e+37  ;;  %v2477_v31 = vmul.f32 %v7618_v37, %v7618_v37 }
 0x369   : > { %4285 = vst [vmem:[#allocation1 + $0x2] ss:$9 sm:$0xff] %v4027_v17  ;;  %v7854_v8 = vadd.f32 1.0, %v5316_v30  ;;  %v3532_v21 = vadd.f32 %v5314_v32, %v3531_v14  ;;  %v7862_v0 = vpop.xlane.xlu2 %2418  ;;  %v3285_v17 = vsel %vm618_vm0, %v3233_v19, 0.0  ;;  %v7883_v30 = vmul.f32 0.03125, %v7804_v24 }
 0x36a   : > { %4287 = vst [vmem:[#allocation1 + $0x3] ss:$9 sm:$0xff] %v4028_v48  ;;  %v7860_v23 = vpop.xlane.xlu1 %2400  ;;  %3286 = vadd.xlane.f32.xlu0 %v3285_v17  ;;  %v7895_v56 = vsel %vm618_vm0, %v2473_v39, 0.0  ;;  %v2475_v24 = vmul.f32 %v7549_v36, %v7549_v36 }
 0x36b   : > { %4289 = vst [vmem:[#allocation1 + $0x4] ss:$9 sm:$0xff] %v4029_v5  ;;  %5317 = vrcp.f32 %v7854_v8  ;;  %v3536_v48 = vsel %vm7865_vm3, %v5314_v32, %v3532_v21  ;;  %v3540_v5 = vor.u32 1.1754944e-38, %v3539_v58  ;;  %v2886_v32 = vsel %vm7887_vm7, %v7840_v16, %v2882_v63 }
 0x36c   : > { %4291 = vst [vmem:[#allocation1 + $0x5] ss:$9 sm:$0xff] %v4030_v26  ;;  %v2478_v58 = vmul.f32 %v7659_v43, %v7659_v43  ;;  %v2654_v16 = vmul.f32 %v7879_v18, %v7879_v18  ;;  %v2651_v27 = vmul.f32 %v7883_v30, %v7883_v30  ;;  %v3554_v43 = vand.u32 2147483648, %v7854_v8 }
 0x36d   : > { %4293 = vst [vmem:[#allocation1 + $0x6] ss:$9 sm:$0xff] %v4031_v12  ;;  %v7876_v45 = vpop.xlane.xlu0 %2445  ;;  %v7885_v26 = vsel %vm3538_vm5, %v3540_v5, %v3536_v48  ;;  %v7908_v12 = vmul.f32 0.03125, %v7761_v11  ;;  %v3098_v11 = vmul.f32 %v2886_v32, %v2714_v51  ;;  %vm3548_vm9 = vweird.f32 %v7854_v8 }
 0x36e   : > { %9435 = vst [vmem:[#allocation23_spill] sm:$0xff] %v7876_v45  ;;  %v4033_v14 = vperm.slane %v7885_v26, 0  ;;  %v4034_v19 = vperm.slane %v7885_v26, 1  ;;  %v4035_v63 = vperm.slane %v7885_v26, 2  ;;  %v4036_v1 = vperm.slane %v7885_v26, 3 }
 0x36f   : > { %4295 = vst [vmem:[#allocation1 + $0x7] ss:$9 sm:$0xff] %v4032_v13  ;;  %v4037_v50 = vperm.slane %v7885_v26, 4  ;;  %v3132_v45 = vmul.f32 %v7441_v40, %v3098_v11 }
 0x371   : > { %v7897_v13 = vpop.eup %5317  ;;  %v3266_v34 = vpop.xlane.xlu2 %3265 }
 0x372   : > { %v3544_v52 = vmul.f32 %v7897_v13, %v7854_v8  ;;  %v2517_v21 = vpop.xlane.xlu1 %2516  ;;  %v3356_v48 = vadd.f32 %v7795_v22, %v3266_v34  ;;  %v4039_v34 = vperm.slane %v7885_v26, 6  ;;  %vm3549_vm8 = vweird.f32 %v7897_v13 }
 0x373   : > { %v2619_v39 = vmul.f32 0.03125, %v2517_v21  ;;  %v4038_v21 = vperm.slane %v7885_v26, 5  ;;  %vm7940_vm10 = vmor %vm3548_vm9, %vm3549_vm8 }
 0x374   : > { %v3545_v17 = vsub.f32 1.0, %v3544_v52  ;;  %v5057_v36 = vmul.f32 -1.442695, %v3356_v48 }
 0x375   : > { %v2526_v37 = vpop.xlane.xlu0 %2525  ;;  %v2683_v51 = vsub.f32 %v2619_v39, %v2651_v27  ;;  %v4040_v27 = vperm.slane %v7885_v26, 7  ;;  %v7957_v26 = vmul.f32 0.03125, %v7778_v55  ;;  %v3555_v39 = vor.u32 1.1754944e-38, %v3554_v43 }
 0x376   : > { %v7923_v5 = vld [vmem:[#allocation1] sm:$0xff]  ;;  %v3546_v32 = vmul.f32 %v7897_v13, %v3545_v17  ;;  %v2622_v52 = vmul.f32 0.03125, %v2526_v37  ;;  %5319 = vpow2.f32 %v5057_v36  ;;  %v3552_v37 = vand.u32 2147483647, %v7854_v8 }
 0x377   : > { %9439 = vst [vmem:[#allocation25_spill] sm:$0xff] %v7923_v5  ;;  %v3166_v5 = vadd.f32 %v7454_v60, %v3132_v45  ;;  %v7935_v40 = vadd.f32 1e-05, %v2683_v51  ;;  %v7946_v60 = vsel %vm618_vm0, %v2475_v24, 0.0  ;;  %v7949_v36 = vsel %vm618_vm0, %v2477_v31, 0.0 }
 0x378   : > { %4297 = vst [vmem:[#allocation1] ss:$9 sm:$0xff] %v4033_v14  ;;  %v3547_v10 = vadd.f32 %v7897_v13, %v3546_v32  ;;  %v2686_v14 = vsub.f32 %v2622_v52, %v2654_v16  ;;  %v7952_v45 = vsel %vm618_vm0, %v2478_v58, 0.0  ;;  %v2652_v8 = vmul.f32 %v7908_v12, %v7908_v12 }
 0x379   : > { %4298 = vst [vmem:[#allocation1 + $0x1] ss:$9 sm:$0xff] %v4034_v19  ;;  %v3198_v11 = vmax.f32 %v3166_v5, 0.0  ;;  %5321 = vrsqrt.f32 %v7935_v40  ;;  %v3269_v17 = vpop.xlane.xlu2 %3268  ;;  %v7971_v55 = vmul.f32 %v7916_v35, %v7916_v35  ;;  %vm3553_vm11 = vcmp.eq.f32.partialorder %v3552_v37, 8.507059e+37 }
 0x37a   : > { %4299 = vst [vmem:[#allocation1 + $0x2] ss:$9 sm:$0xff] %v4035_v63  ;;  %v3551_v16 = vsel %vm7940_vm10, %v7897_v13, %v3547_v10  ;;  %v2520_v63 = vpop.xlane.xlu1 %2519  ;;  %v7967_v48 = vadd.f32 1e-05, %v2686_v14  ;;  %v7974_v10 = vmul.f32 0.03125, %v7782_v57  ;;  %v2656_v51 = vmul.f32 %v7957_v26, %v7957_v26 }
 0x37b   : > { %4300 = vst [vmem:[#allocation1 + $0x3] ss:$9 sm:$0xff] %v4036_v1  ;;  %v3234_v24 = vmul.f32 %v7483_v7, %v3198_v11  ;;  %v7977_v7 = vmul.f32 0.03125, %v7786_v42  ;;  %v7981_v43 = vsel %vm3553_vm11, %v3555_v39, %v3551_v16  ;;  %v2620_v32 = vmul.f32 0.03125, %v2520_v63 }
 0x37c   : > { %4301 = vst [vmem:[#allocation1 + $0x4] ss:$9 sm:$0xff] %v4037_v50  ;;  %v5320_v5 = vpop.eup %5319  ;;  %v3357_v42 = vadd.f32 %v7795_v22, %v3269_v17  ;;  %v7994_v14 = vmul.f32 0.03125, %v7791_v3  ;;  %5323 = vrsqrt.f32 %v7967_v48  ;;  %v7999_v37 = vmul.f32 %v7974_v10, %v7974_v10 }
 0x37d   : > { %9442 = vst [vmem:[#allocation26_spill] sm:$0xff] %v7952_v45  ;;  %v2532_v13 = vpop.xlane.xlu0 %2531  ;;  %v3288_v50 = vsel %vm618_vm0, %v3234_v24, 0.0  ;;  %v7986_v57 = vadd.f32 1.0, %v5320_v5  ;;  %v8003_v11 = vmul.f32 %v7977_v7, %v7977_v7  ;;  %v4041_v19 = vperm.slane %v7981_v43, 0 }
 0x37e   : > { %4302 = vst [vmem:[#allocation1 + $0x5] ss:$9 sm:$0xff] %v4038_v21  ;;  %3289 = vadd.xlane.f32.xlu0 %v3288_v50  ;;  %v2624_v52 = vmul.f32 0.03125, %v2532_v13  ;;  %v8008_v16 = vmul.f32 0.03125, %v7822_v49  ;;  %v4042_v3 = vperm.slane %v7981_v43, 1  ;;  %v4043_v63 = vperm.slane %v7981_v43, 2 }
 0x37f   : > { %4303 = vst [vmem:[#allocation1 + $0x6] ss:$9 sm:$0xff] %v4039_v34  ;;  %v7989_v21 = vpop.eup %5321  ;;  %5325 = vrcp.f32 %v7986_v57  ;;  %v8017_v17 = vmul.f32 0.03125, %v7847_v6  ;;  %v5058_v39 = vmul.f32 -1.442695, %v3357_v42  ;;  %v4046_v42 = vperm.slane %v7981_v43, 5 }
 0x380   : > { %9443 = vst [vmem:[#allocation27_spill] sm:$0xff] %v7974_v10  ;;  %v2688_v13 = vsub.f32 %v2624_v52, %v2656_v51  ;;  %v4045_v51 = vperm.slane %v7981_v43, 4  ;;  %v8039_v6 = vmul.f32 %v8008_v16, %v8008_v16  ;;  %v4047_v53 = vperm.slane %v7981_v43, 6 }
 0x381   : > { %4304 = vst [vmem:[#allocation1 + $0x7] ss:$9 sm:$0xff] %v4040_v27  ;;  %v2684_v27 = vsub.f32 %v2620_v32, %v2652_v8  ;;  %v2888_v8 = vmul.f32 %v7989_v21, %v7935_v40  ;;  %v3272_v50 = vpop.xlane.xlu2 %3271  ;;  %v8023_v32 = vmul.f32 %v7994_v14, %v7994_v14  ;;  %vm3563_vm13 = vweird.f32 %v7986_v57 }
 0x382   : > { %9444 = vst [vmem:[#allocation28_spill] sm:$0xff] %v7994_v14  ;;  %v2523_v5 = vpop.xlane.xlu1 %2522  ;;  %v8033_v49 = vpop.eup %5323  ;;  %v3358_v58 = vadd.f32 %v7795_v22, %v3272_v50  ;;  %vm2894_vm1 = vweird.f32 %v7989_v21  ;;  %vm2893_vm2 = vweird.f32 %v7935_v40  ;;  %vm2923_vm4 = vweird.f32 %v7967_v48 }
 0x383   : > { %9445 = vst [vmem:[#allocation29_spill] sm:$0xff] %v7999_v37  ;;  %v8013_v24 = vadd.f32 1e-05, %v2684_v27  ;;  %v4044_v27 = vperm.slane %v7981_v43, 3  ;;  %v2889_v34 = vmul.f32 %v7989_v21, %v2888_v8  ;;  %v2621_v31 = vmul.f32 0.03125, %v2523_v5 }
 0x384   : > { %9446 = vst [vmem:[#allocation30_spill] sm:$0xff] %v8008_v16  ;;  %v8048_v8 = vmul.f32 0.03125, %v7831_v33  ;;  %v8052_v5 = vmul.f32 0.03125, %v7845_v62  ;;  %vm2924_vm3 = vweird.f32 %v8033_v49 }
 0x385   : > { %9447 = vst [vmem:[#allocation31_spill] sm:$0xff] %v8023_v32  ;;  %5327 = vrsqrt.f32 %v8013_v24  ;;  %v2538_v52 = vpop.xlane.xlu0 %2537  ;;  %v5326_v15 = vpop.eup %5325  ;;  %v2890_v33 = vmul.f32 0.5, %v2889_v34  ;;  %vm2903_vm7 = vweird.f32 %v8013_v24 }
 0x386   : > { %5329 = vpow2.f32 %v5058_v39  ;;  %2558 = vadd.xlane.f32.xlu0 %v7895_v56  ;;  %v4048_v39 = vperm.slane %v7981_v43, 7  ;;  %v3559_v50 = vmul.f32 %v5326_v15, %v7986_v57  ;;  %v3569_v43 = vand.u32 2147483648, %v7986_v57 }
 0x387   : > { %vm3564_vm12 = vweird.f32 %v5326_v15 }
 0x388   : > { %v8025_v1 = vld [vmem:[#allocation1] sm:$0xff]  ;;  %v3560_v47 = vsub.f32 1.0, %v3559_v50  ;;  %v8090_v50 = vmul.f32 %v8052_v5, %v8052_v5  ;;  %vm3565_vm14 = vmor %vm3563_vm13, %vm3564_vm12 }
 0x389   : > { %9448 = vst [vmem:[#allocation32_spill] sm:$0xff] %v8025_v1  ;;  %v2626_v1 = vmul.f32 0.03125, %v2538_v52  ;;  %v2918_v52 = vmul.f32 %v8033_v49, %v7967_v48  ;;  %vm8175_vm12 = vmor %vm2893_vm2, %vm2894_vm1 }
 0x38a   : > { %4306 = vst [vmem:[#allocation1] ss:$9 sm:$0xff] %v4041_v19  ;;  %v2653_v19 = vmul.f32 %v8017_v17, %v8017_v17 }
 0x38b   : > { %4307 = vst [vmem:[#allocation1 + $0x1] ss:$9 sm:$0xff] %v4042_v3  ;;  %v8045_v3 = vadd.f32 1e-05, %v2688_v13  ;;  %v5059_v13 = vmul.f32 -1.442695, %v3358_v58  ;;  %v8058_v14 = vpop.eup %5327  ;;  %v2690_v62 = vsub.f32 %v2626_v1, %v8003_v11  ;;  %v3561_v58 = vmul.f32 %v5326_v15, %v3560_v47  ;;  %v8073_v1 = vpop.xlane.xlu1 %2421 }
 0x38c   : > { %4308 = vst [vmem:[#allocation1 + $0x2] ss:$9 sm:$0xff] %v4043_v63  ;;  %v3567_v63 = vand.u32 2147483647, %v7986_v57  ;;  %v2685_v56 = vsub.f32 %v2621_v31, %v2653_v19  ;;  %v8067_v31 = vpop.xlane.xlu2 %2528  ;;  %v2919_v19 = vmul.f32 %v8033_v49, %v2918_v52  ;;  %v8084_v47 = vmul.f32 0.03125, %v7860_v23 }
 0x38d   : > { %4309 = vst [vmem:[#allocation1 + $0x3] ss:$9 sm:$0xff] %v4044_v27  ;;  %v5330_v27 = vpop.eup %5329  ;;  %5331 = vrsqrt.f32 %v8045_v3  ;;  %v3570_v52 = vor.u32 1.1754944e-38, %v3569_v43  ;;  %v2891_v23 = vsub.f32 1.5, %v2890_v33  ;;  %vm2904_vm5 = vweird.f32 %v8058_v14 }
 0x38e   : > { %4310 = vst [vmem:[#allocation1 + $0x4] ss:$9 sm:$0xff] %v4045_v51  ;;  %v2898_v51 = vmul.f32 %v8058_v14, %v8013_v24  ;;  %v8065_v28 = vadd.f32 1e-05, %v2685_v56  ;;  %v8069_v34 = vadd.f32 1.0, %v5330_v27  ;;  %5333 = vpow2.f32 %v5059_v13  ;;  %2564 = vadd.xlane.f32.xlu0 %v7946_v60 }
 0x38f   : > { %4311 = vst [vmem:[#allocation1 + $0x5] ss:$9 sm:$0xff] %v4046_v42  ;;  %v8071_v42 = vadd.f32 1e-05, %v2690_v62  ;;  %v8093_v56 = vmul.f32 0.03125, %v7862_v0  ;;  %vm3568_vm15 = vcmp.eq.f32.partialorder %v3567_v63, 8.507059e+37  ;;  %v8107_v60 = vmul.f32 %v8084_v47, %v8084_v47 }
 0x390   : > { %4312 = vst [vmem:[#allocation1 + $0x6] ss:$9 sm:$0xff] %v4047_v53  ;;  %v8077_v53 = vmul.f32 %v8048_v8, %v8048_v8  ;;  %5335 = vrsqrt.f32 %v8065_v28  ;;  %v2899_v62 = vmul.f32 %v8058_v14, %v2898_v51  ;;  %v2920_v11 = vmul.f32 0.5, %v2919_v19 }
 0x391   : > { %4313 = vst [vmem:[#allocation1 + $0x7] ss:$9 sm:$0xff] %v4048_v39  ;;  %v3562_v39 = vadd.f32 %v5326_v15, %v3561_v58  ;;  %5337 = vrcp.f32 %v8069_v34  ;;  %v8117_v0 = vmul.f32 %v8093_v56, %v8093_v56  ;;  %v8121_v10 = vmul.f32 %v7989_v21, %v2891_v23 }
 0x392   : > { %9449 = vst [vmem:[#allocation33_spill] sm:$0xff] %v8093_v56  ;;  %5339 = vrsqrt.f32 %v8071_v42  ;;  %v2900_v61 = vmul.f32 0.5, %v2899_v62  ;;  %v2921_v32 = vsub.f32 1.5, %v2920_v11  ;;  %v2623_v11 = vmul.f32 0.03125, %v8067_v31 }
 0x393   : > { %v3566_v13 = vsel %vm3565_vm14, %v5326_v15, %v3562_v39  ;;  %v8099_v57 = vpop.eup %5331  ;;  %v3275_v16 = vpop.xlane.xlu1 %3274  ;;  %vm3578_vm8 = vweird.f32 %v8069_v34  ;;  %v2896_v40 = vsel %vm8175_vm12, %v7989_v21, %v8121_v10  ;;  %vm8207_vm14 = vmor %vm2923_vm4, %vm2924_vm3 }
 0x394   : > { %v3571_v58 = vsel %vm3568_vm15, %v3570_v52, %v3566_v13  ;;  %v5334_v63 = vpop.eup %5333  ;;  %v2535_v52 = vpop.xlane.xlu2 %2534  ;;  %v2687_v31 = vsub.f32 %v2623_v11, %v8107_v60  ;;  %vm8221_vm15 = vmor %vm2903_vm7, %vm2904_vm5  ;;  %vm2944_vm4 = vweird.f32 %v8099_v57  ;;  %vm2963_vm5 = vweird.f32 %v8071_v42 }
 0x395   : > { %v4049_v15 = vperm.slane %v3571_v58, 0  ;;  %v4050_v33 = vperm.slane %v3571_v58, 1  ;;  %v4051_v43 = vperm.slane %v3571_v58, 2  ;;  %v4052_v19 = vperm.slane %v3571_v58, 3 }
 0x396   : > { %v8109_v51 = vpop.eup %5335  ;;  %v4053_v35 = vperm.slane %v3571_v58, 4  ;;  %v4054_v27 = vperm.slane %v3571_v58, 5  ;;  %v8127_v2 = vadd.f32 1.0, %v5334_v63  ;;  %v4055_v54 = vperm.slane %v3571_v58, 6  ;;  %2570 = vadd.xlane.f32.xlu0 %v7949_v36 }
 0x397   : > { %v5338_v13 = vpop.eup %5337  ;;  %v4056_v23 = vperm.slane %v3571_v58, 7  ;;  %v2908_v62 = vmul.f32 %v8109_v51, %v8065_v28  ;;  %v2625_v63 = vmul.f32 0.03125, %v2535_v52  ;;  %v2901_v58 = vsub.f32 1.5, %v2900_v61 }
 0x398   : > { %v8111_v39 = vld [vmem:[#allocation1] sm:$0xff]  ;;  %v3574_v59 = vmul.f32 %v5338_v13, %v8069_v34  ;;  %v8129_v56 = vpop.eup %5339  ;;  %5341 = vrcp.f32 %v8127_v2  ;;  %vm3579_vm6 = vweird.f32 %v5338_v13  ;;  %vm3593_vm11 = vweird.f32 %v8127_v2 }
 0x399   : > { %9450 = vst [vmem:[#allocation34_spill] sm:$0xff] %v8111_v39  ;;  %v2938_v39 = vmul.f32 %v8099_v57, %v8045_v3  ;;  %v2958_v37 = vmul.f32 %v8129_v56, %v8071_v42  ;;  %v8159_v52 = vmul.f32 %v8058_v14, %v2901_v58  ;;  %vm3580_vm10 = vmor %vm3578_vm8, %vm3579_vm6  ;;  %v3597_v60 = vand.u32 2147483647, %v8127_v2  ;;  %v9486_v42 = vld [vmem:[#allocation29_spill] sm:$0xff] }
 0x39a   : > { %4315 = vst [vmem:[#allocation1] ss:$9 sm:$0xff] %v4049_v15  ;;  %v3582_v15 = vand.u32 2147483647, %v8069_v34  ;;  %v3599_v61 = vand.u32 2147483648, %v8127_v2  ;;  %vm2964_vm3 = vweird.f32 %v8129_v56  ;;  %vm2914_vm6 = vweird.f32 %v8109_v51 }
 0x39b   : > { %4316 = vst [vmem:[#allocation1 + $0x1] ss:$9 sm:$0xff] %v4050_v33  ;;  %v3575_v33 = vsub.f32 1.0, %v3574_v59  ;;  %v2939_v45 = vmul.f32 %v8099_v57, %v2938_v39  ;;  %v2959_v36 = vmul.f32 %v8129_v56, %v2958_v37  ;;  %vm3598_vm2 = vcmp.eq.f32.partialorder %v3597_v60, 8.507059e+37  ;;  %vm8308_vm8 = vmor %vm2963_vm5, %vm2964_vm3 }
 0x39c   : > { %4317 = vst [vmem:[#allocation1 + $0x2] ss:$9 sm:$0xff] %v4051_v43  ;;  %v3584_v43 = vand.u32 2147483648, %v8069_v34  ;;  %vm8149_vm9 = vcmp.eq.f32.partialorder %v3582_v15, 8.507059e+37  ;;  %v2541_v39 = vpop.xlane.xlu2 %2540  ;;  %vm2943_vm7 = vweird.f32 %v8045_v3 }
 0x39d   : > { %4318 = vst [vmem:[#allocation1 + $0x3] ss:$9 sm:$0xff] %v4052_v19  ;;  %v8143_v19 = vmul.f32 %v8033_v49, %v2921_v32  ;;  %v3576_v59 = vmul.f32 %v5338_v13, %v3575_v33  ;;  %v8161_v15 = vmul.f32 0.5, %v2939_v45  ;;  %v8163_v33 = vmul.f32 0.5, %v2959_v36 }
 0x39e   : > { %4319 = vst [vmem:[#allocation1 + $0x4] ss:$9 sm:$0xff] %v4053_v35  ;;  %v2909_v35 = vmul.f32 %v8109_v51, %v2908_v62  ;;  %v3585_v34 = vor.u32 1.1754944e-38, %v3584_v43  ;;  %v8165_v62 = vpop.eup %5341  ;;  %v2627_v11 = vmul.f32 0.03125, %v2541_v39  ;;  %v9458_v39 = vsub.f32 %v7524_v4, %v7883_v30  ;;  %v8231_v4 = vld [vmem:[%s9298_s4 + $0x1] ss:$0 sm:$0xff] }
 0x39f   : > { %4320 = vst [vmem:[#allocation1 + $0x5] ss:$9 sm:$0xff] %v4054_v27  ;;  %v3577_v32 = vadd.f32 %v5338_v13, %v3576_v59  ;;  %v2689_v27 = vsub.f32 %v2625_v63, %v8077_v53  ;;  %v8169_v53 = vadd.f32 1e-05, %v2687_v31  ;;  %vm3594_vm13 = vweird.f32 %v8165_v62 }
 0x3a0   : > { %4321 = vst [vmem:[#allocation1 + $0x6] ss:$9 sm:$0xff] %v4055_v54  ;;  %v3359_v54 = vadd.f32 %v7795_v22, %v3275_v16  ;;  %v8188_v58 = vmul.f32 0.5, %v2909_v35  ;;  %v2961_v36 = vsub.f32 1.5, %v8163_v33  ;;  %v2691_v33 = vsub.f32 %v2627_v11, %v8090_v50  ;;  %vm8254_vm1 = vmor %vm3593_vm11, %vm3594_vm13 }
 0x3a1   : > { %4322 = vst [vmem:[#allocation1 + $0x7] ss:$9 sm:$0xff] %v4056_v23  ;;  %v3581_v37 = vsel %vm3580_vm10, %v5338_v13, %v3577_v32  ;;  %v3589_v13 = vmul.f32 %v8165_v62, %v8127_v2  ;;  %v8185_v23 = vadd.f32 1e-05, %v2689_v27  ;;  %v3278_v32 = vpop.xlane.xlu1 %3277  ;;  %5343 = vrsqrt.f32 %v8169_v53 }
 0x3a2   : > { %v8181_v45 = vsel %vm8149_vm9, %v3585_v34, %v3581_v37  ;;  %v5060_v43 = vmul.f32 -1.442695, %v3359_v54  ;;  %v3099_v34 = vmul.f32 %v2896_v40, %v9458_v39  ;;  %v8234_v24 = vadd.f32 1e-05, %v2691_v33 }
 0x3a3   : > { %v4057_v63 = vperm.slane %v8181_v45, 0  ;;  %v4058_v59 = vperm.slane %v8181_v45, 1  ;;  %v4059_v31 = vperm.slane %v8181_v45, 2  ;;  %v4060_v35 = vperm.slane %v8181_v45, 3 }
 0x3a4   : > { %v3590_v27 = vsub.f32 1.0, %v3589_v13  ;;  %v4061_v21 = vperm.slane %v8181_v45, 4  ;;  %5345 = vrsqrt.f32 %v8185_v23  ;;  %v4062_v37 = vperm.slane %v8181_v45, 5 }
 0x3a5   : > { %5347 = vpow2.f32 %v5060_v43  ;;  %v3360_v13 = vadd.f32 %v7795_v22, %v3278_v32  ;;  %v3133_v30 = vmul.f32 %v8231_v4, %v3099_v34  ;;  %v2926_v50 = vsel %vm8207_vm14, %v8033_v49, %v8143_v19  ;;  %v8264_v19 = vld [vmem:[%s9298_s4 + $0x2] ss:$0 sm:$0xff]  ;;  %vm8375_vm14 = vmor %vm2943_vm7, %vm2944_vm4 }
 0x3a6   : > { %v3591_v16 = vmul.f32 %v8165_v62, %v3590_v27  ;;  %v2906_v11 = vsel %vm8221_vm15, %v8058_v14, %v8159_v52  ;;  %v4064_v27 = vperm.slane %v8181_v45, 7  ;;  %v8259_v14 = vmul.f32 0.03125, %v8073_v1 }
 0x3a7   : > { %v5061_v40 = vmul.f32 -1.442695, %v3360_v13  ;;  %5349 = vrsqrt.f32 %v8234_v24  ;;  %v2941_v52 = vsub.f32 1.5, %v8161_v15  ;;  %v9464_v1 = vsub.f32 %v7398_v29, %v7908_v12 }
 0x3a8   : > { %v8201_v54 = vld [vmem:[#allocation1] sm:$0xff]  ;;  %v3592_v43 = vadd.f32 %v8165_v62, %v3591_v16  ;;  %v3600_v39 = vor.u32 1.1754944e-38, %v3599_v61  ;;  %v8286_v29 = vmul.f32 %v8129_v56, %v2961_v36  ;;  %v8314_v13 = vmul.f32 %v8259_v14, %v8259_v14 }
 0x3a9   : > { %9455 = vst [vmem:[#allocation35_spill] sm:$0xff] %v8201_v54  ;;  %5351 = vpow2.f32 %v5061_v40  ;;  %v3281_v48 = vpop.xlane.xlu1 %3280  ;;  %v8303_v16 = vmul.f32 %v8099_v57, %v2941_v52  ;;  %vm2913_vm9 = vweird.f32 %v8065_v28  ;;  %vm2933_vm11 = vweird.f32 %v8169_v53 }
 0x3aa   : > { %4324 = vst [vmem:[#allocation1] ss:$9 sm:$0xff] %v4057_v63  ;;  %v4063_v63 = vperm.slane %v8181_v45, 6  ;;  %v3596_v45 = vsel %vm8254_vm1, %v8165_v62, %v3592_v43  ;;  %v2911_v62 = vsub.f32 1.5, %v8188_v58  ;;  %vm8386_vm15 = vmor %vm2913_vm9, %vm2914_vm6  ;;  %vm2973_vm6 = vweird.f32 %v8234_v24 }
 0x3ab   : > { %4325 = vst [vmem:[#allocation1 + $0x1] ss:$9 sm:$0xff] %v4058_v59  ;;  %v9461_v59 = vsub.f32 %v7409_v38, %v7879_v18  ;;  %v3167_v38 = vadd.f32 %v8264_v19, %v3133_v30  ;;  %v8268_v18 = vpop.eup %5343  ;;  %v8290_v12 = vsel %vm3598_vm2, %v3600_v39, %v3596_v45  ;;  %v8319_v30 = vld [vmem:[%s9299_s5] ss:$0 sm:$0xff]  ;;  %v2946_v28 = vsel %vm8375_vm14, %v8099_v57, %v8303_v16 }
 0x3ac   : > { %4326 = vst [vmem:[#allocation1 + $0x2] ss:$9 sm:$0xff] %v4059_v31  ;;  %v3100_v31 = vmul.f32 %v2906_v11, %v9464_v1  ;;  %v8277_v10 = vpop.eup %5345  ;;  %v2928_v34 = vmul.f32 %v8268_v18, %v8169_v53  ;;  %v8324_v43 = vmul.f32 %v8109_v51, %v2911_v62  ;;  %v4065_v40 = vperm.slane %v8290_v12, 0 }
 0x3ad   : > { %v3102_v32 = vmul.f32 %v2926_v50, %v9461_v59  ;;  %4327 = vst [vmem:[#allocation1 + $0x3] ss:$9 sm:$0xff] %v4060_v35  ;;  %v2547_v35 = vpop.xlane.xlu2 %2546  ;;  %v5348_v33 = vpop.eup %5347  ;;  %v2948_v2 = vmul.f32 %v8277_v10, %v8185_v23  ;;  %v4067_v52 = vperm.slane %v8290_v12, 2  ;;  %vm2934_vm10 = vweird.f32 %v8268_v18 }
 0x3ae   : > { %4328 = vst [vmem:[#allocation1 + $0x4] ss:$9 sm:$0xff] %v4061_v21  ;;  %v3199_v21 = vmax.f32 %v3167_v38, 0.0  ;;  %v2629_v61 = vmul.f32 0.03125, %v2547_v35  ;;  %v2929_v58 = vmul.f32 %v8268_v18, %v2928_v34  ;;  %v8297_v60 = vadd.f32 1.0, %v5348_v33  ;;  %vm8419_vm3 = vmor %vm2933_vm11, %vm2934_vm10 }
 0x3af   : > { %4329 = vst [vmem:[#allocation1 + $0x5] ss:$9 sm:$0xff] %v4062_v37  ;;  %v3136_v15 = vmul.f32 %v8231_v4, %v3102_v32  ;;  %v3134_v36 = vmul.f32 %v8231_v4, %v3100_v31  ;;  %v8300_v37 = vpop.eup %5349  ;;  %v4066_v32 = vperm.slane %v8290_v12, 1  ;;  %v2949_v49 = vmul.f32 %v8277_v10, %v2948_v2 }
 0x3b0   : > { %4330 = vst [vmem:[#allocation1 + $0x6] ss:$9 sm:$0xff] %v4063_v63  ;;  %v3235_v50 = vmul.f32 %v8319_v30, %v3199_v21  ;;  %v5352_v63 = vpop.eup %5351  ;;  %5353 = vrcp.f32 %v8297_v60  ;;  %v2693_v31 = vsub.f32 %v2629_v61, %v8117_v0  ;;  %v4068_v35 = vperm.slane %v8290_v12, 3 }
 0x3b1   : > { %4331 = vst [vmem:[#allocation1 + $0x7] ss:$9 sm:$0xff] %v4064_v27  ;;  %v3170_v11 = vadd.f32 %v8264_v19, %v3136_v15  ;;  %v2930_v27 = vmul.f32 0.5, %v2929_v58  ;;  %v8338_v45 = vadd.f32 1.0, %v5352_v63  ;;  %v3168_v1 = vadd.f32 %v8264_v19, %v3134_v36 }
 0x3b2   : > { %v3291_v38 = vsel %vm618_vm0, %v3235_v50, 0.0  ;;  %v3612_v39 = vand.u32 2147483647, %v8297_v60  ;;  %v2968_v34 = vmul.f32 %v8300_v37, %v8234_v24  ;;  %v4069_v33 = vperm.slane %v8290_v12, 4 }
 0x3b3   : > { %3292 = vadd.xlane.f32.xlu2 %v3291_v38  ;;  %v3202_v21 = vmax.f32 %v3170_v11, 0.0  ;;  %v4070_v62 = vperm.slane %v8290_v12, 5  ;;  %v3614_v58 = vand.u32 2147483648, %v8297_v60  ;;  %5355 = vrcp.f32 %v8338_v45 }
 0x3b4   : > { %v4071_v0 = vperm.slane %v8290_v12, 6  ;;  %v2931_v61 = vsub.f32 1.5, %v2930_v27  ;;  %v8354_v2 = vmul.f32 0.5, %v2949_v49  ;;  %v4072_v11 = vperm.slane %v8290_v12, 7 }
 0x3b5   : > { %v3238_v36 = vmul.f32 %v8319_v30, %v3202_v21  ;;  %v3200_v63 = vmax.f32 %v3168_v1, 0.0  ;;  %v8360_v38 = vadd.f32 1e-05, %v2693_v31  ;;  %v3361_v59 = vadd.f32 %v7795_v22, %v3281_v48  ;;  %v2553_v49 = vpop.xlane.xlu2 %2552  ;;  %v2544_v1 = vpop.xlane.xlu1 %2543 }
 0x3b6   : > { %v8357_v50 = vpop.eup %5353  ;;  %vm3608_vm12 = vweird.f32 %v8297_v60  ;;  %vm8366_vm13 = vcmp.eq.f32.partialorder %v3612_v39, 8.507059e+37  ;;  %v2969_v27 = vmul.f32 %v8300_v37, %v2968_v34  ;;  %v3615_v48 = vor.u32 1.1754944e-38, %v3614_v58 }
 0x3b7   : > { %v3604_v54 = vmul.f32 %v8357_v50, %v8297_v60  ;;  %5357 = vrsqrt.f32 %v8360_v38  ;;  %v2932_v3 = vmul.f32 %v8268_v18, %v2931_v61  ;;  %v5062_v34 = vmul.f32 -1.442695, %v3361_v59 }
 0x3b8   : > { %v8346_v15 = vld [vmem:[#allocation1] sm:$0xff]  ;;  %v2631_v61 = vmul.f32 0.03125, %v2553_v49  ;;  %vm3609_vm1 = vweird.f32 %v8357_v50  ;;  %v2970_v59 = vmul.f32 0.5, %v2969_v27  ;;  %vm2974_vm2 = vweird.f32 %v8300_v37 }
 0x3b9   : > { %4333 = vst [vmem:[#allocation1] ss:$9 sm:$0xff] %v4065_v40  ;;  %v3605_v39 = vsub.f32 1.0, %v3604_v54  ;;  %v8392_v21 = vpop.eup %5355  ;;  %5359 = vpow2.f32 %v5062_v34  ;;  %v9473_v57 = vsub.f32 %v7426_v9, %v7957_v26  ;;  %vm3623_vm4 = vweird.f32 %v8338_v45  ;;  %vm3610_vm5 = vmor %vm3608_vm12, %vm3609_vm1 }
 0x3ba   : > { %4334 = vst [vmem:[#allocation1 + $0x1] ss:$9 sm:$0xff] %v4066_v32  ;;  %v3300_v32 = vsel %vm618_vm0, %v3238_v36, 0.0  ;;  %v3627_v9 = vand.u32 2147483647, %v8338_v45  ;;  %vm2954_vm7 = vweird.f32 %v8277_v10  ;;  %v2936_v12 = vsel %vm8419_vm3, %v8268_v18, %v2932_v3 }
 0x3bb   : > { %4335 = vst [vmem:[#allocation1 + $0x2] ss:$9 sm:$0xff] %v4067_v52  ;;  %v3236_v52 = vmul.f32 %v8319_v30, %v3200_v63  ;;  %3301 = vadd.xlane.f32.xlu1 %v3300_v32  ;;  %v3606_v54 = vmul.f32 %v8357_v50, %v3605_v39  ;;  %v3104_v16 = vmul.f32 %v2946_v28, %v9473_v57  ;;  %vm3624_vm9 = vweird.f32 %v8392_v21 }
 0x3bc   : > { %4336 = vst [vmem:[#allocation1 + $0x3] ss:$9 sm:$0xff] %v4068_v35  ;;  %v2951_v35 = vsub.f32 1.5, %v8354_v2  ;;  %vm2953_vm10 = vweird.f32 %v8185_v23  ;;  %v2628_v34 = vmul.f32 0.03125, %v2544_v1  ;;  %v9477_v3 = vsub.f32 %v7647_v25, %v8084_v47  ;;  %vm3625_vm11 = vmor %vm3623_vm4, %vm3624_vm9 }
 0x3bd   : > { %4337 = vst [vmem:[#allocation1 + $0x4] ss:$9 sm:$0xff] %v4069_v33  ;;  %v3294_v58 = vsel %vm618_vm0, %v3236_v52, 0.0  ;;  %v2916_v33 = vsel %vm8386_vm15, %v8109_v51, %v8324_v43  ;;  %v9474_v51 = vsub.f32 %v7608_v41, %v8017_v17  ;;  %v8426_v26 = vpop.eup %5357  ;;  %v3629_v41 = vand.u32 2147483648, %v8338_v45  ;;  %vm8514_vm14 = vmor %vm2953_vm10, %vm2954_vm7 }
 0x3be   : > { %4338 = vst [vmem:[#allocation1 + $0x5] ss:$9 sm:$0xff] %v4070_v62  ;;  %v3619_v62 = vmul.f32 %v8392_v21, %v8338_v45  ;;  %3295 = vadd.xlane.f32.xlu2 %v3294_v58  ;;  %v2988_v60 = vmul.f32 %v8426_v26, %v8360_v38  ;;  %v2971_v52 = vsub.f32 1.5, %v2970_v59  ;;  %v3103_v28 = vmul.f32 %v2936_v12, %v9477_v3 }
 0x3bf   : > { %4339 = vst [vmem:[#allocation1 + $0x6] ss:$9 sm:$0xff] %v4071_v0  ;;  %v3101_v43 = vmul.f32 %v2916_v33, %v9474_v51  ;;  %v2695_v0 = vsub.f32 %v2631_v61, %v7971_v55  ;;  %v3138_v55 = vmul.f32 %v8231_v4, %v3104_v16  ;;  %v5360_v58 = vpop.eup %5359  ;;  %v2550_v33 = vpop.xlane.xlu1 %2549  ;;  %vm3628_vm12 = vcmp.eq.f32.partialorder %v3627_v9, 8.507059e+37 }
 0x3c0   : > { %4340 = vst [vmem:[#allocation1 + $0x7] ss:$9 sm:$0xff] %v4072_v11  ;;  %v3607_v11 = vadd.f32 %v8357_v50, %v3606_v54  ;;  %v3620_v63 = vsub.f32 1.0, %v3619_v62  ;;  %v2989_v59 = vmul.f32 %v8426_v26, %v2988_v60  ;;  %v8466_v62 = vadd.f32 1.0, %v5360_v58 }
 0x3c1   : > { %v3135_v17 = vmul.f32 %v8231_v4, %v3101_v43  ;;  %v8436_v53 = vadd.f32 1e-05, %v2695_v0  ;;  %v3172_v31 = vadd.f32 %v8264_v19, %v3138_v55  ;;  %v8470_v16 = vmul.f32 %v8300_v37, %v2971_v52 }
 0x3c2   : > { %v3611_v27 = vsel %vm3610_vm5, %v8357_v50, %v3607_v11  ;;  %v3621_v49 = vmul.f32 %v8392_v21, %v3620_v63  ;;  %v3630_v25 = vor.u32 1.1754944e-38, %v3629_v41  ;;  %v2692_v45 = vsub.f32 %v2628_v34, %v8039_v6 }
 0x3c3   : > { %v8448_v32 = vsel %vm8366_vm13, %v3615_v48, %v3611_v27  ;;  %5361 = vrsqrt.f32 %v8436_v53  ;;  %v3169_v48 = vadd.f32 %v8264_v19, %v3135_v17  ;;  %v3204_v1 = vmax.f32 %v3172_v31, 0.0  ;;  %vm8494_vm13 = vmor %vm2973_vm6, %vm2974_vm2 }
 0x3c4   : > { %v4073_v50 = vperm.slane %v8448_v32, 0  ;;  %v4074_v39 = vperm.slane %v8448_v32, 1  ;;  %v4075_v18 = vperm.slane %v8448_v32, 2  ;;  %v4076_v40 = vperm.slane %v8448_v32, 3 }
 0x3c5   : > { %v3622_v54 = vadd.f32 %v8392_v21, %v3621_v49  ;;  %v4077_v57 = vperm.slane %v8448_v32, 4  ;;  %v4078_v47 = vperm.slane %v8448_v32, 5  ;;  %v4079_v51 = vperm.slane %v8448_v32, 6 }
 0x3c6   : > { %5363 = vrcp.f32 %v8466_v62  ;;  %v3240_v36 = vmul.f32 %v8319_v30, %v3204_v1  ;;  %v3201_v11 = vmax.f32 %v3169_v48, 0.0  ;;  %v2952_v9 = vmul.f32 %v8277_v10, %v2951_v35 }
 0x3c7   : > { %v8462_v61 = vld [vmem:[#allocation1] sm:$0xff]  ;;  %v3626_v43 = vsel %vm3625_vm11, %v8392_v21, %v3622_v54  ;;  %v4080_v41 = vperm.slane %v8448_v32, 7  ;;  %v2990_v55 = vmul.f32 0.5, %v2989_v59  ;;  %v3137_v6 = vmul.f32 %v8231_v4, %v3103_v28  ;;  %v2556_v54 = vpop.xlane.xlu1 %2555 }
 0x3c8   : > { %4342 = vst [vmem:[#allocation1] ss:$9 sm:$0xff] %v4073_v50  ;;  %v8480_v0 = vsel %vm3628_vm12, %v3630_v25, %v3626_v43  ;;  %v2976_v2 = vsel %vm8494_vm13, %v8300_v37, %v8470_v16  ;;  %v3642_v17 = vand.u32 2147483647, %v8466_v62  ;;  %v3644_v27 = vand.u32 2147483648, %v8466_v62 }
 0x3c9   : > { %4343 = vst [vmem:[#allocation1 + $0x1] ss:$9 sm:$0xff] %v4074_v39  ;;  %v8484_v63 = vpop.eup %5361  ;;  %v4081_v35 = vperm.slane %v8480_v0, 0  ;;  %v4082_v24 = vperm.slane %v8480_v0, 1  ;;  %v4083_v49 = vperm.slane %v8480_v0, 2  ;;  %v4084_v60 = vperm.slane %v8480_v0, 3 }
 0x3ca   : > { %4344 = vst [vmem:[#allocation1 + $0x2] ss:$9 sm:$0xff] %v4075_v18  ;;  %v3306_v12 = vsel %vm618_vm0, %v3240_v36, 0.0  ;;  %v4085_v32 = vperm.slane %v8480_v0, 4  ;;  %vm2994_vm15 = vweird.f32 %v8426_v26  ;;  %vm3638_vm1 = vweird.f32 %v8466_v62 }
 0x3cb   : > { %4345 = vst [vmem:[#allocation1 + $0x3] ss:$9 sm:$0xff] %v4076_v40  ;;  %3307 = vadd.xlane.f32.xlu1 %v3306_v12  ;;  %v3237_v52 = vmul.f32 %v8319_v30, %v3201_v11  ;;  %v3008_v31 = vmul.f32 %v8484_v63, %v8436_v53  ;;  %v8524_v50 = vadd.f32 1e-05, %v2692_v45  ;;  %v4086_v39 = vperm.slane %v8480_v0, 5 }
 0x3cc   : > { %4346 = vst [vmem:[#allocation1 + $0x4] ss:$9 sm:$0xff] %v4077_v57  ;;  %v8526_v23 = vpop.eup %5363  ;;  %v3171_v34 = vadd.f32 %v8264_v19, %v3137_v6  ;;  %v2630_v58 = vmul.f32 0.03125, %v2550_v33  ;;  %v2956_v18 = vsel %vm8514_vm14, %v8277_v10, %v2952_v9  ;;  %v4087_v40 = vperm.slane %v8480_v0, 6 }
 0x3cd   : > { %4347 = vst [vmem:[#allocation1 + $0x5] ss:$9 sm:$0xff] %v4078_v47  ;;  %vm2993_vm2 = vweird.f32 %v8360_v38  ;;  %v3634_v48 = vmul.f32 %v8526_v23, %v8466_v62  ;;  %v3297_v3 = vsel %vm618_vm0, %v3237_v52, 0.0  ;;  %v3009_v28 = vmul.f32 %v8484_v63, %v3008_v31 }
 0x3ce   : > { %4348 = vst [vmem:[#allocation1 + $0x6] ss:$9 sm:$0xff] %v4079_v51  ;;  %v2991_v59 = vsub.f32 1.5, %v2990_v55  ;;  %vm3639_vm3 = vweird.f32 %v8526_v23  ;;  %3298 = vadd.xlane.f32.xlu2 %v3297_v3  ;;  %vm3013_vm4 = vweird.f32 %v8436_v53  ;;  %5365 = vrsqrt.f32 %v8524_v50  ;;  %vm8604_vm7 = vmor %vm2993_vm2, %vm2994_vm15  ;;  %v9495_v3 = vld [vmem:[#allocation16_spill] sm:$0xff] }
 0x3cf   : > { %4349 = vst [vmem:[#allocation1 + $0x7] ss:$9 sm:$0xff] %v4080_v41  ;;  %v3203_v10 = vmax.f32 %v3171_v34, 0.0  ;;  %v3635_v33 = vsub.f32 1.0, %v3634_v48  ;;  %v3010_v1 = vmul.f32 0.5, %v3009_v28  ;;  %v2694_v57 = vsub.f32 %v2630_v58, %v8314_v13  ;;  %vm8578_vm5 = vmor %vm3638_vm1, %vm3639_vm3 }
 0x3d0   : > { %v9482_v16 = vsub.f32 %v7574_v46, %v8048_v8  ;;  %v9483_v51 = vsub.f32 %v7476_v20, %v7977_v7  ;;  %v9484_v43 = vsel %vm8308_vm8, %v8129_v56, %v8286_v29  ;;  %v2632_v11 = vmul.f32 0.03125, %v2556_v54 }
 0x3d1   : > { %v3239_v47 = vmul.f32 %v8319_v30, %v3203_v10  ;;  %v9485_v45 = vsub.f32 %v7612_v44, %v8052_v5  ;;  %v3636_v9 = vmul.f32 %v8526_v23, %v3635_v33  ;;  %v3011_v46 = vsub.f32 1.5, %v3010_v1  ;;  %v2562_v10 = vpop.xlane.xlu1 %2561  ;;  %v9498_v33 = vld [vmem:[#allocation18_spill] sm:$0xff] }
 0x3d2   : > { %v3105_v25 = vmul.f32 %v2956_v18, %v9482_v16  ;;  %v3106_v36 = vmul.f32 %v9484_v43, %v9483_v51  ;;  %v8559_v8 = vadd.f32 1e-05, %v2694_v57  ;;  %v2696_v21 = vsub.f32 %v2632_v11, %v9486_v42  ;;  %v9493_v18 = vld [vmem:[#allocation13_spill] sm:$0xff] }
 0x3d3   : > { %v3107_v13 = vmul.f32 %v2976_v2, %v9485_v45  ;;  %v3303_v20 = vsel %vm618_vm0, %v3239_v47, 0.0  ;;  %v2992_v44 = vmul.f32 %v8426_v26, %v2991_v59  ;;  %v3637_v5 = vadd.f32 %v8526_v23, %v3636_v9  ;;  %v9499_v9 = vld [vmem:[#allocation31_spill] sm:$0xff] }
 0x3d4   : > { %v3139_v41 = vmul.f32 %v8231_v4, %v3105_v25  ;;  %v3140_v7 = vmul.f32 %v8231_v4, %v3106_v36  ;;  %vm3014_vm8 = vweird.f32 %v8484_v63  ;;  %3304 = vadd.xlane.f32.xlu0 %v3303_v20  ;;  %5367 = vrsqrt.f32 %v8559_v8  ;;  %v8572_v55 = vpop.eup %5365  ;;  %v3284_v25 = vpop.xlane.xlu0 %3283 }
 0x3d5   : > { %v3141_v56 = vmul.f32 %v8231_v4, %v3107_v13  ;;  %v8583_v2 = vmul.f32 %v8484_v63, %v3011_v46  ;;  %v8587_v52 = vadd.f32 1e-05, %v2696_v21  ;;  %vm3643_vm6 = vcmp.eq.f32.partialorder %v3642_v17, 8.507059e+37  ;;  %vm8624_vm9 = vmor %vm3013_vm4, %vm3014_vm8 }
 0x3d6   : > { %v8566_v29 = vld [vmem:[#allocation1] sm:$0xff]  ;;  %v3173_v12 = vadd.f32 %v8264_v19, %v3139_v41  ;;  %v3174_v37 = vadd.f32 %v8264_v19, %v3140_v7  ;;  %v3645_v31 = vor.u32 1.1754944e-38, %v3644_v27  ;;  %v2978_v34 = vmul.f32 %v8572_v55, %v8524_v50 }
 0x3d7   : > { %4351 = vst [vmem:[#allocation1] ss:$9 sm:$0xff] %v4081_v35  ;;  %v3641_v35 = vsel %vm8578_vm5, %v8526_v23, %v3637_v5  ;;  %v9491_v23 = vld [vmem:[#allocation26_spill] sm:$0xff]  ;;  %5369 = vrsqrt.f32 %v8587_v52  ;;  %v3175_v62 = vadd.f32 %v8264_v19, %v3141_v56  ;;  %v4088_v38 = vperm.slane %v8480_v0, 7 }
 0x3d8   : > { %4352 = vst [vmem:[#allocation1 + $0x1] ss:$9 sm:$0xff] %v4082_v24  ;;  %2573 = vadd.xlane.f32.xlu2 %v9491_v23  ;;  %v3205_v17 = vmax.f32 %v3173_v12, 0.0  ;;  %v3206_v58 = vmax.f32 %v3174_v37, 0.0  ;;  %v9492_v27 = vld [vmem:[#allocation30_spill] sm:$0xff]  ;;  %v8618_v54 = vsel %vm3643_vm6, %v3645_v31, %v3641_v35  ;;  %v2726_v1 = vsub.f32 %v9498_v33, %v8259_v14  ;;  %v9501_v24 = vld [vmem:[#allocation24_spill] sm:$0xff] }
 0x3d9   : > { %4353 = vst [vmem:[#allocation1 + $0x2] ss:$9 sm:$0xff] %v4083_v49  ;;  %v2724_v48 = vsub.f32 %v9493_v18, %v9492_v27  ;;  %v9494_v49 = vld [vmem:[#allocation33_spill] sm:$0xff]  ;;  %v3016_v53 = vsel %vm8624_vm9, %v8484_v63, %v8583_v2  ;;  %vm2983_vm10 = vweird.f32 %v8524_v50  ;;  %v2979_v16 = vmul.f32 %v8572_v55, %v2978_v34  ;;  %v9500_v34 = vld [vmem:[#allocation8_spill] sm:$0xff] }
 0x3da   : > { %v2725_v28 = vsub.f32 %v9495_v3, %v9494_v49  ;;  %4354 = vst [vmem:[#allocation1 + $0x3] ss:$9 sm:$0xff] %v4084_v60  ;;  %v2996_v60 = vsel %vm8604_vm7, %v8426_v26, %v2992_v44  ;;  %v8640_v57 = vpop.eup %5367  ;;  %vm2984_vm11 = vweird.f32 %v8572_v55  ;;  %v3242_v26 = vmul.f32 %v8319_v30, %v3206_v58 }
 0x3db   : > { %4355 = vst [vmem:[#allocation1 + $0x4] ss:$9 sm:$0xff] %v4085_v32  ;;  %v3241_v32 = vmul.f32 %v8319_v30, %v3205_v17  ;;  %v4089_v63 = vperm.slane %v8618_v54, 0  ;;  %v2998_v47 = vmul.f32 %v8640_v57, %v8559_v8  ;;  %vm3003_vm12 = vweird.f32 %v8559_v8  ;;  %vm2985_vm13 = vmor %vm2983_vm10, %vm2984_vm11 }
 0x3dc   : > { %4356 = vst [vmem:[#allocation1 + $0x5] ss:$9 sm:$0xff] %v4086_v39  ;;  %v3207_v39 = vmax.f32 %v3175_v62, 0.0  ;;  %v2634_v51 = vmul.f32 0.03125, %v2562_v10  ;;  %v2980_v43 = vmul.f32 0.5, %v2979_v16  ;;  %v3312_v11 = vsel %vm618_vm0, %v3242_v26, 0.0 }
 0x3dd   : > { %4357 = vst [vmem:[#allocation1 + $0x6] ss:$9 sm:$0xff] %v4087_v40  ;;  %v3309_v36 = vsel %vm618_vm0, %v3241_v32, 0.0  ;;  %v3109_v45 = vmul.f32 %v2996_v60, %v2725_v28  ;;  %v8656_v13 = vpop.eup %5369  ;;  %v2999_v0 = vmul.f32 %v8640_v57, %v2998_v47  ;;  %3313 = vadd.xlane.f32.xlu0 %v3312_v11  ;;  %v3362_v41 = vadd.f32 %v7795_v22, %v3284_v25  ;;  %v9503_v25 = vld [vmem:[#allocation27_spill] sm:$0xff]  ;;  %v2568_v11 = vpop.xlane.xlu1 %2567 }
 0x3de   : > { %4358 = vst [vmem:[#allocation1 + $0x7] ss:$9 sm:$0xff] %v4088_v38  ;;  %v3243_v40 = vmul.f32 %v8319_v30, %v3207_v39  ;;  %v2698_v46 = vsub.f32 %v2634_v51, %v9499_v9  ;;  %v4090_v20 = vperm.slane %v8618_v54, 1  ;;  %v2981_v7 = vsub.f32 1.5, %v2980_v43  ;;  %v9505_v9 = vld [vmem:[#allocation21_spill] sm:$0xff] }
 0x3df   : > { %v3018_v42 = vmul.f32 %v8656_v13, %v8587_v52  ;;  %v3143_v21 = vmul.f32 %v8231_v4, %v3109_v45  ;;  %v3000_v56 = vmul.f32 0.5, %v2999_v0  ;;  %v5063_v6 = vmul.f32 -1.442695, %v3362_v41 }
 0x3e0   : > { %3310 = vadd.xlane.f32.xlu2 %v3309_v36  ;;  %v3315_v44 = vsel %vm618_vm0, %v3243_v40, 0.0  ;;  %v8667_v5 = vadd.f32 1e-05, %v2698_v46  ;;  %v4091_v2 = vperm.slane %v8618_v54, 2  ;;  %v2982_v12 = vmul.f32 %v8572_v55, %v2981_v7  ;;  %v3287_v40 = vpop.xlane.xlu0 %3286 }
 0x3e1   : > { %v3019_v37 = vmul.f32 %v8656_v13, %v3018_v42  ;;  %3316 = vadd.xlane.f32.xlu1 %v3315_v44  ;;  %v3177_v35 = vadd.f32 %v8264_v19, %v3143_v21  ;;  %v3001_v31 = vsub.f32 1.5, %v3000_v56  ;;  %vm3004_vm14 = vweird.f32 %v8640_v57 }
 0x3e2   : > { %5371 = vrsqrt.f32 %v8667_v5  ;;  %v9502_v23 = vsub.f32 %v9500_v34, %v9501_v24  ;;  %v2986_v58 = vsel %vm2985_vm13, %v8572_v55, %v2982_v12  ;;  %v4092_v28 = vperm.slane %v8618_v54, 3  ;;  %vm3005_vm15 = vmor %vm3003_vm12, %vm3004_vm14  ;;  %v9507_v34 = vld [vmem:[#allocation14_spill] sm:$0xff] }
 0x3e3   : > { %v3020_v62 = vmul.f32 0.5, %v3019_v37  ;;  %v3209_v49 = vmax.f32 %v3177_v35, 0.0  ;;  %5373 = vpow2.f32 %v5063_v6  ;;  %v4093_v50 = vperm.slane %v8618_v54, 4 }
 0x3e4   : > { %v3111_v17 = vmul.f32 %v3016_v53, %v9502_v23  ;;  %v3002_v38 = vmul.f32 %v8640_v57, %v3001_v31  ;;  %v3108_v59 = vmul.f32 %v2986_v58, %v2724_v48  ;;  %v4094_v10 = vperm.slane %v8618_v54, 5  ;;  %v9506_v31 = vld [vmem:[#allocation28_spill] sm:$0xff] }
 0x3e5   : > { %v8683_v3 = vld [vmem:[#allocation1] sm:$0xff]  ;;  %v3021_v55 = vsub.f32 1.5, %v3020_v62  ;;  %vm3024_vm1 = vweird.f32 %v8656_v13  ;;  %v3245_v60 = vmul.f32 %v8319_v30, %v3209_v49  ;;  %v4095_v53 = vperm.slane %v8618_v54, 6 }
 0x3e6   : > { %4360 = vst [vmem:[#allocation1] ss:$9 sm:$0xff] %v4089_v63  ;;  %v3006_v16 = vsel %vm3005_vm15, %v8640_v57, %v3002_v38  ;;  %vm3023_vm2 = vweird.f32 %v8587_v52  ;;  %v3142_v27 = vmul.f32 %v8231_v4, %v3108_v59  ;;  %v3145_v48 = vmul.f32 %v8231_v4, %v3111_v17  ;;  %v9504_v63 = vld [vmem:[#allocation11_spill] sm:$0xff] }
 0x3e7   : > { %4361 = vst [vmem:[#allocation1 + $0x1] ss:$9 sm:$0xff] %v4090_v20  ;;  %v3022_v18 = vmul.f32 %v8656_v13, %v3021_v55  ;;  %v3321_v8 = vsel %vm618_vm0, %v3245_v60, 0.0  ;;  %v3110_v32 = vmul.f32 %v3006_v16, %v2726_v1  ;;  %v2728_v47 = vsub.f32 %v9504_v63, %v9503_v25  ;;  %vm3025_vm3 = vmor %vm3023_vm2, %vm3024_vm1 }
 0x3e8   : > { %4362 = vst [vmem:[#allocation1 + $0x2] ss:$9 sm:$0xff] %v4091_v2  ;;  %v5372_v26 = vpop.eup %5371  ;;  %v4096_v57 = vperm.slane %v8618_v54, 7  ;;  %3322 = vadd.xlane.f32.xlu0 %v3321_v8  ;;  %v3176_v52 = vadd.f32 %v8264_v19, %v3142_v27  ;;  %v3179_v45 = vadd.f32 %v8264_v19, %v3145_v48  ;;  %v8720_v46 = vmul.f32 0.03125, %v9505_v9 }
 0x3e9   : > { %4363 = vst [vmem:[#allocation1 + $0x3] ss:$9 sm:$0xff] %v4092_v28  ;;  %v5374_v39 = vpop.eup %5373  ;;  %v3026_v51 = vsel %vm3025_vm3, %v8656_v13, %v3022_v18  ;;  %v3038_v14 = vmul.f32 %v5372_v26, %v8667_v5  ;;  %v3144_v33 = vmul.f32 %v8231_v4, %v3110_v32  ;;  %v2636_v7 = vmul.f32 0.03125, %v2568_v11 }
 0x3ea   : > { %4364 = vst [vmem:[#allocation1 + $0x4] ss:$9 sm:$0xff] %v4093_v50  ;;  %v8715_v1 = vadd.f32 1.0, %v5374_v39  ;;  %v3208_v43 = vmax.f32 %v3176_v52, 0.0  ;;  %v3112_v54 = vmul.f32 %v3026_v51, %v2728_v47  ;;  %v3363_v42 = vadd.f32 %v7795_v22, %v3287_v40 }
 0x3eb   : > { %4365 = vst [vmem:[#allocation1 + $0x5] ss:$9 sm:$0xff] %v4094_v10  ;;  %v3039_v36 = vmul.f32 %v5372_v26, %v3038_v14  ;;  %v3178_v0 = vadd.f32 %v8264_v19, %v3144_v33  ;;  %vm3044_vm4 = vweird.f32 %v5372_v26  ;;  %v3211_v6 = vmax.f32 %v3179_v45, 0.0  ;;  %v9508_v45 = vld [vmem:[#allocation19_spill] sm:$0xff] }
 0x3ec   : > { %4366 = vst [vmem:[#allocation1 + $0x6] ss:$9 sm:$0xff] %v4095_v53  ;;  %5375 = vrcp.f32 %v8715_v1  ;;  %v3244_v41 = vmul.f32 %v8319_v30, %v3208_v43  ;;  %v3146_v21 = vmul.f32 %v8231_v4, %v3112_v54  ;;  %v2668_v2 = vmul.f32 %v8720_v46, %v8720_v46 }
 0x3ed   : > { %4367 = vst [vmem:[#allocation1 + $0x7] ss:$9 sm:$0xff] %v4096_v57  ;;  %v3040_v13 = vmul.f32 0.5, %v3039_v36  ;;  %v3210_v20 = vmax.f32 %v3178_v0, 0.0  ;;  %v5064_v37 = vmul.f32 -1.442695, %v3363_v42  ;;  %v2730_v24 = vsub.f32 %v9507_v34, %v9506_v31 }
 0x3ee   : > { %v3318_v44 = vsel %vm618_vm0, %v3244_v41, 0.0  ;;  %v3180_v35 = vadd.f32 %v8264_v19, %v3146_v21  ;;  %vm3043_vm8 = vweird.f32 %v8667_v5  ;;  %v2700_v58 = vsub.f32 %v2636_v7, %v2668_v2 }
 0x3ef   : > { %v3041_v56 = vsub.f32 1.5, %v3040_v13  ;;  %3319 = vadd.xlane.f32.xlu2 %v3318_v44  ;;  %v3246_v12 = vmul.f32 %v8319_v30, %v3210_v20  ;;  %vm3045_vm5 = vmor %vm3043_vm8, %vm3044_vm4  ;;  %5377 = vpow2.f32 %v5064_v37  ;;  %v3247_v38 = vmul.f32 %v8319_v30, %v3211_v6 }
 0x3f0   : > { %v3212_v49 = vmax.f32 %v3180_v35, 0.0  ;;  %v3659_v60 = vand.u32 2147483648, %v8715_v1  ;;  %v8739_v5 = vadd.f32 1e-05, %v2700_v58  ;;  %v3657_v18 = vand.u32 2147483647, %v8715_v1 }
 0x3f1   : > { %v3042_v23 = vmul.f32 %v5372_v26, %v3041_v56  ;;  %v3324_v62 = vsel %vm618_vm0, %v3246_v12, 0.0  ;;  %v3327_v8 = vsel %vm618_vm0, %v3247_v38, 0.0  ;;  %vm3653_vm7 = vweird.f32 %v8715_v1  ;;  %v3290_v57 = vpop.xlane.xlu0 %3289  ;;  %v9509_v58 = vld [vmem:[#allocation20_spill] sm:$0xff] }
 0x3f2   : > { %v5376_v17 = vpop.eup %5375  ;;  %3325 = vadd.xlane.f32.xlu1 %v3324_v62  ;;  %v3248_v59 = vmul.f32 %v8319_v30, %v3212_v49  ;;  %v3660_v63 = vor.u32 1.1754944e-38, %v3659_v60  ;;  %5379 = vrsqrt.f32 %v8739_v5  ;;  %vm3658_vm10 = vcmp.eq.f32.partialorder %v3657_v18, 8.507059e+37 }
 0x3f3   : > { %v3046_v28 = vsel %vm3045_vm5, %v5372_v26, %v3042_v23  ;;  %v3649_v50 = vmul.f32 %v5376_v17, %v8715_v1  ;;  %vm3654_vm6 = vweird.f32 %v5376_v17  ;;  %v3364_v51 = vadd.f32 %v7795_v22, %v3290_v57 }
 0x3f4   : > { %v3114_v10 = vmul.f32 %v3046_v28, %v2730_v24  ;;  %v3330_v53 = vsel %vm618_vm0, %v3248_v59, 0.0  ;;  %vm3655_vm9 = vmor %vm3653_vm7, %vm3654_vm6  ;;  %v8750_v43 = vld [vmem:[#allocation1] sm:$0xff]  ;;  %v8756_v0 = vmul.f32 0.03125, %v9508_v45  ;;  %v8768_v62 = vmul.f32 0.03125, %v9509_v58 }
 0x3f5   : > { %v3650_v55 = vsub.f32 1.0, %v3649_v50  ;;  %3331 = vadd.xlane.f32.xlu0 %v3330_v53  ;;  %v5378_v48 = vpop.eup %5377  ;;  %vm3063_vm1 = vweird.f32 %v8739_v5 }
 0x3f6   : > { %v3148_v16 = vmul.f32 %v8231_v4, %v3114_v10  ;;  %v3491_v25 = vadd.f32 1.0, %v5378_v48  ;;  %v2665_v42 = vmul.f32 %v8756_v0, %v8756_v0 }
 0x3f7   : > { %v3651_v27 = vmul.f32 %v5376_v17, %v3650_v55  ;;  %3328 = vadd.xlane.f32.xlu2 %v3327_v8 }
 0x3f8   : > { %v3182_v32 = vadd.f32 %v8264_v19, %v3148_v16  ;;  %5381 = vrcp.f32 %v3491_v25  ;;  %v8753_v11 = vpop.eup %5379  ;;  %v3674_v6 = vand.u32 2147483648, %v3491_v25  ;;  %v3672_v12 = vand.u32 2147483647, %v3491_v25 }
 0x3f9   : > { %v3652_v26 = vadd.f32 %v5376_v17, %v3651_v27  ;;  %v2559_v7 = vpop.xlane.xlu0 %2558  ;;  %v3058_v21 = vmul.f32 %v8753_v11, %v8739_v5  ;;  %vm3668_vm12 = vweird.f32 %v3491_v25  ;;  %v2667_v16 = vmul.f32 %v8768_v62, %v8768_v62  ;;  %v9513_v5 = vld [vmem:[#allocation9_spill] sm:$0xff] }
 0x3fa   : > { %v3214_v4 = vmax.f32 %v3182_v32, 0.0  ;;  %v2633_v44 = vmul.f32 0.03125, %v2559_v7  ;;  %v3675_v23 = vor.u32 1.1754944e-38, %v3674_v6  ;;  %vm3673_vm14 = vcmp.eq.f32.partialorder %v3672_v12, 8.507059e+37 }
 0x3fb   : > { %v3656_v47 = vsel %vm3655_vm9, %v5376_v17, %v3652_v26  ;;  %v3059_v31 = vmul.f32 %v8753_v11, %v3058_v21  ;;  %vm3064_vm15 = vweird.f32 %v8753_v11  ;;  %v2732_v7 = vsub.f32 %v9513_v5, %v8720_v46 }
 0x3fc   : > { %v3661_v52 = vsel %vm3658_vm10, %v3660_v63, %v3656_v47  ;;  %v3250_v39 = vmul.f32 %v8319_v30, %v3214_v4  ;;  %v5065_v30 = vmul.f32 -1.442695, %v3364_v51  ;;  %v2697_v37 = vsub.f32 %v2633_v44, %v2665_v42  ;;  %vm8789_vm3 = vmor %vm3063_vm1, %vm3064_vm15  ;;  %v9514_v44 = vld [vmem:[#allocation10_spill] sm:$0xff] }
 0x3fd   : > { %v4097_v14 = vperm.slane %v3661_v52, 0  ;;  %v4098_v19 = vperm.slane %v3661_v52, 1  ;;  %v4099_v33 = vperm.slane %v3661_v52, 2  ;;  %v4100_v1 = vperm.slane %v3661_v52, 3 }
 0x3fe   : > { %v4101_v54 = vperm.slane %v3661_v52, 4  ;;  %v3336_v36 = vsel %vm618_vm0, %v3250_v39, 0.0  ;;  %v4102_v40 = vperm.slane %v3661_v52, 5  ;;  %v5382_v9 = vpop.eup %5381  ;;  %v4103_v13 = vperm.slane %v3661_v52, 6 }
 0x3ff   : > { %4369 = vst [vmem:[#allocation1] ss:$9 sm:$0xff] %v4097_v14  ;;  %3337 = vadd.xlane.f32.xlu2 %v3336_v36  ;;  %v4104_v41 = vperm.slane %v3661_v52, 7  ;;  %v3664_v20 = vmul.f32 %v5382_v9, %v3491_v25  ;;  %5383 = vpow2.f32 %v5065_v30  ;;  %vm3669_vm11 = vweird.f32 %v5382_v9 }
 0x400   : > { %4370 = vst [vmem:[#allocation1 + $0x1] ss:$9 sm:$0xff] %v4098_v19  ;;  %v8763_v24 = vadd.f32 1e-05, %v2697_v37  ;;  %vm3670_vm13 = vmor %vm3668_vm12, %vm3669_vm11  ;;  %v3060_v38 = vmul.f32 0.5, %v3059_v31  ;;  %v9510_v19 = vld [vmem:[#allocation22_spill] sm:$0xff]  ;;  %v2729_v6 = vsub.f32 %v9514_v44, %v8756_v0 }
 0x401   : > { %4371 = vst [vmem:[#allocation1 + $0x2] ss:$9 sm:$0xff] %v4099_v33  ;;  %v3665_v56 = vsub.f32 1.0, %v3664_v20  ;;  %v2565_v50 = vpop.xlane.xlu0 %2564  ;;  %v8784_v33 = vmul.f32 0.03125, %v9510_v19 }
 0x402   : > { %4372 = vst [vmem:[#allocation1 + $0x3] ss:$9 sm:$0xff] %v4100_v1  ;;  %5385 = vrsqrt.f32 %v8763_v24  ;;  %v2635_v18 = vmul.f32 0.03125, %v2565_v50  ;;  %v3061_v32 = vsub.f32 1.5, %v3060_v38  ;;  %vm3033_vm6 = vweird.f32 %v8763_v24  ;;  %v8811_v38 = vld [vmem:[%s9298_s4 + $0x1] ss:$0 sm:$0xff] }
 0x403   : > { %4373 = vst [vmem:[#allocation1 + $0x4] ss:$9 sm:$0xff] %v4101_v54  ;;  %v3666_v2 = vmul.f32 %v5382_v9, %v3665_v56 }
 0x404   : > { %4374 = vst [vmem:[#allocation1 + $0x5] ss:$9 sm:$0xff] %v4102_v40  ;;  %v2699_v25 = vsub.f32 %v2635_v18, %v2667_v16  ;;  %v3062_v51 = vmul.f32 %v8753_v11, %v3061_v32 }
 0x405   : > { %4375 = vst [vmem:[#allocation1 + $0x6] ss:$9 sm:$0xff] %v4103_v13  ;;  %v5384_v35 = vpop.eup %5383  ;;  %v3667_v34 = vadd.f32 %v5382_v9, %v3666_v2  ;;  %v2669_v2 = vmul.f32 %v8784_v33, %v8784_v33 }
 0x406   : > { %4376 = vst [vmem:[#allocation1 + $0x7] ss:$9 sm:$0xff] %v4104_v41  ;;  %v8765_v17 = vadd.f32 1.0, %v5384_v35  ;;  %v8778_v52 = vadd.f32 1e-05, %v2699_v25  ;;  %v3066_v13 = vsel %vm8789_vm3, %v8753_v11, %v3062_v51 }
 0x407   : > { %v3671_v49 = vsel %vm3670_vm13, %v5382_v9, %v3667_v34  ;;  %v3116_v35 = vmul.f32 %v3066_v13, %v2732_v7 }
 0x408   : > { %v3676_v28 = vsel %vm3673_vm14, %v3675_v23, %v3671_v49  ;;  %5387 = vrcp.f32 %v8765_v17  ;;  %v5386_v48 = vpop.eup %5385  ;;  %v3689_v1 = vand.u32 2147483648, %v8765_v17  ;;  %v3687_v40 = vand.u32 2147483647, %v8765_v17 }
 0x409   : > { %v4105_v59 = vperm.slane %v3676_v28, 0  ;;  %v4106_v10 = vperm.slane %v3676_v28, 1  ;;  %v4107_v55 = vperm.slane %v3676_v28, 2  ;;  %v4108_v53 = vperm.slane %v3676_v28, 3  ;;  %v2571_v36 = vpop.xlane.xlu0 %2570 }
 0x40a   : > { %v4109_v27 = vperm.slane %v3676_v28, 4  ;;  %v4110_v8 = vperm.slane %v3676_v28, 5  ;;  %v4111_v26 = vperm.slane %v3676_v28, 6  ;;  %v4112_v4 = vperm.slane %v3676_v28, 7 }
 0x40b   : > { %v3028_v47 = vmul.f32 %v5386_v48, %v8763_v24  ;;  %5389 = vrsqrt.f32 %v8778_v52  ;;  %vm3034_vm4 = vweird.f32 %v5386_v48  ;;  %vm3683_vm8 = vweird.f32 %v8765_v17 }
 0x40c   : > { %v2637_v20 = vmul.f32 0.03125, %v2571_v36  ;;  %v3690_v42 = vor.u32 1.1754944e-38, %v3689_v1  ;;  %vm3688_vm7 = vcmp.eq.f32.partialorder %v3687_v40, 8.507059e+37  ;;  %vm3035_vm9 = vmor %vm3033_vm6, %vm3034_vm4  ;;  %vm3053_vm11 = vweird.f32 %v8778_v52  ;;  %v9515_v1 = vld [vmem:[#allocation12_spill] sm:$0xff] }
 0x40d   : > { %v8772_v60 = vld [vmem:[#allocation1] sm:$0xff]  ;;  %v3029_v39 = vmul.f32 %v5386_v48, %v3028_v47 }
 0x40e   : > { %4378 = vst [vmem:[#allocation1] ss:$9 sm:$0xff] %v4105_v59  ;;  %v5388_v63 = vpop.eup %5387  ;;  %v2701_v24 = vsub.f32 %v2637_v20, %v2669_v2  ;;  %v3150_v59 = vmul.f32 %v8811_v38, %v3116_v35 }
 0x40f   : > { %4379 = vst [vmem:[#allocation1 + $0x1] ss:$9 sm:$0xff] %v4106_v10  ;;  %v3679_v57 = vmul.f32 %v5388_v63, %v8765_v17  ;;  %v3030_v54 = vmul.f32 0.5, %v3029_v39  ;;  %vm3684_vm2 = vweird.f32 %v5388_v63 }
 0x410   : > { %4380 = vst [vmem:[#allocation1 + $0x2] ss:$9 sm:$0xff] %v4107_v55  ;;  %vm3685_vm5 = vmor %vm3683_vm8, %vm3684_vm2 }
 0x411   : > { %4381 = vst [vmem:[#allocation1 + $0x3] ss:$9 sm:$0xff] %v4108_v53  ;;  %v3680_v14 = vsub.f32 1.0, %v3679_v57  ;;  %v3031_v9 = vsub.f32 1.5, %v3030_v54  ;;  %v5390_v56 = vpop.eup %5389  ;;  %v2765_v53 = vadd.f32 1e-05, %v2701_v24  ;;  %v2731_v54 = vsub.f32 %v9515_v1, %v8768_v62 }
 0x412   : > { %4382 = vst [vmem:[#allocation1 + $0x4] ss:$9 sm:$0xff] %v4109_v27  ;;  %v3048_v46 = vmul.f32 %v5390_v56, %v8778_v52  ;;  %vm3054_vm10 = vweird.f32 %v5390_v56 }
 0x413   : > { %4383 = vst [vmem:[#allocation1 + $0x5] ss:$9 sm:$0xff] %v4110_v8  ;;  %v3681_v45 = vmul.f32 %v5388_v63, %v3680_v14  ;;  %v3032_v21 = vmul.f32 %v5386_v48, %v3031_v9  ;;  %v8818_v8 = vld [vmem:[%s9298_s4 + $0x2] ss:$0 sm:$0xff]  ;;  %5391 = vrsqrt.f32 %v2765_v53  ;;  %vm3055_vm12 = vmor %vm3053_vm11, %vm3054_vm10  ;;  %vm3073_vm14 = vweird.f32 %v2765_v53 }
 0x414   : > { %4384 = vst [vmem:[#allocation1 + $0x6] ss:$9 sm:$0xff] %v4111_v26  ;;  %v3049_v49 = vmul.f32 %v5390_v56, %v3048_v46  ;;  %v3184_v26 = vadd.f32 %v8818_v8, %v3150_v59 }
 0x415   : > { %4385 = vst [vmem:[#allocation1 + $0x7] ss:$9 sm:$0xff] %v4112_v4  ;;  %v3682_v41 = vadd.f32 %v5388_v63, %v3681_v45  ;;  %v3036_v37 = vsel %vm3035_vm9, %v5386_v48, %v3032_v21 }
 0x416   : > { %v3113_v28 = vmul.f32 %v3036_v37, %v2729_v6  ;;  %v3050_v55 = vmul.f32 0.5, %v3049_v49  ;;  %v3216_v39 = vmax.f32 %v3184_v26, 0.0 }
 0x417   : > { %v3686_v11 = vsel %vm3685_vm5, %v5388_v63, %v3682_v41  ;;  %v8825_v63 = vld [vmem:[%s9299_s5] ss:$0 sm:$0xff] }
 0x418   : > { %v3691_v12 = vsel %vm3688_vm7, %v3690_v42, %v3686_v11  ;;  %v3147_v16 = vmul.f32 %v8811_v38, %v3113_v28  ;;  %v3051_v18 = vsub.f32 1.5, %v3050_v55  ;;  %v3252_v45 = vmul.f32 %v8825_v63, %v3216_v39 }
 0x419   : > { %v4113_v31 = vperm.slane %v3691_v12, 0  ;;  %v4114_v34 = vperm.slane %v3691_v12, 1  ;;  %v4115_v23 = vperm.slane %v3691_v12, 2  ;;  %v4116_v58 = vperm.slane %v3691_v12, 3  ;;  %v5392_v14 = vpop.eup %5391 }
 0x41a   : > { %v4117_v0 = vperm.slane %v3691_v12, 4  ;;  %v4118_v50 = vperm.slane %v3691_v12, 5  ;;  %v4119_v10 = vperm.slane %v3691_v12, 6  ;;  %v4120_v27 = vperm.slane %v3691_v12, 7 }
 0x41b   : > { %v3181_v48 = vadd.f32 %v8818_v8, %v3147_v16  ;;  %v3052_v25 = vmul.f32 %v5390_v56, %v3051_v18  ;;  %v3068_v40 = vmul.f32 %v5392_v14, %v2765_v53  ;;  %v3342_v9 = vsel %vm618_vm0, %v3252_v45, 0.0 }
 0x41c   : > { %v8806_v17 = vld [vmem:[#allocation1] sm:$0xff]  ;;  %vm3074_vm13 = vweird.f32 %v5392_v14 }
 0x41d   : > { %4387 = vst [vmem:[#allocation1] ss:$9 sm:$0xff] %v4113_v31  ;;  %v3213_v32 = vmax.f32 %v3181_v48, 0.0  ;;  %v3056_v19 = vsel %vm3055_vm12, %v5390_v56, %v3052_v25  ;;  %v3069_v13 = vmul.f32 %v5392_v14, %v3068_v40  ;;  %vm8842_vm15 = vmor %vm3073_vm14, %vm3074_vm13 }
 0x41e   : > { %4388 = vst [vmem:[#allocation1 + $0x1] ss:$9 sm:$0xff] %v4114_v34  ;;  %v3115_v30 = vmul.f32 %v3056_v19, %v2731_v54 }
 0x41f   : > { %4389 = vst [vmem:[#allocation1 + $0x2] ss:$9 sm:$0xff] %v4115_v23  ;;  %v3249_v4 = vmul.f32 %v8825_v63, %v3213_v32  ;;  %v3070_v56 = vmul.f32 0.5, %v3069_v13 }
 0x420   : > { %4390 = vst [vmem:[#allocation1 + $0x3] ss:$9 sm:$0xff] %v4116_v58  ;;  %v3149_v52 = vmul.f32 %v8811_v38, %v3115_v30 }
 0x421   : > { %4391 = vst [vmem:[#allocation1 + $0x4] ss:$9 sm:$0xff] %v4117_v0  ;;  %v3333_v57 = vsel %vm618_vm0, %v3249_v4, 0.0  ;;  %v3071_v2 = vsub.f32 1.5, %v3070_v56 }
 0x422   : > { %4392 = vst [vmem:[#allocation1 + $0x5] ss:$9 sm:$0xff] %v4118_v50  ;;  %3334 = vadd.xlane.f32.xlu1 %v3333_v57  ;;  %v3183_v20 = vadd.f32 %v8818_v8, %v3149_v52  ;;  %v9518_v50 = vld [vmem:[#allocation15_spill] sm:$0xff] }
 0x423   : > { %4393 = vst [vmem:[#allocation1 + $0x6] ss:$9 sm:$0xff] %v4119_v10  ;;  %v3072_v37 = vmul.f32 %v5392_v14, %v3071_v2  ;;  %v2733_v59 = vsub.f32 %v9518_v50, %v8784_v33 }
 0x424   : > { %4394 = vst [vmem:[#allocation1 + $0x7] ss:$9 sm:$0xff] %v4120_v27  ;;  %v3215_v42 = vmax.f32 %v3183_v20, 0.0 }
 0x425   : > { %v3076_v0 = vsel %vm8842_vm15, %v5392_v14, %v3072_v37 }
 0x426   : > { %v3293_v47 = vpop.xlane.xlu2 %3292  ;;  %v3251_v44 = vmul.f32 %v8825_v63, %v3215_v42  ;;  %v3117_v18 = vmul.f32 %v3076_v0, %v2733_v59  ;;  %v9519_v0 = vld [vmem:[#allocation23_spill] sm:$0xff] }
 0x427   : > { %v3365_v51 = vadd.f32 %v7795_v22, %v3293_v47 }
 0x428   : > { %v3339_v6 = vsel %vm618_vm0, %v3251_v44, 0.0 }
 0x429   : > { %v5066_v36 = vmul.f32 -1.442695, %v3365_v51  ;;  %3340 = vadd.xlane.f32.xlu0 %v3339_v6  ;;  %v3151_v51 = vmul.f32 %v8811_v38, %v3117_v18 }
 0x42a   : > { %3343 = vadd.xlane.f32.xlu1 %v3342_v9 }
 0x42b   : > { %5393 = vpow2.f32 %v5066_v36  ;;  %v8853_v39 = vld [vmem:[#allocation1] sm:$0xff]  ;;  %v3185_v30 = vadd.f32 %v8818_v8, %v3151_v51 }
 0x42e   : > { %v3302_v35 = vpop.xlane.xlu1 %3301 }
 0x42f   : > { %v3368_v58 = vadd.f32 %v7795_v22, %v3302_v35 }
 0x431   : > { %v3296_v41 = vpop.xlane.xlu2 %3295  ;;  %v5394_v7 = vpop.eup %5393  ;;  %v5069_v16 = vmul.f32 -1.442695, %v3368_v58 }
 0x432   : > { %v3366_v5 = vadd.f32 %v7795_v22, %v3296_v41  ;;  %v3493_v62 = vadd.f32 1.0, %v5394_v7  ;;  %v3217_v7 = vmax.f32 %v3185_v30, 0.0 }
 0x434   : > { %v5067_v21 = vmul.f32 -1.442695, %v3366_v5  ;;  %5395 = vrcp.f32 %v3493_v62  ;;  %v3704_v24 = vand.u32 2147483648, %v3493_v62  ;;  %v3702_v28 = vand.u32 2147483647, %v3493_v62 }
 0x435   : > { %vm3698_vm2 = vweird.f32 %v3493_v62 }
 0x436   : > { %5397 = vpow2.f32 %v5067_v21  ;;  %v3705_v53 = vor.u32 1.1754944e-38, %v3704_v24  ;;  %vm3703_vm4 = vcmp.eq.f32.partialorder %v3702_v28, 8.507059e+37 }
 0x43a   : > { %v5396_v11 = vpop.eup %5395 }
 0x43b   : > { %v3694_v46 = vmul.f32 %v5396_v11, %v3493_v62  ;;  %vm3699_vm1 = vweird.f32 %v5396_v11 }
 0x43c   : > { %v5398_v12 = vpop.eup %5397  ;;  %vm3700_vm3 = vmor %vm3698_vm2, %vm3699_vm1 }
 0x43d   : > { %v8840_v31 = vadd.f32 1.0, %v5398_v12  ;;  %v3695_v34 = vsub.f32 1.0, %v3694_v46 }
 0x43e   : > { %v3308_v59 = vpop.xlane.xlu1 %3307 }
 0x43f   : > { %5399 = vrcp.f32 %v8840_v31  ;;  %v3696_v49 = vmul.f32 %v5396_v11, %v3695_v34  ;;  %v3719_v13 = vand.u32 2147483648, %v8840_v31  ;;  %v3717_v20 = vand.u32 2147483647, %v8840_v31 }
 0x440   : > { %5401 = vpow2.f32 %v5069_v16  ;;  %vm3713_vm5 = vweird.f32 %v8840_v31 }
 0x441   : > { %v3697_v10 = vadd.f32 %v5396_v11, %v3696_v49  ;;  %v3299_v55 = vpop.xlane.xlu2 %3298  ;;  %v3720_v56 = vor.u32 1.1754944e-38, %v3719_v13  ;;  %vm3718_vm7 = vcmp.eq.f32.partialorder %v3717_v20, 8.507059e+37  ;;  %v8870_v49 = vmul.f32 0.03125, %v9519_v0 }
 0x442   : > { %v3367_v27 = vadd.f32 %v7795_v22, %v3299_v55 }
 0x443   : > { %v3701_v48 = vsel %vm3700_vm3, %v5396_v11, %v3697_v10  ;;  %v3253_v11 = vmul.f32 %v8825_v63, %v3217_v7 }
 0x444   : > { %v3706_v26 = vsel %vm3703_vm4, %v3705_v53, %v3701_v48  ;;  %v5068_v25 = vmul.f32 -1.442695, %v3367_v27  ;;  %v2670_v48 = vmul.f32 %v8870_v49, %v8870_v49 }
 0x445   : > { %v5400_v32 = vpop.eup %5399  ;;  %v4121_v4 = vperm.slane %v3706_v26, 0  ;;  %v4122_v47 = vperm.slane %v3706_v26, 1  ;;  %v4123_v57 = vperm.slane %v3706_v26, 2  ;;  %v4124_v33 = vperm.slane %v3706_v26, 3 }
 0x446   : > { %v4125_v14 = vperm.slane %v3706_v26, 4  ;;  %v3709_v19 = vmul.f32 %v5400_v32, %v8840_v31  ;;  %5403 = vpow2.f32 %v5068_v25  ;;  %v4126_v1 = vperm.slane %v3706_v26, 5  ;;  %v5402_v9 = vpop.eup %5401 }
 0x447   : > { %4396 = vst [vmem:[#allocation1] ss:$9 sm:$0xff] %v4121_v4  ;;  %v4127_v54 = vperm.slane %v3706_v26, 6  ;;  %v4128_v45 = vperm.slane %v3706_v26, 7  ;;  %v3305_v40 = vpop.xlane.xlu0 %3304  ;;  %vm3714_vm8 = vweird.f32 %v5400_v32  ;;  %v8861_v42 = vadd.f32 1.0, %v5402_v9 }
 0x448   : > { %4397 = vst [vmem:[#allocation1 + $0x1] ss:$9 sm:$0xff] %v4122_v47  ;;  %v3710_v36 = vsub.f32 1.0, %v3709_v19  ;;  %v3369_v5 = vadd.f32 %v7795_v22, %v3305_v40  ;;  %vm3715_vm6 = vmor %vm3713_vm5, %vm3714_vm8  ;;  %v3345_v24 = vsel %vm618_vm0, %v3253_v11, 0.0 }
 0x449   : > { %4398 = vst [vmem:[#allocation1 + $0x2] ss:$9 sm:$0xff] %v4123_v57  ;;  %3346 = vadd.xlane.f32.xlu2 %v3345_v24  ;;  %vm3743_vm14 = vweird.f32 %v8861_v42  ;;  %v3747_v11 = vand.u32 2147483647, %v8861_v42 }
 0x44a   : > { %4399 = vst [vmem:[#allocation1 + $0x3] ss:$9 sm:$0xff] %v4124_v33  ;;  %v3711_v52 = vmul.f32 %v5400_v32, %v3710_v36  ;;  %v5070_v6 = vmul.f32 -1.442695, %v3369_v5 }
 0x44b   : > { %4400 = vst [vmem:[#allocation1 + $0x4] ss:$9 sm:$0xff] %v4125_v14  ;;  %v2574_v23 = vpop.xlane.xlu2 %2573  ;;  %vm3748_vm1 = vcmp.eq.f32.partialorder %v3747_v11, 8.507059e+37 }
 0x44c   : > { %4401 = vst [vmem:[#allocation1 + $0x5] ss:$9 sm:$0xff] %v4126_v1  ;;  %v5404_v41 = vpop.eup %5403  ;;  %v3712_v62 = vadd.f32 %v5400_v32, %v3711_v52  ;;  %v2638_v16 = vmul.f32 0.03125, %v2574_v23 }
 0x44d   : > { %4402 = vst [vmem:[#allocation1 + $0x6] ss:$9 sm:$0xff] %v4127_v54  ;;  %v3495_v21 = vadd.f32 1.0, %v5404_v41 }
 0x44e   : > { %4403 = vst [vmem:[#allocation1 + $0x7] ss:$9 sm:$0xff] %v4128_v45  ;;  %v3716_v44 = vsel %vm3715_vm6, %v5400_v32, %v3712_v62  ;;  %v3370_v32 = vadd.f32 %v7795_v22, %v3308_v59  ;;  %v2702_v57 = vsub.f32 %v2638_v16, %v2670_v48 }
 0x44f   : > { %5405 = vrcp.f32 %v3495_v21  ;;  %v3721_v2 = vsel %vm3718_vm7, %v3720_v56, %v3716_v44  ;;  %v3734_v4 = vand.u32 2147483648, %v3495_v21  ;;  %v3732_v47 = vand.u32 2147483647, %v3495_v21 }
 0x450   : > { %5407 = vrcp.f32 %v8861_v42  ;;  %v4129_v12 = vperm.slane %v3721_v2, 0  ;;  %v4130_v37 = vperm.slane %v3721_v2, 1  ;;  %v4131_v46 = vperm.slane %v3721_v2, 2 }
 0x451   : > { %v4132_v34 = vperm.slane %v3721_v2, 3  ;;  %5409 = vpow2.f32 %v5070_v6  ;;  %v4133_v31 = vperm.slane %v3721_v2, 4  ;;  %v4134_v28 = vperm.slane %v3721_v2, 5 }
 0x452   : > { %v4135_v50 = vperm.slane %v3721_v2, 6  ;;  %v4136_v53 = vperm.slane %v3721_v2, 7  ;;  %v5071_v14 = vmul.f32 -1.442695, %v3370_v32  ;;  %vm3728_vm10 = vweird.f32 %v3495_v21 }
 0x453   : > { %v3735_v1 = vor.u32 1.1754944e-38, %v3734_v4  ;;  %vm3733_vm12 = vcmp.eq.f32.partialorder %v3732_v47, 8.507059e+37  ;;  %v8881_v36 = vadd.f32 1e-05, %v2702_v57  ;;  %v3311_v44 = vpop.xlane.xlu2 %3310  ;;  %v3749_v2 = vand.u32 2147483648, %v8861_v42  ;;  %v3314_v57 = vpop.xlane.xlu0 %3313 }
 0x455   : > { %v8866_v35 = vld [vmem:[#allocation1] sm:$0xff]  ;;  %v5406_v58 = vpop.eup %5405  ;;  %v3750_v23 = vor.u32 1.1754944e-38, %v3749_v2  ;;  %vm3083_vm6 = vweird.f32 %v8881_v36 }
 0x456   : > { %4405 = vst [vmem:[#allocation1] ss:$9 sm:$0xff] %v4129_v12  ;;  %v3724_v10 = vmul.f32 %v5406_v58, %v3495_v21  ;;  %v8872_v55 = vpop.eup %5407  ;;  %vm3729_vm9 = vweird.f32 %v5406_v58 }
 0x457   : > { %4406 = vst [vmem:[#allocation1 + $0x1] ss:$9 sm:$0xff] %v4130_v37  ;;  %v5410_v18 = vpop.eup %5409  ;;  %v3739_v26 = vmul.f32 %v8872_v55, %v8861_v42  ;;  %vm3730_vm11 = vmor %vm3728_vm10, %vm3729_vm9  ;;  %vm3744_vm13 = vweird.f32 %v8872_v55 }
 0x458   : > { %4407 = vst [vmem:[#allocation1 + $0x2] ss:$9 sm:$0xff] %v4131_v46  ;;  %v3725_v27 = vsub.f32 1.0, %v3724_v10  ;;  %v8879_v51 = vadd.f32 1.0, %v5410_v18  ;;  %vm3745_vm15 = vmor %vm3743_vm14, %vm3744_vm13  ;;  %v3371_v46 = vadd.f32 %v7795_v22, %v3311_v44  ;;  %v9520_v10 = vld [vmem:[#allocation25_spill] sm:$0xff] }
 0x459   : > { %4408 = vst [vmem:[#allocation1 + $0x3] ss:$9 sm:$0xff] %v4132_v34  ;;  %v3740_v19 = vsub.f32 1.0, %v3739_v26 }
 0x45a   : > { %4409 = vst [vmem:[#allocation1 + $0x4] ss:$9 sm:$0xff] %v4133_v31  ;;  %v3726_v25 = vmul.f32 %v5406_v58, %v3725_v27  ;;  %5411 = vrcp.f32 %v8879_v51  ;;  %v5072_v0 = vmul.f32 -1.442695, %v3371_v46  ;;  %vm3758_vm3 = vweird.f32 %v8879_v51 }
 0x45b   : > { %4410 = vst [vmem:[#allocation1 + $0x5] ss:$9 sm:$0xff] %v4134_v28  ;;  %5413 = vpow2.f32 %v5071_v14  ;;  %v3741_v9 = vmul.f32 %v8872_v55, %v3740_v19  ;;  %v5613_v28 = vmov 0   ;;  %v3764_v14 = vand.u32 2147483648, %v8879_v51 }
 0x45c   : > { %4411 = vst [vmem:[#allocation1 + $0x6] ss:$9 sm:$0xff] %v4135_v50  ;;  %v3727_v33 = vadd.f32 %v5406_v58, %v3726_v25  ;;  %5415 = vrsqrt.f32 %v8881_v36  ;;  %5209 = vset.pattern.permute.xlu1 %v5613_v28  ;;  %5210 = vset.pattern.permute.xlu2 %v5613_v28 }
 0x45d   : > { %4412 = vst [vmem:[#allocation1 + $0x7] ss:$9 sm:$0xff] %v4136_v53  ;;  %v3742_v21 = vadd.f32 %v8872_v55, %v3741_v9  ;;  %4577 = vperm.xlu1 %5209, %v9520_v10   ;;  %5211 = vset.pattern.permute.xlu0 %v5613_v28 }
 0x45e   : > { %v3731_v54 = vsel %vm3730_vm11, %v5406_v58, %v3727_v33 }
 0x45f   : > { %v3736_v45 = vsel %vm3733_vm12, %v3735_v1, %v3731_v54  ;;  %v3746_v34 = vsel %vm3745_vm15, %v8872_v55, %v3742_v21  ;;  %v9521_v55 = vld [vmem:[#allocation32_spill] sm:$0xff] }
 0x460   : > { %v4137_v40 = vperm.slane %v3736_v45, 0  ;;  %v4138_v30 = vperm.slane %v3736_v45, 1  ;;  %v4139_v52 = vperm.slane %v3736_v45, 2  ;;  %v4140_v41 = vperm.slane %v3736_v45, 3  ;;  %v8888_v62 = vpop.eup %5411 }
 0x461   : > { %v4141_v20 = vperm.slane %v3736_v45, 4  ;;  %v4142_v5 = vperm.slane %v3736_v45, 5  ;;  %v4143_v7 = vperm.slane %v3736_v45, 6  ;;  %v4144_v56 = vperm.slane %v3736_v45, 7  ;;  %v5414_v6 = vpop.eup %5413  ;;  %4580 = vperm.xlu2 %5210, %v9521_v55  }
 0x462   : > { %v8895_v12 = vpop.eup %5415  ;;  %v3754_v37 = vmul.f32 %v8888_v62, %v8879_v51  ;;  %v8901_v31 = vadd.f32 1.0, %v5414_v6  ;;  %v3751_v24 = vsel %vm3748_vm1, %v3750_v23, %v3746_v34  ;;  %vm3759_vm2 = vweird.f32 %v8888_v62 }
 0x463   : > { %v3078_v42 = vmul.f32 %v8895_v12, %v8881_v36  ;;  %v4145_v50 = vperm.slane %v3751_v24, 0  ;;  %v4146_v53 = vperm.slane %v3751_v24, 1  ;;  %v4147_v18 = vperm.slane %v3751_v24, 2  ;;  %vm3760_vm4 = vmor %vm3758_vm3, %vm3759_vm2  ;;  %v9525_v36 = vld [vmem:[#allocation17_spill] sm:$0xff] }
 0x464   : > { %v8885_v13 = vld [vmem:[#allocation1] sm:$0xff]  ;;  %v3755_v58 = vsub.f32 1.0, %v3754_v37  ;;  %5417 = vrcp.f32 %v8901_v31  ;;  %v4148_v48 = vperm.slane %v3751_v24, 3  ;;  %v4149_v26 = vperm.slane %v3751_v24, 4 }
 0x465   : > { %4414 = vst [vmem:[#allocation1] ss:$9 sm:$0xff] %v4137_v40  ;;  %v3079_v59 = vmul.f32 %v8895_v12, %v3078_v42  ;;  %5419 = vpow2.f32 %v5072_v0  ;;  %v4150_v4 = vperm.slane %v3751_v24, 5  ;;  %v4151_v33 = vperm.slane %v3751_v24, 6  ;;  %4589 = vperm.xlu1 %5209, %v8346_v15  }
 0x466   : > { %4415 = vst [vmem:[#allocation1 + $0x1] ss:$9 sm:$0xff] %v4138_v30  ;;  %v3756_v27 = vmul.f32 %v8888_v62, %v3755_v58  ;;  %v4152_v1 = vperm.slane %v3751_v24, 7  ;;  %v3762_v45 = vand.u32 2147483647, %v8879_v51  ;;  %v3372_v30 = vadd.f32 %v7795_v22, %v3314_v57 }
 0x467   : > { %4416 = vst [vmem:[#allocation1 + $0x2] ss:$9 sm:$0xff] %v4139_v52  ;;  %v3080_v25 = vmul.f32 0.5, %v3079_v59  ;;  %v9522_v52 = vld [vmem:[#allocation35_spill] sm:$0xff]  ;;  %vm3084_vm5 = vweird.f32 %v8895_v12  ;;  %v2734_v11 = vsub.f32 %v9525_v36, %v8870_v49  ;;  %vm3773_vm10 = vweird.f32 %v8901_v31 }
 0x468   : > { %4417 = vst [vmem:[#allocation1 + $0x3] ss:$9 sm:$0xff] %v4140_v41  ;;  %v3757_v47 = vadd.f32 %v8888_v62, %v3756_v27  ;;  %v3765_v41 = vor.u32 1.1754944e-38, %v3764_v14  ;;  %vm3763_vm8 = vcmp.eq.f32.partialorder %v3762_v45, 8.507059e+37  ;;  %v5073_v21 = vmul.f32 -1.442695, %v3372_v30  ;;  %vm8931_vm7 = vmor %vm3083_vm6, %vm3084_vm5 }
 0x469   : > { %4418 = vst [vmem:[#allocation1 + $0x4] ss:$9 sm:$0xff] %v4141_v20  ;;  %v3081_v40 = vsub.f32 1.5, %v3080_v25  ;;  %4586 = vperm.xlu2 %5210, %v9522_v52   ;;  %v3777_v0 = vand.u32 2147483647, %v8901_v31 }
 0x46a   : > { %4419 = vst [vmem:[#allocation1 + $0x5] ss:$9 sm:$0xff] %v4142_v5  ;;  %v8912_v32 = vpop.eup %5417  ;;  %v3761_v9 = vsel %vm3760_vm4, %v8888_v62, %v3757_v47 }
 0x46b   : > { %4420 = vst [vmem:[#allocation1 + $0x6] ss:$9 sm:$0xff] %v4143_v7  ;;  %v5420_v19 = vpop.eup %5419  ;;  %v3769_v54 = vmul.f32 %v8912_v32, %v8901_v31  ;;  %v3082_v7 = vmul.f32 %v8895_v12, %v3081_v40  ;;  %v3766_v51 = vsel %vm3763_vm8, %v3765_v41, %v3761_v9  ;;  %vm3774_vm9 = vweird.f32 %v8912_v32 }
 0x46c   : > { %4421 = vst [vmem:[#allocation1 + $0x7] ss:$9 sm:$0xff] %v4144_v56  ;;  %v8925_v20 = vadd.f32 1.0, %v5420_v19  ;;  %v4153_v62 = vperm.slane %v3766_v51, 0  ;;  %v4154_v2 = vperm.slane %v3766_v51, 1  ;;  %v4155_v37 = vperm.slane %v3766_v51, 2  ;;  %vm3775_vm11 = vmor %vm3773_vm10, %vm3774_vm9 }
 0x46d   : > { %v3770_v5 = vsub.f32 1.0, %v3769_v54  ;;  %v3086_v6 = vsel %vm8931_vm7, %v8895_v12, %v3082_v7  ;;  %4595 = vperm.xlu1 %5209, %v8566_v29   ;;  %v4156_v46 = vperm.slane %v3766_v51, 3  ;;  %v4157_v34 = vperm.slane %v3766_v51, 4  ;;  %v3317_v29 = vpop.xlane.xlu1 %3316 }
 0x46e   : > { %5421 = vrcp.f32 %v8925_v20  ;;  %v3118_v23 = vmul.f32 %v3086_v6, %v2734_v11  ;;  %v4158_v24 = vperm.slane %v3766_v51, 5  ;;  %v4159_v58 = vperm.slane %v3766_v51, 6 }
 0x46f   : > { %v3771_v56 = vmul.f32 %v8912_v32, %v3770_v5  ;;  %5423 = vpow2.f32 %v5073_v21  ;;  %v4160_v28 = vperm.slane %v3766_v51, 7  ;;  %v3373_v59 = vadd.f32 %v7795_v22, %v3317_v29 }
 0x470   : > { %v3152_v10 = vmul.f32 %v8811_v38, %v3118_v23  ;;  %vm3778_vm12 = vcmp.eq.f32.partialorder %v3777_v0, 8.507059e+37  ;;  %v3792_v40 = vand.u32 2147483647, %v8925_v20 }
 0x471   : > { %4592 = vperm.xlu2 %5210, %v8462_v61   ;;  %v3772_v12 = vadd.f32 %v8912_v32, %v3771_v56  ;;  %v3779_v61 = vand.u32 2147483648, %v8901_v31 }
 0x472   : > { %v3186_v27 = vadd.f32 %v8818_v8, %v3152_v10  ;;  %vm3793_vm15 = vcmp.eq.f32.partialorder %v3792_v40, 8.507059e+37 }
 0x473   : > { %v8909_v16 = vld [vmem:[#allocation1] sm:$0xff]  ;;  %v3776_v55 = vsel %vm3775_vm11, %v8912_v32, %v3772_v12 }
 0x474   : > { %4423 = vst [vmem:[#allocation1] ss:$9 sm:$0xff] %v4145_v50  ;;  %v8945_v42 = vpop.eup %5421  ;;  %v3218_v25 = vmax.f32 %v3186_v27, 0.0 }
 0x475   : > { %4424 = vst [vmem:[#allocation1 + $0x1] ss:$9 sm:$0xff] %v4146_v53  ;;  %v5424_v49 = vpop.eup %5423  ;;  %v3784_v50 = vmul.f32 %v8945_v42, %v8925_v20  ;;  %4601 = vperm.xlu1 %5209, %v8750_v43   ;;  %v3780_v53 = vor.u32 1.1754944e-38, %v3779_v61  ;;  %vm3789_vm13 = vweird.f32 %v8945_v42  ;;  %v9526_v61 = vld [vmem:[#allocation34_spill] sm:$0xff] }
 0x476   : > { %4425 = vst [vmem:[#allocation1 + $0x2] ss:$9 sm:$0xff] %v4147_v18  ;;  %v8959_v31 = vadd.f32 1.0, %v5424_v49  ;;  %v3254_v32 = vmul.f32 %v8825_v63, %v3218_v25 }
 0x477   : > { %4426 = vst [vmem:[#allocation1 + $0x3] ss:$9 sm:$0xff] %v4148_v48  ;;  %v3781_v18 = vsel %vm3778_vm12, %v3780_v53, %v3776_v55  ;;  %v3785_v48 = vsub.f32 1.0, %v3784_v50 }
 0x478   : > { %4427 = vst [vmem:[#allocation1 + $0x4] ss:$9 sm:$0xff] %v4149_v26  ;;  %v5074_v26 = vmul.f32 -1.442695, %v3373_v59  ;;  %5425 = vrcp.f32 %v8959_v31  ;;  %v4161_v38 = vperm.slane %v3781_v18, 0  ;;  %v3348_v57 = vsel %vm618_vm0, %v3254_v32, 0.0  ;;  %v3326_v32 = vpop.xlane.xlu1 %3325 }
 0x479   : > { %4428 = vst [vmem:[#allocation1 + $0x5] ss:$9 sm:$0xff] %v4150_v4  ;;  %4598 = vperm.xlu2 %5210, %v8683_v3   ;;  %v4162_v4 = vperm.slane %v3781_v18, 1  ;;  %v3786_v43 = vmul.f32 %v8945_v42, %v3785_v48  ;;  %v4163_v3 = vperm.slane %v3781_v18, 2  ;;  %v4164_v8 = vperm.slane %v3781_v18, 3  ;;  %3349 = vadd.xlane.f32.xlu0 %v3348_v57 }
 0x47a   : > { %4429 = vst [vmem:[#allocation1 + $0x6] ss:$9 sm:$0xff] %v4151_v33  ;;  %5427 = vpow2.f32 %v5074_v26  ;;  %v4165_v33 = vperm.slane %v3781_v18, 4  ;;  %v4166_v63 = vperm.slane %v3781_v18, 5  ;;  %v4167_v54 = vperm.slane %v3781_v18, 6 }
 0x47b   : > { %4430 = vst [vmem:[#allocation1 + $0x7] ss:$9 sm:$0xff] %v4152_v1  ;;  %v3787_v19 = vadd.f32 %v8945_v42, %v3786_v43  ;;  %v3320_v1 = vpop.xlane.xlu2 %3319  ;;  %vm3788_vm0 = vweird.f32 %v8925_v20  ;;  %vm3803_vm2 = vweird.f32 %v8959_v31  ;;  %v3807_v12 = vand.u32 2147483647, %v8959_v31 }
 0x47c   : > { %vm3790_vm14 = vmor %vm3788_vm0, %vm3789_vm13  ;;  %v3374_v52 = vadd.f32 %v7795_v22, %v3320_v1 }
 0x47d   : > { %4610 = vperm.xlu1 %5209, %v8853_v39   ;;  %v3794_v39 = vand.u32 2147483648, %v8925_v20  ;;  %v3791_v9 = vsel %vm3790_vm14, %v8945_v42, %v3787_v19  ;;  %vm3808_vm4 = vcmp.eq.f32.partialorder %v3807_v12, 8.507059e+37 }
 0x47e   : > { %v8968_v14 = vpop.eup %5425  ;;  %v5075_v51 = vmul.f32 -1.442695, %v3374_v52 }
 0x47f   : > { %v3799_v30 = vmul.f32 %v8968_v14, %v8959_v31  ;;  %v3795_v41 = vor.u32 1.1754944e-38, %v3794_v39  ;;  %vm3804_vm1 = vweird.f32 %v8968_v14 }
 0x480   : > { %v5428_v45 = vpop.eup %5427  ;;  %vm3805_vm3 = vmor %vm3803_vm2, %vm3804_vm1 }
 0x481   : > { %4607 = vperm.xlu2 %5210, %v8806_v17   ;;  %v4168_v17 = vperm.slane %v3781_v18, 7  ;;  %v8979_v5 = vadd.f32 1.0, %v5428_v45  ;;  %v3796_v7 = vsel %vm3793_vm15, %v3795_v41, %v3791_v9  ;;  %v3800_v20 = vsub.f32 1.0, %v3799_v30 }
 0x482   : > { %v8936_v44 = vld [vmem:[#allocation1] sm:$0xff]  ;;  %v4169_v21 = vperm.slane %v3796_v7, 0  ;;  %v4171_v6 = vperm.slane %v3796_v7, 2  ;;  %v4174_v36 = vperm.slane %v3796_v7, 5  ;;  %v4176_v42 = vperm.slane %v3796_v7, 7 }
 0x483   : > { %4432 = vst [vmem:[#allocation1] ss:$9 sm:$0xff] %v4153_v62  ;;  %5429 = vrcp.f32 %v8979_v5  ;;  %v4170_v62 = vperm.slane %v3796_v7, 1  ;;  %v3801_v56 = vmul.f32 %v8968_v14, %v3800_v20  ;;  %vm3818_vm5 = vweird.f32 %v8979_v5 }
 0x484   : > { %4433 = vst [vmem:[#allocation1 + $0x1] ss:$9 sm:$0xff] %v4154_v2  ;;  %5431 = vpow2.f32 %v5075_v51  ;;  %v4172_v2 = vperm.slane %v3796_v7, 3 }
 0x485   : > { %4434 = vst [vmem:[#allocation1 + $0x2] ss:$9 sm:$0xff] %v4155_v37  ;;  %4619 = vperm.xlu1 %5209, %v8909_v16   ;;  %v4173_v16 = vperm.slane %v3796_v7, 4  ;;  %v3802_v11 = vadd.f32 %v8968_v14, %v3801_v56  ;;  %v3323_v37 = vpop.xlane.xlu0 %3322 }
 0x486   : > { %4435 = vst [vmem:[#allocation1 + $0x3] ss:$9 sm:$0xff] %v4156_v46  ;;  %v4175_v46 = vperm.slane %v3796_v7, 6  ;;  %v3375_v29 = vadd.f32 %v7795_v22, %v3323_v37  ;;  %v3329_v7 = vpop.xlane.xlu2 %3328 }
 0x487   : > { %4436 = vst [vmem:[#allocation1 + $0x4] ss:$9 sm:$0xff] %v4157_v34  ;;  %v3809_v34 = vand.u32 2147483648, %v8959_v31  ;;  %v3377_v56 = vadd.f32 %v7795_v22, %v3329_v7 }
 0x488   : > { %4437 = vst [vmem:[#allocation1 + $0x5] ss:$9 sm:$0xff] %v4158_v24  ;;  %v5076_v59 = vmul.f32 -1.442695, %v3375_v29 }
 0x489   : > { %4438 = vst [vmem:[#allocation1 + $0x6] ss:$9 sm:$0xff] %v4159_v58  ;;  %4616 = vperm.xlu2 %5210, %v8885_v13   ;;  %v8985_v13 = vpop.eup %5429  ;;  %v3806_v58 = vsel %vm3805_vm3, %v8968_v14, %v3802_v11  ;;  %v3810_v49 = vor.u32 1.1754944e-38, %v3809_v34  ;;  %v5078_v11 = vmul.f32 -1.442695, %v3377_v56 }
 0x48a   : > { %4439 = vst [vmem:[#allocation1 + $0x7] ss:$9 sm:$0xff] %v4160_v28  ;;  %v5432_v23 = vpop.eup %5431  ;;  %v3814_v24 = vmul.f32 %v8985_v13, %v8979_v5  ;;  %vm3819_vm8 = vweird.f32 %v8985_v13 }
 0x48b   : > { %v8997_v0 = vadd.f32 1.0, %v5432_v23  ;;  %v3811_v28 = vsel %vm3808_vm4, %v3810_v49, %v3806_v58  ;;  %vm3820_vm6 = vmor %vm3818_vm5, %vm3819_vm8 }
 0x48c   : > { %v3815_v50 = vsub.f32 1.0, %v3814_v24  ;;  %v4177_v10 = vperm.slane %v3811_v28, 0  ;;  %v4178_v53 = vperm.slane %v3811_v28, 1  ;;  %v4179_v27 = vperm.slane %v3811_v28, 2 }
 0x48d   : > { %4583 = vperm.xlu0 %5211, %v9526_v61   ;;  %5433 = vrcp.f32 %v8997_v0  ;;  %v4180_v18 = vperm.slane %v3811_v28, 3  ;;  %v4181_v48 = vperm.slane %v3811_v28, 4  ;;  %v4182_v25 = vperm.slane %v3811_v28, 5  ;;  %v3332_v49 = vpop.xlane.xlu0 %3331 }
 0x48e   : > { %v3816_v31 = vmul.f32 %v8985_v13, %v3815_v50  ;;  %5435 = vpow2.f32 %v5076_v59  ;;  %v4184_v43 = vperm.slane %v3811_v28, 7  ;;  %v3839_v51 = vand.u32 2147483648, %v8997_v0 }
 0x48f   : > { %vm3833_vm10 = vweird.f32 %v8997_v0 }
 0x491   : > { %v4440_v47 = vld [vmem:[#allocation1] sm:$0xff] }
 0x492   : > { %4441 = vst [vmem:[#allocation1] ss:$9 sm:$0xff] %v4161_v38  ;;  %4625 = vperm.xlu2 %5210, %v4440_v47   ;;  %v3817_v38 = vadd.f32 %v8985_v13, %v3816_v31  ;;  %v3824_v47 = vand.u32 2147483648, %v8979_v5 }
 0x493   : > { %4442 = vst [vmem:[#allocation1 + $0x1] ss:$9 sm:$0xff] %v4162_v4  ;;  %v9004_v26 = vpop.eup %5433  ;;  %v4183_v4 = vperm.slane %v3811_v28, 6 }
 0x494   : > { %4443 = vst [vmem:[#allocation1 + $0x2] ss:$9 sm:$0xff] %v4163_v3  ;;  %v3822_v3 = vand.u32 2147483647, %v8979_v5  ;;  %v3829_v57 = vmul.f32 %v9004_v26, %v8997_v0  ;;  %v3825_v14 = vor.u32 1.1754944e-38, %v3824_v47  ;;  %vm3834_vm9 = vweird.f32 %v9004_v26 }
 0x495   : > { %4444 = vst [vmem:[#allocation1 + $0x3] ss:$9 sm:$0xff] %v4164_v8  ;;  %4604 = vperm.xlu0 %5211, %v8772_v60   ;;  %v5436_v60 = vpop.eup %5435  ;;  %v3376_v8 = vadd.f32 %v7795_v22, %v3326_v32  ;;  %vm3835_vm11 = vmor %vm3833_vm10, %vm3834_vm9 }
 0x496   : > { %4445 = vst [vmem:[#allocation1 + $0x4] ss:$9 sm:$0xff] %v4165_v33  ;;  %v3821_v33 = vsel %vm3820_vm6, %v8985_v13, %v3817_v38  ;;  %vm3823_vm7 = vcmp.eq.f32.partialorder %v3822_v3, 8.507059e+37  ;;  %v3830_v1 = vsub.f32 1.0, %v3829_v57 }
 0x497   : > { %4446 = vst [vmem:[#allocation1 + $0x5] ss:$9 sm:$0xff] %v4166_v63  ;;  %v9016_v63 = vadd.f32 1.0, %v5436_v60  ;;  %v3826_v19 = vsel %vm3823_vm7, %v3825_v14, %v3821_v33 }
 0x498   : > { %4447 = vst [vmem:[#allocation1 + $0x6] ss:$9 sm:$0xff] %v4167_v54  ;;  %v5077_v54 = vmul.f32 -1.442695, %v3376_v8  ;;  %v4185_v39 = vperm.slane %v3826_v19, 0  ;;  %v3831_v40 = vmul.f32 %v9004_v26, %v3830_v1  ;;  %v4187_v30 = vperm.slane %v3826_v19, 2 }
 0x499   : > { %4448 = vst [vmem:[#allocation1 + $0x7] ss:$9 sm:$0xff] %v4168_v17  ;;  %5437 = vrcp.f32 %v9016_v63  ;;  %v4186_v17 = vperm.slane %v3826_v19, 1  ;;  %v4189_v52 = vperm.slane %v3826_v19, 4  ;;  %v4190_v41 = vperm.slane %v3826_v19, 5 }
 0x49a   : > { %5439 = vpow2.f32 %v5077_v54  ;;  %v3832_v5 = vadd.f32 %v9004_v26, %v3831_v40  ;;  %v4191_v20 = vperm.slane %v3826_v19, 6  ;;  %vm3848_vm0 = vweird.f32 %v9016_v63 }
 0x49b   : > { %v3852_v59 = vand.u32 2147483647, %v9016_v63 }
 0x49d   : > { %4613 = vperm.xlu0 %5211, %v8866_v35   ;;  %v4188_v35 = vperm.slane %v3826_v19, 3  ;;  %vm3853_vm15 = vcmp.eq.f32.partialorder %v3852_v59, 8.507059e+37 }
 0x49f   : > { %v9021_v9 = vpop.eup %5437 }
 0x4a0   : > { %v4449_v15 = vld [vmem:[#allocation1] sm:$0xff]  ;;  %vm3849_vm13 = vweird.f32 %v9021_v9 }
 0x4a1   : > { %4450 = vst [vmem:[#allocation1] ss:$9 sm:$0xff] %v4169_v21  ;;  %4628 = vperm.xlu1 %5209, %v4449_v15   ;;  %v5440_v21 = vpop.eup %5439  ;;  %v3837_v15 = vand.u32 2147483647, %v8997_v0  ;;  %v3854_v0 = vand.u32 2147483648, %v9016_v63  ;;  %vm3850_vm14 = vmor %vm3848_vm0, %vm3849_vm13 }
 0x4a2   : > { %4451 = vst [vmem:[#allocation1 + $0x1] ss:$9 sm:$0xff] %v4170_v62  ;;  %v3844_v62 = vmul.f32 %v9021_v9, %v9016_v63 }
 0x4a3   : > { %4452 = vst [vmem:[#allocation1 + $0x2] ss:$9 sm:$0xff] %v4171_v6  ;;  %v3836_v6 = vsel %vm3835_vm11, %v9004_v26, %v3832_v5  ;;  %vm3838_vm12 = vcmp.eq.f32.partialorder %v3837_v15, 8.507059e+37 }
 0x4a4   : > { %4453 = vst [vmem:[#allocation1 + $0x3] ss:$9 sm:$0xff] %v4172_v2  ;;  %v3840_v2 = vor.u32 1.1754944e-38, %v3839_v51  ;;  %v3845_v13 = vsub.f32 1.0, %v3844_v62 }
 0x4a5   : > { %4454 = vst [vmem:[#allocation1 + $0x4] ss:$9 sm:$0xff] %v4173_v16  ;;  %4622 = vperm.xlu0 %5211, %v8936_v44   ;;  %v4192_v44 = vperm.slane %v3826_v19, 7  ;;  %v9032_v16 = vadd.f32 1.0, %v5440_v21 }
 0x4a6   : > { %4455 = vst [vmem:[#allocation1 + $0x5] ss:$9 sm:$0xff] %v4174_v36  ;;  %v3841_v36 = vsel %vm3838_vm12, %v3840_v2, %v3836_v6  ;;  %v3846_v34 = vmul.f32 %v9021_v9, %v3845_v13  ;;  %v3338_v2 = vpop.xlane.xlu2 %3337  ;;  %vm4677_vm12 = vcmask 130112  }
 0x4a7   : > { %4456 = vst [vmem:[#allocation1 + $0x6] ss:$9 sm:$0xff] %v4175_v46  ;;  %5441 = vrcp.f32 %v9032_v16  ;;  %v4193_v37 = vperm.slane %v3841_v36, 0  ;;  %v4194_v23 = vperm.slane %v3841_v36, 1  ;;  %v4196_v12 = vperm.slane %v3841_v36, 3 }
 0x4a8   : > { %4457 = vst [vmem:[#allocation1 + $0x7] ss:$9 sm:$0xff] %v4176_v42  ;;  %5443 = vpow2.f32 %v5078_v11  ;;  %v4195_v42 = vperm.slane %v3841_v36, 2  ;;  %v4197_v24 = vperm.slane %v3841_v36, 4  ;;  %v3847_v61 = vadd.f32 %v9021_v9, %v3846_v34 }
 0x4a9   : > { %v4198_v58 = vperm.slane %v3841_v36, 5  ;;  %v4199_v28 = vperm.slane %v3841_v36, 6  ;;  %v3869_v63 = vand.u32 2147483648, %v9032_v16  ;;  %vm3863_vm2 = vweird.f32 %v9032_v16 }
 0x4aa   : > { %v3851_v31 = vsel %vm3850_vm14, %v9021_v9, %v3847_v61  ;;  %v3867_v54 = vand.u32 2147483647, %v9032_v16  ;;  %v3380_v34 = vadd.f32 %v7795_v22, %v3338_v2 }
 0x4ac   : > { %vm3868_vm4 = vcmp.eq.f32.partialorder %v3867_v54, 8.507059e+37  ;;  %v5081_v61 = vmul.f32 -1.442695, %v3380_v34 }
 0x4ad   : > { %v9037_v29 = vpop.eup %5441 }
 0x4ae   : > { %v5444_v50 = vpop.eup %5443  ;;  %vm3864_vm1 = vweird.f32 %v9037_v29 }
 0x4af   : > { %v9000_v55 = vld [vmem:[#allocation1] sm:$0xff]  ;;  %vm3865_vm3 = vmor %vm3863_vm2, %vm3864_vm1 }
 0x4b0   : > { %4459 = vst [vmem:[#allocation1] ss:$9 sm:$0xff] %v4177_v10  ;;  %4631 = vperm.xlu0 %5211, %v9000_v55   ;;  %v4200_v10 = vperm.slane %v3841_v36, 7  ;;  %v3859_v55 = vmul.f32 %v9037_v29, %v9032_v16 }
 0x4b1   : > { %4460 = vst [vmem:[#allocation1 + $0x1] ss:$9 sm:$0xff] %v4178_v53  ;;  %v3378_v53 = vadd.f32 %v7795_v22, %v3332_v49 }
 0x4b2   : > { %4461 = vst [vmem:[#allocation1 + $0x2] ss:$9 sm:$0xff] %v4179_v27  ;;  %v3855_v27 = vor.u32 1.1754944e-38, %v3854_v0  ;;  %v3860_v26 = vsub.f32 1.0, %v3859_v55 }
 0x4b3   : > { %4462 = vst [vmem:[#allocation1 + $0x3] ss:$9 sm:$0xff] %v4180_v18  ;;  %v9048_v18 = vadd.f32 1.0, %v5444_v50 }
 0x4b4   : > { %4463 = vst [vmem:[#allocation1 + $0x4] ss:$9 sm:$0xff] %v4181_v48  ;;  %v3856_v48 = vsel %vm3853_vm15, %v3855_v27, %v3851_v31  ;;  %v3861_v47 = vmul.f32 %v9037_v29, %v3860_v26  ;;  %v9527_v31 = vlaneseq }
 0x4b5   : > { %4464 = vst [vmem:[#allocation1 + $0x5] ss:$9 sm:$0xff] %v4182_v25  ;;  %v5079_v25 = vmul.f32 -1.442695, %v3378_v53  ;;  %5445 = vrcp.f32 %v9048_v18  ;;  %v4201_v38 = vperm.slane %v3856_v48, 0  ;;  %v4202_v32 = vperm.slane %v3856_v48, 1 }
 0x4b6   : > { %4465 = vst [vmem:[#allocation1 + $0x6] ss:$9 sm:$0xff] %v4183_v4  ;;  %v4203_v60 = vperm.slane %v3856_v48, 2  ;;  %v4205_v3 = vperm.slane %v3856_v48, 4  ;;  %v4206_v8 = vperm.slane %v3856_v48, 5  ;;  %v3862_v33 = vadd.f32 %v9037_v29, %v3861_v47 }
 0x4b7   : > { %4466 = vst [vmem:[#allocation1 + $0x7] ss:$9 sm:$0xff] %v4184_v43  ;;  %5447 = vpow2.f32 %v5079_v25  ;;  %v4204_v43 = vperm.slane %v3856_v48, 3  ;;  %v4207_v14 = vperm.slane %v3856_v48, 6  ;;  %v4208_v1 = vperm.slane %v3856_v48, 7  ;;  %v3341_v25 = vpop.xlane.xlu0 %3340 }
 0x4b8   : > { %v3884_v16 = vand.u32 2147483648, %v9048_v18  ;;  %vm3878_vm5 = vweird.f32 %v9048_v18  ;;  %v3882_v36 = vand.u32 2147483647, %v9048_v18  ;;  %v9089_v27 = vand.u32 127, %v9527_v31 }
 0x4ba   : > { %vm3883_vm7 = vcmp.eq.f32.partialorder %v3882_v36, 8.507059e+37 }
 0x4bb   : > { %v9052_v57 = vpop.eup %5445 }
 0x4bc   : > { %vm3879_vm8 = vweird.f32 %v9052_v57 }
 0x4bd   : > { %v5448_v19 = vpop.eup %5447  ;;  %vm3880_vm6 = vmor %vm3878_vm5, %vm3879_vm8 }
 0x4be   : > { %v4467_v45 = vld [vmem:[#allocation1] sm:$0xff]  ;;  %v9062_v40 = vadd.f32 1.0, %v5448_v19 }
 0x4bf   : > { %4468 = vst [vmem:[#allocation1] ss:$9 sm:$0xff] %v4185_v39  ;;  %4634 = vperm.xlu2 %5210, %v4467_v45   ;;  %v3874_v39 = vmul.f32 %v9052_v57, %v9048_v18  ;;  %v3866_v45 = vsel %vm3865_vm3, %v9037_v29, %v3862_v33  ;;  %v3381_v33 = vadd.f32 %v7795_v22, %v3341_v25 }
 0x4c0   : > { %4469 = vst [vmem:[#allocation1 + $0x1] ss:$9 sm:$0xff] %v4186_v17  ;;  %v3870_v17 = vor.u32 1.1754944e-38, %v3869_v63  ;;  %5449 = vrcp.f32 %v9062_v40  ;;  %vm3893_vm10 = vweird.f32 %v9062_v40 }
 0x4c1   : > { %4470 = vst [vmem:[#allocation1 + $0x2] ss:$9 sm:$0xff] %v4187_v30  ;;  %v3875_v30 = vsub.f32 1.0, %v3874_v39 }
 0x4c2   : > { %4471 = vst [vmem:[#allocation1 + $0x3] ss:$9 sm:$0xff] %v4188_v35  ;;  %v3871_v35 = vsel %vm3868_vm4, %v3870_v17, %v3866_v45 }
 0x4c3   : > { %4472 = vst [vmem:[#allocation1 + $0x4] ss:$9 sm:$0xff] %v4189_v52  ;;  %v3335_v52 = vpop.xlane.xlu1 %3334  ;;  %v4210_v51 = vperm.slane %v3871_v35, 1  ;;  %v4211_v21 = vperm.slane %v3871_v35, 2  ;;  %v4213_v15 = vperm.slane %v3871_v35, 4  ;;  %v4214_v6 = vperm.slane %v3871_v35, 5 }
 0x4c4   : > { %4473 = vst [vmem:[#allocation1 + $0x5] ss:$9 sm:$0xff] %v4190_v41  ;;  %v3379_v9 = vadd.f32 %v7795_v22, %v3335_v52  ;;  %v4209_v41 = vperm.slane %v3871_v35, 0  ;;  %v4215_v13 = vperm.slane %v3871_v35, 6  ;;  %v4216_v11 = vperm.slane %v3871_v35, 7 }
 0x4c5   : > { %4474 = vst [vmem:[#allocation1 + $0x6] ss:$9 sm:$0xff] %v4191_v20  ;;  %v3876_v20 = vmul.f32 %v9052_v57, %v3875_v30 }
 0x4c6   : > { %4475 = vst [vmem:[#allocation1 + $0x7] ss:$9 sm:$0xff] %v4192_v44  ;;  %v5080_v5 = vmul.f32 -1.442695, %v3379_v9  ;;  %v4212_v44 = vperm.slane %v3871_v35, 3  ;;  %v9067_v62 = vpop.eup %5449 }
 0x4c7   : > { %v3877_v56 = vadd.f32 %v9052_v57, %v3876_v20  ;;  %vm3894_vm9 = vweird.f32 %v9067_v62 }
 0x4c8   : > { %5451 = vpow2.f32 %v5080_v5  ;;  %vm3895_vm11 = vmor %vm3893_vm10, %vm3894_vm9 }
 0x4cb   : > { %v9083_v49 = vpop.xlane.xlu1 %3343 }
 0x4cc   : > { %v3382_v36 = vadd.f32 %v7795_v22, %v9083_v49 }
 0x4cd   : > { %v4476_v46 = vld [vmem:[#allocation1] sm:$0xff] }
 0x4ce   : > { %4477 = vst [vmem:[#allocation1] ss:$9 sm:$0xff] %v4193_v37  ;;  %4637 = vperm.xlu1 %5209, %v4476_v46   ;;  %v5452_v37 = vpop.eup %5451  ;;  %v3889_v46 = vmul.f32 %v9067_v62, %v9062_v40  ;;  %v5083_v34 = vmul.f32 -1.442695, %v3382_v36 }
 0x4cf   : > { %4478 = vst [vmem:[#allocation1 + $0x1] ss:$9 sm:$0xff] %v4194_v23  ;;  %v3881_v23 = vsel %vm3880_vm6, %v9052_v57, %v3877_v56  ;;  %v3897_v57 = vand.u32 2147483647, %v9062_v40 }
 0x4d0   : > { %4479 = vst [vmem:[#allocation1 + $0x2] ss:$9 sm:$0xff] %v4195_v42  ;;  %v9078_v42 = vadd.f32 1.0, %v5452_v37  ;;  %v3890_v29 = vsub.f32 1.0, %v3889_v46 }
 0x4d1   : > { %4480 = vst [vmem:[#allocation1 + $0x3] ss:$9 sm:$0xff] %v4196_v12  ;;  %v3885_v12 = vor.u32 1.1754944e-38, %v3884_v16  ;;  %vm3898_vm13 = vcmp.eq.f32.partialorder %v3897_v57, 8.507059e+37 }
 0x4d2   : > { %4481 = vst [vmem:[#allocation1 + $0x4] ss:$9 sm:$0xff] %v4197_v24  ;;  %5453 = vrcp.f32 %v9078_v42  ;;  %v3891_v59 = vmul.f32 %v9067_v62, %v3890_v29  ;;  %vm3908_vm14 = vweird.f32 %v9078_v42 }
 0x4d3   : > { %4482 = vst [vmem:[#allocation1 + $0x5] ss:$9 sm:$0xff] %v4198_v58  ;;  %v3886_v24 = vsel %vm3883_vm7, %v3885_v12, %v3881_v23  ;;  %v9081_v58 = vpop.xlane.xlu2 %3346  ;;  %5455 = vpow2.f32 %v5081_v61 }
 0x4d4   : > { %4483 = vst [vmem:[#allocation1 + $0x6] ss:$9 sm:$0xff] %v4199_v28  ;;  %v4217_v0 = vperm.slane %v3886_v24, 0  ;;  %v4218_v28 = vperm.slane %v3886_v24, 1  ;;  %v4220_v53 = vperm.slane %v3886_v24, 3  ;;  %v4221_v18 = vperm.slane %v3886_v24, 4 }
 0x4d5   : > { %4484 = vst [vmem:[#allocation1 + $0x7] ss:$9 sm:$0xff] %v4200_v10  ;;  %v4219_v10 = vperm.slane %v3886_v24, 2  ;;  %v4222_v48 = vperm.slane %v3886_v24, 5  ;;  %v3892_v26 = vadd.f32 %v9067_v62, %v3891_v59 }
 0x4d7   : > { %v3896_v19 = vsel %vm3895_vm11, %v9067_v62, %v3892_v26 }
 0x4d8   : > { %v9086_v55 = vpop.eup %5453 }
 0x4d9   : > { %v3904_v47 = vmul.f32 %v9086_v55, %v9078_v42  ;;  %vm3909_vm0 = vweird.f32 %v9086_v55 }
 0x4da   : > { %vm3910_vm15 = vmor %vm3908_vm14, %vm3909_vm0  ;;  %vm4681_vm0 = vcmask 195712   ;;  %vm4685_vm14 = vcmask 261312  }
 0x4db   : > { %v3905_v39 = vsub.f32 1.0, %v3904_v47 }
 0x4dc   : > { %v4485_v4 = vld [vmem:[#allocation1] sm:$0xff] }
 0x4dd   : > { %4486 = vst [vmem:[#allocation1] ss:$9 sm:$0xff] %v4201_v38  ;;  %4640 = vperm.xlu0 %5211, %v4485_v4   ;;  %v9094_v38 = vadd.s32 4294967288, %v9089_v27  ;;  %v3899_v4 = vand.u32 2147483648, %v9062_v40  ;;  %v5082_v40 = vmul.f32 -1.442695, %v3381_v33  ;;  %v3906_v30 = vmul.f32 %v9086_v55, %v3905_v39 }
 0x4de   : > { %4487 = vst [vmem:[#allocation1 + $0x1] ss:$9 sm:$0xff] %v4202_v32  ;;  %v4223_v32 = vperm.slane %v3886_v24, 6 }
 0x4df   : > { %4488 = vst [vmem:[#allocation1 + $0x2] ss:$9 sm:$0xff] %v4203_v60  ;;  %v4581_v60 = vpop.permute.xlu2 %4580 }
 0x4e0   : > { %4489 = vst [vmem:[#allocation1 + $0x3] ss:$9 sm:$0xff] %v4204_v43  ;;  %v5456_v43 = vpop.eup %5455 }
 0x4e1   : > { %4490 = vst [vmem:[#allocation1 + $0x4] ss:$9 sm:$0xff] %v4205_v3  ;;  %v4224_v3 = vperm.slane %v3886_v24, 7  ;;  %v9107_v54 = vadd.f32 1.0, %v5456_v43 }
 0x4e2   : > { %4491 = vst [vmem:[#allocation1 + $0x5] ss:$9 sm:$0xff] %v4206_v8  ;;  %v4578_v8 = vpop.permute.xlu1 %4577 }
 0x4e3   : > { %4492 = vst [vmem:[#allocation1 + $0x6] ss:$9 sm:$0xff] %v4207_v14  ;;  %v4676_v14 = vperm.slane %v4581_v60, %v9094_v38  ;;  %v4674_v63 = vperm.slane %v4578_v8, %v9089_v27  ;;  %5457 = vrcp.f32 %v9107_v54  ;;  %vm3923_vm3 = vweird.f32 %v9107_v54 }
 0x4e4   : > { %4493 = vst [vmem:[#allocation1 + $0x7] ss:$9 sm:$0xff] %v4208_v1  ;;  %v3900_v1 = vor.u32 1.1754944e-38, %v3899_v4  ;;  %5459 = vpow2.f32 %v5082_v40 }
 0x4e5   : > { %v9110_v45 = vsel %vm4677_vm12, %v4676_v14, %v4674_v63 }
 0x4e6   : > { %v3901_v17 = vsel %vm3898_vm13, %v3900_v1, %v3896_v19 }
 0x4e7   : > { %v4225_v35 = vperm.slane %v3901_v17, 0  ;;  %v4226_v9 = vperm.slane %v3901_v17, 1  ;;  %v4228_v5 = vperm.slane %v3901_v17, 3  ;;  %v4229_v20 = vperm.slane %v3901_v17, 4 }
 0x4e8   : > { %v4231_v62 = vperm.slane %v3901_v17, 6 }
 0x4eb   : > { %v4494_v7 = vld [vmem:[#allocation1] sm:$0xff] }
 0x4ec   : > { %4495 = vst [vmem:[#allocation1] ss:$9 sm:$0xff] %v4209_v41  ;;  %4643 = vperm.xlu2 %5210, %v4494_v7   ;;  %v4227_v41 = vperm.slane %v3901_v17, 2  ;;  %v3907_v7 = vadd.f32 %v9086_v55, %v3906_v30  ;;  %v3350_v63 = vpop.xlane.xlu0 %3349 }
 0x4ed   : > { %4496 = vst [vmem:[#allocation1 + $0x1] ss:$9 sm:$0xff] %v4210_v51  ;;  %v3914_v51 = vand.u32 2147483648, %v9078_v42 }
 0x4ee   : > { %4497 = vst [vmem:[#allocation1 + $0x2] ss:$9 sm:$0xff] %v4211_v21  ;;  %v5458_v21 = vpop.eup %5457  ;;  %v3911_v2 = vsel %vm3910_vm15, %v9086_v55, %v3907_v7  ;;  %v3929_v55 = vand.u32 2147483648, %v9107_v54  ;;  %vm4689_vm15 = vcmask 326912  }
 0x4ef   : > { %4498 = vst [vmem:[#allocation1 + $0x3] ss:$9 sm:$0xff] %v4212_v44  ;;  %v4230_v44 = vperm.slane %v3901_v17, 5  ;;  %v5460_v56 = vpop.eup %5459  ;;  %v3919_v16 = vmul.f32 %v5458_v21, %v9107_v54  ;;  %vm3924_vm2 = vweird.f32 %v5458_v21 }
 0x4f0   : > { %4499 = vst [vmem:[#allocation1 + $0x4] ss:$9 sm:$0xff] %v4213_v15  ;;  %v3912_v15 = vand.u32 2147483647, %v9078_v42  ;;  %v9123_v37 = vadd.f32 1.0, %v5460_v56  ;;  %vm3925_vm4 = vmor %vm3923_vm3, %vm3924_vm2  ;;  %vm4693_vm2 = vcmask 392512  }
 0x4f1   : > { %4500 = vst [vmem:[#allocation1 + $0x5] ss:$9 sm:$0xff] %v4214_v6  ;;  %v4232_v6 = vperm.slane %v3901_v17, 7  ;;  %v3920_v46 = vsub.f32 1.0, %v3919_v16 }
 0x4f2   : > { %4501 = vst [vmem:[#allocation1 + $0x6] ss:$9 sm:$0xff] %v4215_v13  ;;  %v3915_v13 = vor.u32 1.1754944e-38, %v3914_v51  ;;  %vm3913_vm1 = vcmp.eq.f32.partialorder %v3912_v15, 8.507059e+37  ;;  %5461 = vrcp.f32 %v9123_v37  ;;  %v3944_v30 = vand.u32 2147483648, %v9123_v37  ;;  %v4587_v15 = vpop.permute.xlu2 %4586 }
 0x4f3   : > { %4502 = vst [vmem:[#allocation1 + $0x7] ss:$9 sm:$0xff] %v4216_v11  ;;  %v3921_v29 = vmul.f32 %v5458_v21, %v3920_v46  ;;  %5463 = vpow2.f32 %v5083_v34  ;;  %vm3938_vm6 = vweird.f32 %v9123_v37 }
 0x4f4   : > { %v3916_v11 = vsel %vm3913_vm1, %v3915_v13, %v3911_v2 }
 0x4f5   : > { %v4233_v23 = vperm.slane %v3916_v11, 0  ;;  %v4234_v42 = vperm.slane %v3916_v11, 1  ;;  %v4235_v12 = vperm.slane %v3916_v11, 2  ;;  %v4236_v61 = vperm.slane %v3916_v11, 3 }
 0x4f6   : > { %v4238_v49 = vperm.slane %v3916_v11, 5  ;;  %v3922_v59 = vadd.f32 %v5458_v21, %v3921_v29  ;;  %v9165_v29 = vadd.s32 4294967264, %v9089_v27 }
 0x4f8   : > { %v3926_v25 = vsel %vm3925_vm4, %v5458_v21, %v3922_v59 }
 0x4fa   : > { %v4503_v50 = vld [vmem:[#allocation1] sm:$0xff] }
 0x4fb   : > { %4504 = vst [vmem:[#allocation1] ss:$9 sm:$0xff] %v4217_v0  ;;  %4646 = vperm.xlu1 %5209, %v4503_v50   ;;  %v4237_v0 = vperm.slane %v3916_v11, 4  ;;  %v9126_v50 = vpop.eup %5461 }
 0x4fc   : > { %4505 = vst [vmem:[#allocation1 + $0x1] ss:$9 sm:$0xff] %v4218_v28  ;;  %v4239_v28 = vperm.slane %v3916_v11, 6  ;;  %v3934_v26 = vmul.f32 %v9126_v50, %v9123_v37  ;;  %vm3939_vm5 = vweird.f32 %v9126_v50 }
 0x4fd   : > { %4506 = vst [vmem:[#allocation1 + $0x2] ss:$9 sm:$0xff] %v4219_v10  ;;  %v4240_v10 = vperm.slane %v3916_v11, 7  ;;  %vm3940_vm7 = vmor %vm3938_vm6, %vm3939_vm5 }
 0x4fe   : > { %4507 = vst [vmem:[#allocation1 + $0x3] ss:$9 sm:$0xff] %v4220_v53  ;;  %v5464_v53 = vpop.eup %5463  ;;  %v3935_v43 = vsub.f32 1.0, %v3934_v26  ;;  %v4593_v26 = vpop.permute.xlu2 %4592 }
 0x4ff   : > { %4508 = vst [vmem:[#allocation1 + $0x4] ss:$9 sm:$0xff] %v4221_v18  ;;  %v3927_v18 = vand.u32 2147483647, %v9107_v54  ;;  %v9135_v4 = vadd.f32 1.0, %v5464_v53 }
 0x500   : > { %4509 = vst [vmem:[#allocation1 + $0x5] ss:$9 sm:$0xff] %v4222_v48  ;;  %v3383_v48 = vadd.f32 %v7795_v22, %v9081_v58  ;;  %v3936_v58 = vmul.f32 %v9126_v50, %v3935_v43 }
 0x501   : > { %4510 = vst [vmem:[#allocation1 + $0x6] ss:$9 sm:$0xff] %v4223_v32  ;;  %v3930_v32 = vor.u32 1.1754944e-38, %v3929_v55  ;;  %vm3928_vm8 = vcmp.eq.f32.partialorder %v3927_v18, 8.507059e+37  ;;  %5465 = vrcp.f32 %v9135_v4  ;;  %v3957_v46 = vand.u32 2147483647, %v9135_v4 }
 0x502   : > { %4511 = vst [vmem:[#allocation1 + $0x7] ss:$9 sm:$0xff] %v4224_v3  ;;  %v5084_v47 = vmul.f32 -1.442695, %v3383_v48  ;;  %v3937_v39 = vadd.f32 %v9126_v50, %v3936_v58  ;;  %vm3953_vm11 = vweird.f32 %v9135_v4  ;;  %v9182_v55 = vadd.s32 4294967256, %v9089_v27 }
 0x503   : > { %v3931_v60 = vsel %vm3928_vm8, %v3930_v32, %v3926_v25  ;;  %vm3958_vm1 = vcmp.eq.f32.partialorder %v3957_v46, 8.507059e+37 }
 0x504   : > { %v4241_v3 = vperm.slane %v3931_v60, 0  ;;  %5467 = vpow2.f32 %v5084_v47  ;;  %v4242_v57 = vperm.slane %v3931_v60, 1  ;;  %v4243_v33 = vperm.slane %v3931_v60, 2 }
 0x505   : > { %v4244_v14 = vperm.slane %v3931_v60, 3  ;;  %v4245_v19 = vperm.slane %v3931_v60, 4  ;;  %v4246_v54 = vperm.slane %v3931_v60, 5  ;;  %v4247_v40 = vperm.slane %v3931_v60, 6 }
 0x506   : > { %v4692_v43 = vperm.slane %v4593_v26, %v9182_v55 }
 0x507   : > { %v9139_v1 = vpop.eup %5465 }
 0x508   : > { %vm3954_vm10 = vweird.f32 %v9139_v1 }
 0x509   : > { %v4512_v52 = vld [vmem:[#allocation1] sm:$0xff]  ;;  %vm9170_vm13 = vmor %vm3953_vm11, %vm3954_vm10  ;;  %vm4697_vm11 = vcmask 458112  }
 0x50a   : > { %4513 = vst [vmem:[#allocation1] ss:$9 sm:$0xff] %v4225_v35  ;;  %4649 = vperm.xlu0 %5211, %v4512_v52   ;;  %v5468_v17 = vpop.eup %5467  ;;  %v3384_v35 = vadd.f32 %v7795_v22, %v3350_v63  ;;  %v4248_v52 = vperm.slane %v3931_v60, 7 }
 0x50b   : > { %4514 = vst [vmem:[#allocation1 + $0x1] ss:$9 sm:$0xff] %v4226_v9  ;;  %v3942_v9 = vand.u32 2147483647, %v9123_v37  ;;  %v9150_v7 = vadd.f32 1.0, %v5468_v17 }
 0x50c   : > { %4515 = vst [vmem:[#allocation1 + $0x2] ss:$9 sm:$0xff] %v4227_v41  ;;  %v3949_v41 = vmul.f32 %v9139_v1, %v9135_v4  ;;  %v5085_v51 = vmul.f32 -1.442695, %v3384_v35 }
 0x50d   : > { %4516 = vst [vmem:[#allocation1 + $0x3] ss:$9 sm:$0xff] %v4228_v5  ;;  %v3941_v5 = vsel %vm3940_vm7, %v9126_v50, %v3937_v39  ;;  %vm3943_vm9 = vcmp.eq.f32.partialorder %v3942_v9, 8.507059e+37  ;;  %5469 = vrcp.f32 %v9150_v7  ;;  %v4590_v50 = vpop.permute.xlu1 %4589  ;;  %vm3968_vm4 = vweird.f32 %v9150_v7 }
 0x50e   : > { %4517 = vst [vmem:[#allocation1 + $0x4] ss:$9 sm:$0xff] %v4229_v20  ;;  %v3945_v20 = vor.u32 1.1754944e-38, %v3944_v30  ;;  %v3950_v22 = vsub.f32 1.0, %v3949_v41  ;;  %5471 = vpow2.f32 %v5085_v51  ;;  %v4688_v25 = vperm.slane %v4590_v50, %v9165_v29 }
 0x50f   : > { %4518 = vst [vmem:[#allocation1 + $0x5] ss:$9 sm:$0xff] %v4230_v44 }
 0x510   : > { %4519 = vst [vmem:[#allocation1 + $0x6] ss:$9 sm:$0xff] %v4231_v62  ;;  %v3946_v21 = vsel %vm3943_vm9, %v3945_v20, %v3941_v5  ;;  %v3951_v62 = vmul.f32 %v9139_v1, %v3950_v22 }
 0x511   : > { %4520 = vst [vmem:[#allocation1 + $0x7] ss:$9 sm:$0xff] %v4232_v6  ;;  %v4249_v44 = vperm.slane %v3946_v21, 0  ;;  %v4250_v56 = vperm.slane %v3946_v21, 1  ;;  %v4251_v2 = vperm.slane %v3946_v21, 2  ;;  %v4252_v16 = vperm.slane %v3946_v21, 3 }
 0x512   : > { %v4253_v36 = vperm.slane %v3946_v21, 4  ;;  %v3952_v37 = vadd.f32 %v9139_v1, %v3951_v62  ;;  %v4254_v34 = vperm.slane %v3946_v21, 5 }
 0x513   : > { %v9154_v13 = vpop.eup %5469 }
 0x514   : > { %v5472_v11 = vpop.eup %5471  ;;  %vm3969_vm3 = vweird.f32 %v9154_v13 }
 0x515   : > { %v9176_v59 = vadd.f32 1.0, %v5472_v11  ;;  %vm3970_vm8 = vmor %vm3968_vm4, %vm3969_vm3  ;;  %vm4729_vm3 = vcmask 982912   ;;  %vm4733_vm4 = vcmask 1048512  }
 0x517   : > { %5473 = vrcp.f32 %v9176_v59  ;;  %vm3983_vm7 = vweird.f32 %v9176_v59 }
 0x518   : > { %v4521_v24 = vld [vmem:[#allocation1] sm:$0xff] }
 0x519   : > { %4522 = vst [vmem:[#allocation1] ss:$9 sm:$0xff] %v4233_v23  ;;  %4652 = vperm.xlu2 %5210, %v4521_v24   ;;  %v3959_v23 = vand.u32 2147483648, %v9135_v4  ;;  %v4256_v24 = vperm.slane %v3946_v21, 7 }
 0x51a   : > { %4523 = vst [vmem:[#allocation1 + $0x1] ss:$9 sm:$0xff] %v4234_v42  ;;  %v4255_v42 = vperm.slane %v3946_v21, 6 }
 0x51b   : > { %4524 = vst [vmem:[#allocation1 + $0x2] ss:$9 sm:$0xff] %v4235_v12  ;;  %v9161_v12 = vadd.s32 4294967272, %v9089_v27  ;;  %v3960_v18 = vor.u32 1.1754944e-38, %v3959_v23 }
 0x51c   : > { %4525 = vst [vmem:[#allocation1 + $0x3] ss:$9 sm:$0xff] %v4236_v61  ;;  %v9168_v61 = vadd.s32 4294967280, %v9089_v27 }
 0x51d   : > { %4526 = vst [vmem:[#allocation1 + $0x4] ss:$9 sm:$0xff] %v4237_v0  ;;  %v4584_v0 = vpop.permute.xlu0 %4583  ;;  %v4684_v48 = vperm.slane %v4587_v15, %v9161_v12  ;;  %v5474_v63 = vpop.eup %5473 }
 0x51e   : > { %4527 = vst [vmem:[#allocation1 + $0x5] ss:$9 sm:$0xff] %v4238_v49  ;;  %v4680_v53 = vperm.slane %v4584_v0, %v9168_v61  ;;  %v3979_v30 = vmul.f32 %v5474_v63, %v9176_v59  ;;  %vm3984_vm6 = vweird.f32 %v5474_v63 }
 0x51f   : > { %4528 = vst [vmem:[#allocation1 + $0x6] ss:$9 sm:$0xff] %v4239_v28  ;;  %v3964_v28 = vmul.f32 %v9154_v13, %v9150_v7  ;;  %vm3985_vm9 = vmor %vm3983_vm7, %vm3984_vm6 }
 0x520   : > { %4529 = vst [vmem:[#allocation1 + $0x7] ss:$9 sm:$0xff] %v4240_v10  ;;  %v3956_v10 = vsel %vm9170_vm13, %v9139_v1, %v3952_v37  ;;  %v4682_v32 = vsel %vm4681_vm0, %v4680_v53, %v9110_v45  ;;  %v3980_v5 = vsub.f32 1.0, %v3979_v30  ;;  %v4596_v53 = vpop.permute.xlu1 %4595  ;;  %vm4701_vm13 = vcmask 523712  }
 0x521   : > { %v3961_v4 = vsel %vm3958_vm1, %v3960_v18, %v3956_v10  ;;  %v3965_v47 = vsub.f32 1.0, %v3964_v28  ;;  %v4686_v60 = vsel %vm4685_vm14, %v4684_v48, %v4682_v32  ;;  %v4599_v18 = vpop.permute.xlu2 %4598  ;;  %vm4705_vm1 = vcmask 589312  }
 0x522   : > { %v4259_v45 = vperm.slane %v3961_v4, 2  ;;  %v4261_v1 = vperm.slane %v3961_v4, 4  ;;  %v4263_v17 = vperm.slane %v3961_v4, 6  ;;  %v4264_v35 = vperm.slane %v3961_v4, 7 }
 0x523   : > { %v3981_v51 = vmul.f32 %v5474_v63, %v3980_v5 }
 0x527   : > { %v4530_v8 = vld [vmem:[#allocation1] sm:$0xff] }
 0x528   : > { %4655 = vperm.xlu1 %5209, %v4530_v8   ;;  %4531 = vst [vmem:[#allocation1] ss:$9 sm:$0xff] %v4241_v3  ;;  %v4690_v3 = vsel %vm4689_vm15, %v4688_v25, %v4686_v60  ;;  %v4258_v8 = vperm.slane %v3961_v4, 1  ;;  %v4602_v48 = vpop.permute.xlu1 %4601  ;;  %v4605_v25 = vpop.permute.xlu0 %4604 }
 0x529   : > { %4532 = vst [vmem:[#allocation1 + $0x1] ss:$9 sm:$0xff] %v4242_v57  ;;  %v4257_v57 = vperm.slane %v3961_v4, 0  ;;  %v9194_v58 = vsel %vm4693_vm2, %v4692_v43, %v4690_v3  ;;  %v4608_v26 = vpop.permute.xlu2 %4607 }
 0x52a   : > { %4533 = vst [vmem:[#allocation1 + $0x2] ss:$9 sm:$0xff] %v4243_v33  ;;  %v3966_v33 = vmul.f32 %v9154_v13, %v3965_v47 }
 0x52b   : > { %4534 = vst [vmem:[#allocation1 + $0x3] ss:$9 sm:$0xff] %v4244_v14 }
 0x52c   : > { %4535 = vst [vmem:[#allocation1 + $0x4] ss:$9 sm:$0xff] %v4245_v19  ;;  %v4260_v19 = vperm.slane %v3961_v4, 3  ;;  %v3967_v39 = vadd.f32 %v9154_v13, %v3966_v33 }
 0x52d   : > { %4536 = vst [vmem:[#allocation1 + $0x5] ss:$9 sm:$0xff] %v4246_v54  ;;  %v4262_v54 = vperm.slane %v3961_v4, 5 }
 0x52e   : > { %4537 = vst [vmem:[#allocation1 + $0x6] ss:$9 sm:$0xff] %v4247_v40  ;;  %v3974_v40 = vand.u32 2147483648, %v9150_v7  ;;  %v3971_v9 = vsel %vm3970_vm8, %v9154_v13, %v3967_v39  ;;  %v4699_v39 = vadd.s32 4294967240, %v9089_v27  ;;  %vm4767_vm8 = vcmask 1040384  }
 0x52f   : > { %4538 = vst [vmem:[#allocation1 + $0x7] ss:$9 sm:$0xff] %v4248_v52  ;;  %v3972_v52 = vand.u32 2147483647, %v9150_v7 }
 0x530   : > { %v3975_v41 = vor.u32 1.1754944e-38, %v3974_v40  ;;  %v9207_v32 = vpop.permute.xlu1 %4610  ;;  %v9211_v47 = vpop.permute.xlu0 %4613 }
 0x531   : > { %vm3973_vm5 = vcmp.eq.f32.partialorder %v3972_v52, 8.507059e+37  ;;  %v9209_v4 = vpop.permute.xlu2 %4616  ;;  %v4703_v52 = vadd.s32 4294967232, %v9089_v27 }
 0x532   : > { %v3976_v20 = vsel %vm3973_vm5, %v3975_v41, %v3971_v9  ;;  %vm4772_vm5 = vcmp.lt.s32.totalorder %v9527_v31, 256 }
 0x533   : > { %v4265_v22 = vperm.slane %v3976_v20, 0  ;;  %v4266_v21 = vperm.slane %v3976_v20, 1  ;;  %v4267_v15 = vperm.slane %v3976_v20, 2  ;;  %v4268_v62 = vperm.slane %v3976_v20, 3 }
 0x534   : > { %v4269_v7 = vperm.slane %v3976_v20, 4  ;;  %v4271_v13 = vperm.slane %v3976_v20, 6 }
 0x536   : > { %v4539_v6 = vld [vmem:[#allocation1] sm:$0xff] }
 0x537   : > { %4658 = vperm.xlu0 %5211, %v4539_v6   ;;  %4540 = vst [vmem:[#allocation1] ss:$9 sm:$0xff] %v4249_v44  ;;  %v3989_v6 = vand.u32 2147483648, %v9176_v59 }
 0x538   : > { %4541 = vst [vmem:[#allocation1 + $0x1] ss:$9 sm:$0xff] %v4250_v56  ;;  %v3982_v56 = vadd.f32 %v5474_v63, %v3981_v51  ;;  %v9213_v60 = vpop.permute.xlu1 %4619  ;;  %v9215_v3 = vpop.permute.xlu0 %4622 }
 0x539   : > { %4542 = vst [vmem:[#allocation1 + $0x2] ss:$9 sm:$0xff] %v4251_v2  ;;  %v4270_v2 = vperm.slane %v3976_v20, 5  ;;  %v3990_v37 = vor.u32 1.1754944e-38, %v3989_v6  ;;  %v4626_v43 = vpop.permute.xlu2 %4625 }
 0x53a   : > { %4543 = vst [vmem:[#allocation1 + $0x3] ss:$9 sm:$0xff] %v4252_v16  ;;  %v3987_v16 = vand.u32 2147483647, %v9176_v59  ;;  %v3986_v11 = vsel %vm3985_vm9, %v5474_v63, %v3982_v56  ;;  %v4711_v56 = vadd.s32 4294967216, %v9089_v27 }
 0x53b   : > { %4544 = vst [vmem:[#allocation1 + $0x4] ss:$9 sm:$0xff] %v4253_v36  ;;  %v4272_v36 = vperm.slane %v3976_v20, 7 }
 0x53c   : > { %4545 = vst [vmem:[#allocation1 + $0x5] ss:$9 sm:$0xff] %v4254_v34  ;;  %vm3988_vm10 = vcmp.eq.f32.partialorder %v3987_v16, 8.507059e+37 }
 0x53d   : > { %4546 = vst [vmem:[#allocation1 + $0x6] ss:$9 sm:$0xff] %v4255_v42  ;;  %v3991_v46 = vsel %vm3988_vm10, %v3990_v37, %v3986_v11  ;;  %v4719_v11 = vadd.s32 4294967200, %v9089_v27  ;;  %v4715_v37 = vadd.s32 4294967208, %v9089_v27 }
 0x53e   : > { %4547 = vst [vmem:[#allocation1 + $0x7] ss:$9 sm:$0xff] %v4256_v24  ;;  %v4273_v34 = vperm.slane %v3991_v46, 0  ;;  %v4274_v23 = vperm.slane %v3991_v46, 1  ;;  %v4275_v42 = vperm.slane %v3991_v46, 2  ;;  %v4276_v24 = vperm.slane %v3991_v46, 3 }
 0x53f   : > { %v4277_v49 = vperm.slane %v3991_v46, 4  ;;  %v4278_v28 = vperm.slane %v3991_v46, 5  ;;  %v4279_v50 = vperm.slane %v3991_v46, 6  ;;  %v4280_v59 = vperm.slane %v3991_v46, 7 }
 0x540   : > { %v4632_v33 = vpop.permute.xlu0 %4631 }
 0x545   : > { %v4548_v14 = vld [vmem:[#allocation1] sm:$0xff] }
 0x546   : > { %4661 = vperm.xlu2 %5210, %v4548_v14   ;;  %4549 = vst [vmem:[#allocation1] ss:$9 sm:$0xff] %v4257_v57  ;;  %v4629_v57 = vpop.permute.xlu1 %4628 }
 0x547   : > { %4550 = vst [vmem:[#allocation1 + $0x1] ss:$9 sm:$0xff] %v4258_v8  ;;  %v4635_v8 = vpop.permute.xlu2 %4634 }
 0x548   : > { %4551 = vst [vmem:[#allocation1 + $0x2] ss:$9 sm:$0xff] %v4259_v45  ;;  %v4695_v45 = vadd.s32 4294967248, %v9089_v27  ;;  %v4740_v5 = vperm.slane %v4635_v8, %v9161_v12 }
 0x549   : > { %4552 = vst [vmem:[#allocation1 + $0x3] ss:$9 sm:$0xff] %v4260_v19 }
 0x54a   : > { %4553 = vst [vmem:[#allocation1 + $0x4] ss:$9 sm:$0xff] %v4261_v1  ;;  %v4736_v1 = vperm.slane %v4629_v57, %v9094_v38  ;;  %v4696_v40 = vperm.slane %v4596_v53, %v4695_v45  ;;  %v4700_v38 = vperm.slane %v4599_v18, %v4699_v39  ;;  %v4723_v53 = vadd.s32 4294967192, %v9089_v27 }
 0x54b   : > { %4554 = vst [vmem:[#allocation1 + $0x5] ss:$9 sm:$0xff] %v4262_v54  ;;  %v4738_v54 = vperm.slane %v4632_v33, %v9168_v61  ;;  %v4707_v61 = vadd.s32 4294967224, %v9089_v27  ;;  %v4727_v33 = vadd.s32 4294967184, %v9089_v27 }
 0x54c   : > { %4555 = vst [vmem:[#allocation1 + $0x6] ss:$9 sm:$0xff] %v4263_v17  ;;  %v4735_v17 = vperm.slane %v4626_v43, %v9089_v27  ;;  %v4698_v9 = vsel %vm4697_vm11, %v4696_v40, %v9194_v58  ;;  %v4724_v8 = vperm.slane %v9209_v4, %v4723_v53 }
 0x54d   : > { %4556 = vst [vmem:[#allocation1 + $0x7] ss:$9 sm:$0xff] %v4264_v35 }
 0x54e   : > { %v4638_v14 = vpop.permute.xlu1 %4637  ;;  %v4737_v35 = vsel %vm4677_vm12, %v4736_v1, %v4735_v17  ;;  %vm4709_vm12 = vcmask 654912  }
 0x54f   : > { %v4644_v63 = vpop.permute.xlu2 %4643  ;;  %v4641_v19 = vpop.permute.xlu0 %4640  ;;  %v4739_v41 = vsel %vm4681_vm0, %v4738_v54, %v4737_v35  ;;  %v4742_v58 = vperm.slane %v4638_v14, %v9165_v29  ;;  %vm4713_vm0 = vcmask 720512   ;;  %v4712_v29 = vperm.slane %v4608_v26, %v4711_v56 }
 0x554   : > { %v4557_v44 = vld [vmem:[#allocation1] sm:$0xff] }
 0x555   : > { %4664 = vperm.xlu1 %5209, %v4557_v44   ;;  %4558 = vst [vmem:[#allocation1] ss:$9 sm:$0xff] %v4265_v22  ;;  %v4702_v22 = vsel %vm4701_vm13, %v4700_v38, %v4698_v9  ;;  %v4744_v44 = vperm.slane %v4641_v19, %v9182_v55 }
 0x556   : > { %4559 = vst [vmem:[#allocation1 + $0x1] ss:$9 sm:$0xff] %v4266_v21  ;;  %v4741_v21 = vsel %vm4685_vm14, %v4740_v5, %v4739_v41  ;;  %vm4717_vm14 = vcmask 786112  }
 0x557   : > { %4560 = vst [vmem:[#allocation1 + $0x2] ss:$9 sm:$0xff] %v4267_v15  ;;  %v4704_v15 = vperm.slane %v4602_v48, %v4703_v52  ;;  %v4743_v12 = vsel %vm4689_vm15, %v4742_v58, %v4741_v21  ;;  %vm4721_vm15 = vcmask 851712  }
 0x558   : > { %4561 = vst [vmem:[#allocation1 + $0x3] ss:$9 sm:$0xff] %v4268_v62  ;;  %v4708_v62 = vperm.slane %v4605_v25, %v4707_v61 }
 0x559   : > { %4562 = vst [vmem:[#allocation1 + $0x4] ss:$9 sm:$0xff] %v4269_v7  ;;  %v4706_v7 = vsel %vm4705_vm1, %v4704_v15, %v4702_v22 }
 0x55a   : > { %4563 = vst [vmem:[#allocation1 + $0x5] ss:$9 sm:$0xff] %v4270_v2  ;;  %v4745_v2 = vsel %vm4693_vm2, %v4744_v44, %v4743_v12  ;;  %v4710_v55 = vsel %vm4709_vm12, %v4708_v62, %v4706_v7  ;;  %vm4725_vm2 = vcmask 917312  }
 0x55b   : > { %4564 = vst [vmem:[#allocation1 + $0x6] ss:$9 sm:$0xff] %v4271_v13  ;;  %v4746_v13 = vperm.slane %v4644_v63, %v4695_v45 }
 0x55c   : > { %4565 = vst [vmem:[#allocation1 + $0x7] ss:$9 sm:$0xff] %v4272_v36 }
 0x55d   : > { %v4747_v46 = vsel %vm4697_vm11, %v4746_v13, %v4745_v2 }
 0x563   : > { %v4566_v0 = vld [vmem:[#allocation1] sm:$0xff] }
 0x564   : > { %4667 = vperm.xlu0 %5211, %v4566_v0   ;;  %4567 = vst [vmem:[#allocation1] ss:$9 sm:$0xff] %v4273_v34 }
 0x565   : > { %4568 = vst [vmem:[#allocation1 + $0x1] ss:$9 sm:$0xff] %v4274_v23 }
 0x566   : > { %4569 = vst [vmem:[#allocation1 + $0x2] ss:$9 sm:$0xff] %v4275_v42 }
 0x567   : > { %4570 = vst [vmem:[#allocation1 + $0x3] ss:$9 sm:$0xff] %v4276_v24  ;;  %v4714_v24 = vsel %vm4713_vm0, %v4712_v29, %v4710_v55 }
 0x568   : > { %4571 = vst [vmem:[#allocation1 + $0x4] ss:$9 sm:$0xff] %v4277_v49 }
 0x569   : > { %4572 = vst [vmem:[#allocation1 + $0x5] ss:$9 sm:$0xff] %v4278_v28  ;;  %v4720_v28 = vperm.slane %v9211_v47, %v4719_v11  ;;  %v4731_v47 = vadd.s32 4294967176, %v9089_v27  ;;  %v4728_v27 = vperm.slane %v9213_v60, %v4727_v33 }
 0x56a   : > { %4573 = vst [vmem:[#allocation1 + $0x6] ss:$9 sm:$0xff] %v4279_v50 }
 0x56b   : > { %4574 = vst [vmem:[#allocation1 + $0x7] ss:$9 sm:$0xff] %v4280_v59 }
 0x56d   : > { %v4647_v30 = vpop.permute.xlu1 %4646 }
 0x56e   : > { %v4748_v16 = vperm.slane %v4647_v30, %v4699_v39  ;;  %v4732_v39 = vperm.slane %v9215_v3, %v4731_v47 }
 0x570   : > { %v4749_v42 = vsel %vm4701_vm13, %v4748_v16, %v4747_v46 }
 0x572   : > { %v4575_v10 = vld [vmem:[#allocation1] sm:$0xff] }
 0x573   : > { %4670 = vperm.xlu2 %5210, %v4575_v10   ;;  %v4653_v20 = vpop.permute.xlu2 %4652  ;;  %v4716_v10 = vperm.slane %v9207_v32, %v4715_v37 }
 0x574   : > { %v4752_v50 = vperm.slane %v4653_v20, %v4707_v61 }
 0x575   : > { %v4718_v26 = vsel %vm4717_vm14, %v4716_v10, %v4714_v24 }
 0x576   : > { %v4722_v43 = vsel %vm4721_vm15, %v4720_v28, %v4718_v26 }
 0x577   : > { %v4726_v19 = vsel %vm4725_vm2, %v4724_v8, %v4722_v43 }
 0x578   : > { %v4730_v35 = vsel %vm4729_vm3, %v4728_v27, %v4726_v19 }
 0x579   : > { %v4734_v9 = vsel %vm4733_vm4, %v4732_v39, %v4730_v35 }
 0x57c   : > { %v4650_v51 = vpop.permute.xlu0 %4649 }
 0x57d   : > { %v4750_v36 = vperm.slane %v4650_v51, %v4703_v52 }
 0x57f   : > { %v4751_v0 = vsel %vm4705_vm1, %v4750_v36, %v4749_v42 }
 0x580   : > { %v4753_v48 = vsel %vm4709_vm12, %v4752_v50, %v4751_v0 }
 0x59a   : > { %v4656_v6 = vpop.permute.xlu1 %4655 }
 0x59b   : > { %v4754_v49 = vperm.slane %v4656_v6, %v4711_v56 }
 0x59d   : > { %v4755_v25 = vsel %vm4713_vm0, %v4754_v49, %v4753_v48 }
 0x5a0   : > { %v4662_v34 = vpop.permute.xlu2 %4661 }
 0x5a1   : > { %v4758_v14 = vperm.slane %v4662_v34, %v4719_v11 }
 0x5a9   : > { %v4659_v23 = vpop.permute.xlu0 %4658 }
 0x5aa   : > { %v4756_v59 = vperm.slane %v4659_v23, %v4715_v37 }
 0x5ac   : > { %v4757_v57 = vsel %vm4717_vm14, %v4756_v59, %v4755_v25 }
 0x5ad   : > { %v4759_v1 = vsel %vm4721_vm15, %v4758_v14, %v4757_v57 }
 0x5c7   : > { %v4665_v18 = vpop.permute.xlu1 %4664 }
 0x5c8   : > { %v4760_v32 = vperm.slane %v4665_v18, %v4723_v53 }
 0x5ca   : > { %v4761_v17 = vsel %vm4725_vm2, %v4760_v32, %v4759_v1 }
 0x5cd   : > { %v4671_v45 = vpop.permute.xlu2 %4670 }
 0x5ce   : > { %v4764_v4 = vperm.slane %v4671_v45, %v4731_v47 }
 0x5d6   : > { %v4668_v63 = vpop.permute.xlu0 %4667 }
 0x5d7   : > { %v4762_v54 = vperm.slane %v4668_v63, %v4727_v33 }
 0x5d9   : > { %v4763_v40 = vsel %vm4729_vm3, %v4762_v54, %v4761_v17 }
 0x5da   : > { %v4765_v30 = vsel %vm4733_vm4, %v4764_v4, %v4763_v40 }
 0x5db   : > { %v4766_v52 = vrot.slane %v4765_v30, 7 }
 0x5dd   : > { %v4768_v3 = vsel %vm4767_vm8, %v4734_v9, %v4766_v52 }
 0x5de   : > { %4774 = vst.msk [vmem:[%s543_s6] sm:$0x3] %vm4772_vm5, %v4768_v3 }
 0x5df   : > { %5512 = shalt.err (!%p5509_p1)
}
 0x5e0   : > { %5105 = dma.vmem_to_hbm [thread:$0]  (%p5704_p6), %s4789_s24, 32, %s4791_s25, %s4776_s27  }
 0x5e1 PF: > { %p5111_p2 = scmp.ge.s32.totalorder %s5579_s12, 2  ;;  %s4802_s14 = sand.u32 1, %s5567_s9  }
 0x5e2   : > { %s4803_s28 = scalar_lea.sflag [#allocation6], %s4802_s14 }
 0x5e3   : > { %p5108_p3 = pnand %p5111_p2, %p5708_p8 }
 0x5e5   : > { %p5109_p4 = pneg %p5108_p3 }
 0x5e7   : > { %5562 = dma.done.wait (%p5109_p4), %s4803_s28, 32  }
 0x5e8   : > { %5564 = vsyncadd (%p5109_p4), %s4803_s28, 4294967264  ;;  %p20_p5 = scmp.ge.s32.totalorder %s5690_s13, 8   ;;  %s9530_s9 = smov %s5571_s10 }
 0x5e9   : > { %s9531_s10 = smov %s5575_s11  ;;  %s9532_s11 = smov %s5702_s16 }
 0x5ea   : > { %s9533_s12 = smov %s5690_s13  ;;  %22 = sbr.rel (!%p20_p5) target bundleno = 6 (0x6), region = 182 }
 0x5ef   :  { %4809 = vsyncpa [#allocation6], 1 }
 0x5f0   :  { %4811 = vsyncpa [#allocation6 + $0x1], 1 }

</bundles_post_ra>
